<compile_context>
chip_gen: v7x
topology: tpu7x:2x2x1
jax: 0.10.0
libtpu: 0.0.40
codegen_flags: <defaults>
</compile_context>

<pallas_src>
import functools

import jax
import jax.numpy as jnp
from jax.experimental import pallas as pl
from jax.experimental.pallas import tpu as pltpu

_LAMBDAS = jnp.array([1.0, 1.0, 0.5, 0.5], jnp.float32)   # k=2: [1]*k + [0.5]*k
_INIT_V = jnp.array([1.0, 0.0, 0.0, 0.0], jnp.float32)    # [1] + [0]*(2k-1)
_EPS = 1e-5
_VMEM_LIMIT = 48 * 1024 * 1024   # > v5e 16 MiB default, < v7x 64 MiB physical


def _row_tile(total, target):
    """Largest divisor of `total` <= target, preferring sublane-aligned (x8) tiles."""
    target = max(1, min(total, target))
    for t in range(target - target % 8, 0, -8):   # multiples of 8 first
        if total % t == 0:
            return t
    for t in range(target, 0, -1):                 # fall back to any divisor
        if total % t == 0:
            return t
    return total


# ----------------------- pass-1 kernels: fused act -> conv -> stats -----------------------

def _mm_act_stats_kernel(x_ref, c_ref, w_ref, h_ref, s1_ref, s2_ref, xs_ref, *,
                         apply_act):
    # x: (1, TR, Cin) streamed (bf16); c: (1, 4, Cin) f32 resident coefs of the
    #    PREVIOUS stage's BN+DyReLU, folded: r = max(x*c0 + c2, x*c1 + c3)
    #    (ignored when apply_act=False, i.e. the raw block input).
    # w: (Cin, Cout) bf16 resident.  h: (1, TR, Cout) bf16 streamed output.
    # s1/s2: (1,1,Cout) f32 sum / sum-of-squares of h; xs: (1,1,Cin) f32 sum of
    #    the (activated) input -- all accumulated across the row-tile axis.
    @pl.when(pl.program_id(1) == 0)
    def _():
        s1_ref[...] = jnp.zeros_like(s1_ref)
        s2_ref[...] = jnp.zeros_like(s2_ref)
        xs_ref[...] = jnp.zeros_like(xs_ref)

    xin = x_ref[0].astype(jnp.float32)
    if apply_act:
        c = c_ref[0]
        r = jnp.maximum(xin * c[0:1, :] + c[2:3, :],
                        xin * c[1:2, :] + c[3:4, :])
    else:
        r = xin
    h = jnp.dot(r.astype(jnp.bfloat16), w_ref[...],
                preferred_element_type=jnp.float32)
    h_ref[0] = h.astype(h_ref.dtype)
    s1_ref[...] += jnp.sum(h, axis=0)[None, None, :]
    s2_ref[...] += jnp.sum(h * h, axis=0)[None, None, :]
    xs_ref[...] += jnp.sum(r, axis=0)[None, None, :]


def conv1x1_act_stats(x, coefs, w, row_tile, apply_act):
    """(optional BN+DyReLU of previous stage) -> 1x1 conv -> output channel stats."""
    N, HW, Cin = x.shape
    Cout = w.shape[1]
    TR = _row_tile(HW, row_tile)
    kern = functools.partial(_mm_act_stats_kernel, apply_act=apply_act)
    h, s1, s2, xs = pl.pallas_call(
        kern,
        grid=(N, HW // TR),
        in_specs=[pl.BlockSpec((1, TR, Cin), lambda n, t: (n, t, 0)),
                  pl.BlockSpec((1, 4, Cin), lambda n, t: (n, 0, 0)),
                  pl.BlockSpec((Cin, Cout), lambda n, t: (0, 0))],
        out_specs=(pl.BlockSpec((1, TR, Cout), lambda n, t: (n, t, 0)),
                   pl.BlockSpec((1, 1, Cout), lambda n, t: (n, 0, 0)),
                   pl.BlockSpec((1, 1, Cout), lambda n, t: (n, 0, 0)),
                   pl.BlockSpec((1, 1, Cin), lambda n, t: (n, 0, 0))),
        out_shape=(jax.ShapeDtypeStruct((N, HW, Cout), jnp.bfloat16),
                   jax.ShapeDtypeStruct((N, 1, Cout), jnp.float32),
                   jax.ShapeDtypeStruct((N, 1, Cout), jnp.float32),
                   jax.ShapeDtypeStruct((N, 1, Cin), jnp.float32)),
        compiler_params=pltpu.CompilerParams(
            dimension_semantics=("parallel", "arbitrary"),
            vmem_limit_bytes=_VMEM_LIMIT),
    )(x, coefs, w)
    return h, s1[:, 0], s2[:, 0], xs[:, 0]


def _conv3x3_act_stats_kernel(x_ref, c_ref, w_ref, h_ref, s1_ref, s2_ref,
                              awin_ref, sh_ref, *, TH, W):
    # x: (1, H*W, Cin) whole sample resident (bf16); c: (1, 4, Cin) f32 folded
    #    BN+DyReLU coefs of the previous stage; w: (9, Cin, Cout) bf16 taps.
    # h: (1, TH*W, Cout) bf16 streamed output; s1/s2: (1,1,Cout) f32 accumulators.
    # awin: ((TH+2)*W, Cin) f32 scratch: activated rows incl. 1-row halos.
    # sh: (2, (TH+2)*W, Cin) f32 scratch: column-shifted, pre-masked tap sources.
    t = pl.program_id(1)
    nt = pl.num_programs(1)
    rows = TH * W
    L = (TH + 2) * W
    Cin = x_ref.shape[-1]
    Cout = h_ref.shape[-1]
    base = pl.multiple_of(t * rows, rows)

    @pl.when(t == 0)
    def _():
        s1_ref[...] = jnp.zeros_like(s1_ref)
        s2_ref[...] = jnp.zeros_like(s2_ref)

    c = c_ref[0]

    def act(v):                      # previous stage's BN+DyReLU, folded coefs
        v = v.astype(jnp.float32)
        return jnp.maximum(v * c[0:1, :] + c[2:3, :],
                           v * c[1:2, :] + c[3:4, :])

    # Activated window [1 halo row | TH rows | 1 halo row]; only the border halo
    # rows are ever zero-filled -- no full-slab memset.
    awin_ref[W:W + rows, :] = act(x_ref[0, pl.ds(base, rows), :])

    @pl.when(t == 0)
    def _():
        awin_ref[0:W, :] = jnp.zeros((W, Cin), awin_ref.dtype)

    @pl.when(t > 0)
    def _():
        awin_ref[0:W, :] = act(x_ref[0, pl.ds(base - W, W), :])

    @pl.when(t == nt - 1)
    def _():
        awin_ref[W + rows:L, :] = jnp.zeros((W, Cin), awin_ref.dtype)

    @pl.when(t < nt - 1)
    def _():
        awin_ref[W + rows:L, :] = act(x_ref[0, pl.ds(base + rows, W), :])

    # Column-shifted tap sources built ONCE per tile (2 masks instead of 6):
    #   sh[0][j] = awin[j-1], zeroed where the output column == 0     (kw=0 taps)
    #   sh[1][j] = awin[j+1], zeroed where the output column == W-1   (kw=2 taps)
    # Both masks reduce to the same "stored row is in column W-1" iota test.
    edge = (jax.lax.broadcasted_iota(jnp.int32, (L - 1, 1), 0) % W) == (W - 1)
    lo_rows = awin_ref[pl.ds(0, L - 1), :]
    hi_rows = awin_ref[pl.ds(1, L - 1), :]
    sh_ref[0, pl.ds(1, L - 1), :] = jnp.where(edge, jnp.zeros_like(lo_rows), lo_rows)
    sh_ref[0, 0:1, :] = jnp.zeros((1, Cin), sh_ref.dtype)
    sh_ref[1, pl.ds(0, L - 1), :] = jnp.where(edge, jnp.zeros_like(hi_rows), hi_rows)
    sh_ref[1, L - 1:L, :] = jnp.zeros((1, Cin), sh_ref.dtype)

    # 9 taps; every patch read starts at a multiple of W (sublane-aligned when
    # W % 8 == 0), bf16 operands on the MXU, f32 accumulation.
    # TODO(synk): for Cin < 128 the three kw taps could also be concatenated
    # along the contraction dim (3 MXU pushes instead of 9).
    acc = jnp.zeros((rows, Cout), jnp.float32)
    for kh in range(3):
        lo = kh * W
        acc += jnp.dot(sh_ref[0, pl.ds(lo, rows), :].astype(jnp.bfloat16),
                       w_ref[3 * kh + 0], preferred_element_type=jnp.float32)
        acc += jnp.dot(awin_ref[pl.ds(lo, rows), :].astype(jnp.bfloat16),
                       w_ref[3 * kh + 1], preferred_element_type=jnp.float32)
        acc += jnp.dot(sh_ref[1, pl.ds(lo, rows), :].astype(jnp.bfloat16),
                       w_ref[3 * kh + 2], preferred_element_type=jnp.float32)

    h_ref[0] = acc.astype(h_ref.dtype)
    s1_ref[...] += jnp.sum(acc, axis=0)[None, None, :]
    s2_ref[...] += jnp.sum(acc * acc, axis=0)[None, None, :]


def conv3x3_act_stats(x, coefs, w, H, W, row_tile):
    """BN+DyReLU of previous stage (fused) -> 3x3 conv (stride 1, pad 1) -> stats."""
    N, HW, Cin = x.shape
    Cout = w.shape[2]
    TH = _row_tile(H, max(1, row_tile // W))
    L = (TH + 2) * W
    kern = functools.partial(_conv3x3_act_stats_kernel, TH=TH, W=W)
    # TODO(synk): for feature maps too large to keep a whole sample VMEM-resident,
    # replace the (1, HW, Cin) resident block with a manual halo DMA (pl.ANY +
    # make_async_copy) so VMEM scales with the tile, not the image.
    h, s1, s2 = pl.pallas_call(
        kern,
        grid=(N, H // TH),
        in_specs=[pl.BlockSpec((1, HW, Cin), lambda n, t: (n, 0, 0)),
                  pl.BlockSpec((1, 4, Cin), lambda n, t: (n, 0, 0)),
                  pl.BlockSpec((9, Cin, Cout), lambda n, t: (0, 0, 0))],
        out_specs=(pl.BlockSpec((1, TH * W, Cout), lambda n, t: (n, t, 0)),
                   pl.BlockSpec((1, 1, Cout), lambda n, t: (n, 0, 0)),
                   pl.BlockSpec((1, 1, Cout), lambda n, t: (n, 0, 0))),
        out_shape=(jax.ShapeDtypeStruct((N, HW, Cout), jnp.bfloat16),
                   jax.ShapeDtypeStruct((N, 1, Cout), jnp.float32),
                   jax.ShapeDtypeStruct((N, 1, Cout), jnp.float32)),
        scratch_shapes=[pltpu.VMEM((L, Cin), jnp.float32),
                        pltpu.VMEM((2, L, Cin), jnp.float32)],
        compiler_params=pltpu.CompilerParams(
            dimension_semantics=("parallel", "arbitrary"),
            vmem_limit_bytes=_VMEM_LIMIT),
    )(x, coefs, w)
    return h, s1[:, 0], s2[:, 0]


# ----------------------- pass-2 kernel: BN3 + residual + DyReLU3 -----------------------

def _bn_res_act_kernel(h_ref, r_ref, c_ref, o_ref):
    # c rows: [scale, shift, a1, a2, b1, b2];  y = BN3(h) + residual
    c = c_ref[0]
    y = (h_ref[0].astype(jnp.float32) * c[0:1, :] + c[1:2, :]
         + r_ref[0].astype(jnp.float32))
    o_ref[0] = jnp.maximum(y * c[2:3, :] + c[4:5, :],
                           y * c[3:4, :] + c[5:6, :]).astype(o_ref.dtype)


def bn_res_act(h, res, coefs, row_tile):
    N, HW, C = h.shape
    TR = _row_tile(HW, row_tile)
    return pl.pallas_call(
        _bn_res_act_kernel,
        grid=(N, HW // TR),
        in_specs=[pl.BlockSpec((1, TR, C), lambda n, t: (n, t, 0)),
                  pl.BlockSpec((1, TR, C), lambda n, t: (n, t, 0)),
                  pl.BlockSpec((1, 6, C), lambda n, t: (n, 0, 0))],
        out_specs=pl.BlockSpec((1, TR, C), lambda n, t: (n, t, 0)),
        out_shape=jax.ShapeDtypeStruct((N, HW, C), jnp.float32),
        compiler_params=pltpu.CompilerParams(
            dimension_semantics=("parallel", "parallel"),
            vmem_limit_bytes=_VMEM_LIMIT),
    )(h, res, coefs)


# ----------------------- tiny JAX glue (BN finalize + DyReLU coef MLP) -----------------------

def _bn_scale_shift(s1, s2, gamma, beta, count):
    tot1 = jnp.sum(s1, axis=0)
    tot2 = jnp.sum(s2, axis=0)
    mean = tot1 / count
    var = tot2 / count - mean * mean            # biased variance (train-mode BN)
    scale = gamma * jax.lax.rsqrt(var + _EPS)
    shift = beta - mean * scale
    return scale, shift


def _dyrelu_coefs(theta, dp):
    # theta: (N, C).  Tiny MLP -> not worth a dedicated pallas_call.
    n, c = theta.shape
    hh = jnp.maximum(theta @ dp['w1'] + dp['b1'], 0.0)
    v = 2.0 * jax.nn.sigmoid(hh @ dp['w2'] + dp['b2']) - 1.0
    coefs = v.reshape(n, c, 4) * _LAMBDAS + _INIT_V
    return coefs[:, :, 0], coefs[:, :, 1], coefs[:, :, 2], coefs[:, :, 3]


def _packed_coefs(s1, s2, gamma, beta, hw, dp, res_sum=None):
    n = s1.shape[0]
    scale, shift = _bn_scale_shift(s1, s2, gamma, beta, n * hw)
    theta = (s1 / hw) * scale + shift                      # spatial mean of BN output
    if res_sum is not None:
        theta = theta + res_sum / hw                       # + spatial mean of residual
    a1, a2, b1, b2 = _dyrelu_coefs(theta, dp)
    if res_sum is None:
        # fold the BN affine straight into the DyReLU coefficients
        return jnp.stack([a1 * scale, a2 * scale,
                          a1 * shift + b1, a2 * shift + b2], axis=1)
    return jnp.stack([jnp.broadcast_to(scale, a1.shape),
                      jnp.broadcast_to(shift, a1.shape),
                      a1, a2, b1, b2], axis=1)


# ----------------------- module forward -----------------------

def bottleneck_forward(params, x_nchw, row_tile=512):
    # row_tile: spatial rows per conv block (tune per generation; the final
    # elementwise pass uses a 4x larger target since it carries no weights).
    N, Cin, H, W = x_nchw.shape
    HW = H * W
    x = jnp.transpose(x_nchw, (0, 2, 3, 1)).astype(jnp.float32).reshape(N, HW, Cin)
    x16 = x.astype(jnp.bfloat16)                  # bf16 stream copy (conv-1 + residual)

    dummy = jnp.zeros((N, 4, Cin), jnp.float32)   # ignored (apply_act=False)

    # --- stage 1: conv1x1(x); BN1+DyReLU1 are folded into stage-2's input path ---
    h1, s1, q1, id_sum = conv1x1_act_stats(x16, dummy, params['w1'], row_tile,
                                           apply_act=False)
    c1 = _packed_coefs(s1, q1, params['bn1_g'], params['bn1_b'], HW, params['dy1'])

    # --- stage 2: conv3x3(DyReLU1(BN1(h1))); BN2+DyReLU2 folded into stage 3 ---
    h2, s2, q2 = conv3x3_act_stats(h1, c1, params['w2'], H, W, row_tile)
    c2 = _packed_coefs(s2, q2, params['bn2_g'], params['bn2_b'], HW, params['dy2'])

    # --- stage 3: conv1x1(DyReLU2(BN2(h2))) (expansion) ---
    h3, s3, q3, _ = conv1x1_act_stats(h2, c2, params['w3'], row_tile, apply_act=True)
    c3 = _packed_coefs(s3, q3, params['bn3_g'], params['bn3_b'], HW, params['dy3'],
                       res_sum=id_sum)

    # --- final: BN3 + identity + DyReLU3 (only remaining standalone elementwise pass) ---
    out = bn_res_act(h3, x16, c3, row_tile * 4)
    cexp = params['w3'].shape[1]
    return jnp.transpose(out.reshape(N, H, W, cexp), (0, 3, 1, 2))


# ----------------------- parameters -----------------------

def init_params(key, inplanes, planes, expansion=4, reduction=4, k=2):
    keys = jax.random.split(key, 8)

    def nrm(k_, shape, scale=0.3, dtype=jnp.float32):
        return (scale * jax.random.normal(k_, shape)).astype(dtype)

    def dy(k_, c):
        k1, k2, k3, k4 = jax.random.split(k_, 4)
        r = c // reduction
        return dict(w1=nrm(k1, (c, r)), b1=nrm(k2, (1, r), 0.1),
                    w2=nrm(k3, (r, 2 * k * c)), b2=nrm(k4, (1, 2 * k * c), 0.1))

    cexp = planes * expansion
    bf16 = jnp.bfloat16
    return dict(
        w1=nrm(keys[0], (inplanes, planes), dtype=bf16),       # conv1x1 (Cin -> planes)
        bn1_g=jnp.ones((planes,), jnp.float32), bn1_b=jnp.zeros((planes,), jnp.float32),
        w2=nrm(keys[1], (9, planes, planes), dtype=bf16),      # conv3x3 taps (kh*3+kw, Cin, Cout)
        bn2_g=jnp.ones((planes,), jnp.float32), bn2_b=jnp.zeros((planes,), jnp.float32),
        w3=nrm(keys[2], (planes, cexp), dtype=bf16),           # conv1x1 (planes -> planes*4)
        bn3_g=jnp.ones((cexp,), jnp.float32), bn3_b=jnp.zeros((cexp,), jnp.float32),
        dy1=dy(keys[3], planes), dy2=dy(keys[4], planes), dy3=dy(keys[5], cexp),
    )


# ----------------------- pure-JAX reference (sanity check) -----------------------

def reference_forward(params, x_nchw):
    x = jnp.transpose(x_nchw, (0, 2, 3, 1)).astype(jnp.float32)
    N, H, W, _ = x.shape

    def bn(y, g, b):
        m = jnp.mean(y, axis=(0, 1, 2), keepdims=True)
        v = jnp.mean((y - m) ** 2, axis=(0, 1, 2), keepdims=True)
        return (y - m) / jnp.sqrt(v + _EPS) * g + b

    def dyrelu(y, dp):
        C = y.shape[-1]
        theta = jnp.mean(y, axis=(1, 2))
        h = jnp.maximum(theta @ dp['w1'] + dp['b1'], 0.0)
        t = 2.0 * jax.nn.sigmoid(h @ dp['w2'] + dp['b2']) - 1.0
        coefs = t.reshape(N, C, 4) * _LAMBDAS + _INIT_V
        a = coefs[:, :, :2][:, None, None, :, :]
        b = coefs[:, :, 2:][:, None, None, :, :]
        return jnp.max(y[..., None] * a + b, axis=-1)

    w1 = params['w1'].astype(jnp.float32)
    w2 = params['w2'].astype(jnp.float32)
    w3 = params['w3'].astype(jnp.float32)

    h1 = jnp.einsum('nhwc,cd->nhwd', x, w1)
    r1 = dyrelu(bn(h1, params['bn1_g'], params['bn1_b']), params['dy1'])
    xpad = jnp.pad(r1, ((0, 0), (1, 1), (1, 1), (0, 0)))
    h2 = sum(jnp.einsum('nhwc,cd->nhwd', xpad[:, kh:kh + H, kw:kw + W, :], w2[kh * 3 + kw])
             for kh in range(3) for kw in range(3))
    r2 = dyrelu(bn(h2, params['bn2_g'], params['bn2_b']), params['dy2'])
    h3 = jnp.einsum('nhwc,cd->nhwd', r2, w3)
    y3 = bn(h3, params['bn3_g'], params['bn3_b']) + x
    r3 = dyrelu(y3, params['dy3'])
    return jnp.transpose(r3, (0, 3, 1, 2))


# ----------------------- main -----------------------

if __name__ == "__main__":
    key = jax.random.PRNGKey(0)
    kx, kp = jax.random.split(key)

    # Bottleneck(inplanes=16, planes=4): residual add requires inplanes == planes * expansion.
    inplanes, planes = 16, 4
    N, H, W = 2, 16, 16

    x = jax.random.normal(kx, (N, inplanes, H, W), dtype=jnp.float32)
    params = init_params(kp, inplanes, planes)

    # Small row tile so even the toy shape exercises multi-step grids, halo rows
    # and the accumulator pipelining.
    fwd = jax.jit(functools.partial(bottleneck_forward, row_tile=128))
    out = jax.block_until_ready(fwd(params, x))

    ref = reference_forward(params, x)
    err = float(jnp.max(jnp.abs(out - ref)))
    assert out.shape == (N, planes * 4, H, W), out.shape
    # bf16 weights + bf16 intermediate activation storage vs a pure-f32 reference:
    # keep a correspondingly loose (but still meaningful) tolerance.
    assert err < 2e-1, f"mismatch vs reference: {err}"

    # NOTE: BatchNorm runs in training mode (batch statistics), matching a freshly
    # constructed PyTorch module.
    # TODO(synk): running-mean/var buffer updates (a training-time side effect) are not emitted.
    print("KERNEL_OK")
</pallas_src>

<mosaic_0001>
module attributes {stable_mosaic.version = 11 : i64} {
  func.func @_mm_act_stats_kernel(%arg0: i32, %arg1: i32, %arg2: memref<1x128x16xbf16, #tpu.memory_space<vmem>>, %arg3: memref<1x4x16xf32, #tpu.memory_space<vmem>>, %arg4: memref<16x4xbf16, #tpu.memory_space<vmem>>, %arg5: memref<1x128x4xbf16, #tpu.memory_space<vmem>>, %arg6: memref<1x1x4xf32, #tpu.memory_space<vmem>>, %arg7: memref<1x1x4xf32, #tpu.memory_space<vmem>>, %arg8: memref<1x1x16xf32, #tpu.memory_space<vmem>>) attributes {dimension_semantics = [#tpu.dimension_semantics<parallel>, #tpu.dimension_semantics<arbitrary>], iteration_bounds = array<i64: 2, 2>, scalar_prefetch = 0 : i64, scratch_operands = 0 : i64, tpu.core_type = #tpu.core_type<tc>, window_params = [{transform_indices = @transform_0, window_bounds = array<i64: 1, 128, 16>}, {transform_indices = @transform_1, window_bounds = array<i64: 1, 4, 16>}, {pipeline_mode = #tpu.pipeline_mode<synchronous>, transform_indices = @transform_2, window_bounds = array<i64: 16, 4>}, {transform_indices = @transform_3, window_bounds = array<i64: 1, 128, 4>}, {transform_indices = @transform_4, window_bounds = array<i64: 1, 1, 4>}, {transform_indices = @transform_5, window_bounds = array<i64: 1, 1, 4>}, {transform_indices = @transform_6, window_bounds = array<i64: 1, 1, 16>}]} {
    %c0_i32 = arith.constant 0 : i32
    %0 = arith.cmpi eq, %arg1, %c0_i32 : i32
    %1 = arith.extui %0 : i1 to i32
    %c0_i32_0 = arith.constant 0 : i32
    %2 = arith.cmpi ne, %1, %c0_i32_0 : i32
    scf.if %2 {
      %cst_29 = arith.constant 0.000000e+00 : f32
      %29 = vector.broadcast %cst_29 : f32 to vector<1x1x4xf32>
      %c0_30 = arith.constant 0 : index
      %c0_31 = arith.constant 0 : index
      %c0_32 = arith.constant 0 : index
      %30 = vector.load %arg6[%c0_30, %c0_31, %c0_32] : memref<1x1x4xf32, #tpu.memory_space<vmem>>, vector<1x1x4xf32>
      tpu.vector_store %arg6[%c0_30, %c0_31, %c0_32], %29 {strides = array<i32>} : memref<1x1x4xf32, #tpu.memory_space<vmem>>, vector<1x1x4xf32>,
      %cst_33 = arith.constant 0.000000e+00 : f32
      %31 = vector.broadcast %cst_33 : f32 to vector<1x1x4xf32>
      %c0_34 = arith.constant 0 : index
      %c0_35 = arith.constant 0 : index
      %c0_36 = arith.constant 0 : index
      %32 = vector.load %arg7[%c0_34, %c0_35, %c0_36] : memref<1x1x4xf32, #tpu.memory_space<vmem>>, vector<1x1x4xf32>
      tpu.vector_store %arg7[%c0_34, %c0_35, %c0_36], %31 {strides = array<i32>} : memref<1x1x4xf32, #tpu.memory_space<vmem>>, vector<1x1x4xf32>,
      %cst_37 = arith.constant 0.000000e+00 : f32
      %33 = vector.broadcast %cst_37 : f32 to vector<1x1x16xf32>
      %c0_38 = arith.constant 0 : index
      %c0_39 = arith.constant 0 : index
      %c0_40 = arith.constant 0 : index
      %34 = vector.load %arg8[%c0_38, %c0_39, %c0_40] : memref<1x1x16xf32, #tpu.memory_space<vmem>>, vector<1x1x16xf32>
      tpu.vector_store %arg8[%c0_38, %c0_39, %c0_40], %33 {strides = array<i32>} : memref<1x1x16xf32, #tpu.memory_space<vmem>>, vector<1x1x16xf32>,
    } else {
    }
    %c0 = arith.constant 0 : index
    %c0_1 = arith.constant 0 : index
    %c0_2 = arith.constant 0 : index
    %3 = vector.load %arg2[%c0, %c0_1, %c0_2] : memref<1x128x16xbf16, #tpu.memory_space<vmem>>, vector<1x128x16xbf16>
    %4 = vector.shape_cast %3 : vector<1x128x16xbf16> to vector<128x16xbf16>
    %5 = arith.extf %4 : vector<128x16xbf16> to vector<128x16xf32>
    %6 = arith.truncf %5 : vector<128x16xf32> to vector<128x16xbf16>
    %c0_3 = arith.constant 0 : index
    %c0_4 = arith.constant 0 : index
    %7 = vector.load %arg4[%c0_3, %c0_4] : memref<16x4xbf16, #tpu.memory_space<vmem>>, vector<16x4xbf16>
    %cst = arith.constant dense<0.000000e+00> : vector<128x4xf32>
    %8 = tpu.matmul %6, %7, %cst {dimension_numbers = #tpu.dot_dimension_numbers<[1], [0], [0], [1], [0, 0, 1, 1], [], []>} : vector<128x16xbf16>, vector<16x4xbf16>, vector<128x4xf32> -> vector<128x4xf32>
    %9 = arith.truncf %8 : vector<128x4xf32> to vector<128x4xbf16>
    %c0_5 = arith.constant 0 : index
    %c0_6 = arith.constant 0 : index
    %c0_7 = arith.constant 0 : index
    %10 = vector.load %arg5[%c0_5, %c0_6, %c0_7] : memref<1x128x4xbf16, #tpu.memory_space<vmem>>, vector<1x128x4xbf16>
    %11 = vector.shape_cast %10 : vector<1x128x4xbf16> to vector<128x4xbf16>
    %12 = vector.shape_cast %9 : vector<128x4xbf16> to vector<1x128x4xbf16>
    tpu.vector_store %arg5[%c0_5, %c0_6, %c0_7], %12 {strides = array<i32>} : memref<1x128x4xbf16, #tpu.memory_space<vmem>>, vector<1x128x4xbf16>,
    %c0_8 = arith.constant 0 : index
    %c0_9 = arith.constant 0 : index
    %c0_10 = arith.constant 0 : index
    %13 = vector.load %arg6[%c0_8, %c0_9, %c0_10] : memref<1x1x4xf32, #tpu.memory_space<vmem>>, vector<1x1x4xf32>
    %cst_11 = arith.constant dense<0.000000e+00> : vector<4xf32>
    %14 = vector.multi_reduction <add>, %8, %cst_11 [0] : vector<128x4xf32> to vector<4xf32>
    %15 = vector.shape_cast %14 : vector<4xf32> to vector<1x1x4xf32>
    %16 = arith.addf %13, %15 : vector<1x1x4xf32>
    %c0_12 = arith.constant 0 : index
    %c0_13 = arith.constant 0 : index
    %c0_14 = arith.constant 0 : index
    %17 = vector.load %arg6[%c0_12, %c0_13, %c0_14] : memref<1x1x4xf32, #tpu.memory_space<vmem>>, vector<1x1x4xf32>
    tpu.vector_store %arg6[%c0_12, %c0_13, %c0_14], %16 {strides = array<i32>} : memref<1x1x4xf32, #tpu.memory_space<vmem>>, vector<1x1x4xf32>,
    %c0_15 = arith.constant 0 : index
    %c0_16 = arith.constant 0 : index
    %c0_17 = arith.constant 0 : index
    %18 = vector.load %arg7[%c0_15, %c0_16, %c0_17] : memref<1x1x4xf32, #tpu.memory_space<vmem>>, vector<1x1x4xf32>
    %19 = arith.mulf %8, %8 : vector<128x4xf32>
    %cst_18 = arith.constant dense<0.000000e+00> : vector<4xf32>
    %20 = vector.multi_reduction <add>, %19, %cst_18 [0] : vector<128x4xf32> to vector<4xf32>
    %21 = vector.shape_cast %20 : vector<4xf32> to vector<1x1x4xf32>
    %22 = arith.addf %18, %21 : vector<1x1x4xf32>
    %c0_19 = arith.constant 0 : index
    %c0_20 = arith.constant 0 : index
    %c0_21 = arith.constant 0 : index
    %23 = vector.load %arg7[%c0_19, %c0_20, %c0_21] : memref<1x1x4xf32, #tpu.memory_space<vmem>>, vector<1x1x4xf32>
    tpu.vector_store %arg7[%c0_19, %c0_20, %c0_21], %22 {strides = array<i32>} : memref<1x1x4xf32, #tpu.memory_space<vmem>>, vector<1x1x4xf32>,
    %c0_22 = arith.constant 0 : index
    %c0_23 = arith.constant 0 : index
    %c0_24 = arith.constant 0 : index
    %24 = vector.load %arg8[%c0_22, %c0_23, %c0_24] : memref<1x1x16xf32, #tpu.memory_space<vmem>>, vector<1x1x16xf32>
    %cst_25 = arith.constant dense<0.000000e+00> : vector<16xf32>
    %25 = vector.multi_reduction <add>, %5, %cst_25 [0] : vector<128x16xf32> to vector<16xf32>
    %26 = vector.shape_cast %25 : vector<16xf32> to vector<1x1x16xf32>
    %27 = arith.addf %24, %26 : vector<1x1x16xf32>
    %c0_26 = arith.constant 0 : index
    %c0_27 = arith.constant 0 : index
    %c0_28 = arith.constant 0 : index
    %28 = vector.load %arg8[%c0_26, %c0_27, %c0_28] : memref<1x1x16xf32, #tpu.memory_space<vmem>>, vector<1x1x16xf32>
    tpu.vector_store %arg8[%c0_26, %c0_27, %c0_28], %27 {strides = array<i32>} : memref<1x1x16xf32, #tpu.memory_space<vmem>>, vector<1x1x16xf32>,
    return
  }
  func.func @transform_0(%arg0: i32, %arg1: i32) -> (i32, i32, i32) {
    %c0_i32 = arith.constant 0 : i32
    %c0_i32_0 = arith.constant 0 : i32
    return %arg0, %arg1, %c0_i32 : i32, i32, i32
  }
  func.func @transform_1(%arg0: i32, %arg1: i32) -> (i32, i32, i32) {
    %c0_i32 = arith.constant 0 : i32
    %c0_i32_0 = arith.constant 0 : i32
    %c0_i32_1 = arith.constant 0 : i32
    return %arg0, %c0_i32, %c0_i32_0 : i32, i32, i32
  }
  func.func @transform_2(%arg0: i32, %arg1: i32) -> (i32, i32) {
    %c0_i32 = arith.constant 0 : i32
    %c0_i32_0 = arith.constant 0 : i32
    %c0_i32_1 = arith.constant 0 : i32
    return %c0_i32, %c0_i32_0 : i32, i32
  }
  func.func @transform_3(%arg0: i32, %arg1: i32) -> (i32, i32, i32) {
    %c0_i32 = arith.constant 0 : i32
    %c0_i32_0 = arith.constant 0 : i32
    return %arg0, %arg1, %c0_i32 : i32, i32, i32
  }
  func.func @transform_4(%arg0: i32, %arg1: i32) -> (i32, i32, i32) {
    %c0_i32 = arith.constant 0 : i32
    %c0_i32_0 = arith.constant 0 : i32
    %c0_i32_1 = arith.constant 0 : i32
    return %arg0, %c0_i32, %c0_i32_0 : i32, i32, i32
  }
  func.func @transform_5(%arg0: i32, %arg1: i32) -> (i32, i32, i32) {
    %c0_i32 = arith.constant 0 : i32
    %c0_i32_0 = arith.constant 0 : i32
    %c0_i32_1 = arith.constant 0 : i32
    return %arg0, %c0_i32, %c0_i32_0 : i32, i32, i32
  }
  func.func @transform_6(%arg0: i32, %arg1: i32) -> (i32, i32, i32) {
    %c0_i32 = arith.constant 0 : i32
    %c0_i32_0 = arith.constant 0 : i32
    %c0_i32_1 = arith.constant 0 : i32
    return %arg0, %c0_i32, %c0_i32_0 : i32, i32, i32
  }
}

module attributes {stable_mosaic.version = 11 : i64} {
  func.func @_mm_act_stats_kernel(%arg0: i32, %arg1: i32, %arg2: memref<1x128x4xbf16, #tpu.memory_space<vmem>>, %arg3: memref<1x4x4xf32, #tpu.memory_space<vmem>>, %arg4: memref<4x16xbf16, #tpu.memory_space<vmem>>, %arg5: memref<1x128x16xbf16, #tpu.memory_space<vmem>>, %arg6: memref<1x1x16xf32, #tpu.memory_space<vmem>>, %arg7: memref<1x1x16xf32, #tpu.memory_space<vmem>>, %arg8: memref<1x1x4xf32, #tpu.memory_space<vmem>>) attributes {dimension_semantics = [#tpu.dimension_semantics<parallel>, #tpu.dimension_semantics<arbitrary>], iteration_bounds = array<i64: 2, 2>, scalar_prefetch = 0 : i64, scratch_operands = 0 : i64, tpu.core_type = #tpu.core_type<tc>, window_params = [{transform_indices = @transform_0, window_bounds = array<i64: 1, 128, 4>}, {transform_indices = @transform_1, window_bounds = array<i64: 1, 4, 4>}, {pipeline_mode = #tpu.pipeline_mode<synchronous>, transform_indices = @transform_2, window_bounds = array<i64: 4, 16>}, {transform_indices = @transform_3, window_bounds = array<i64: 1, 128, 16>}, {transform_indices = @transform_4, window_bounds = array<i64: 1, 1, 16>}, {transform_indices = @transform_5, window_bounds = array<i64: 1, 1, 16>}, {transform_indices = @transform_6, window_bounds = array<i64: 1, 1, 4>}]} {
    %c0_i32 = arith.constant 0 : i32
    %0 = arith.cmpi eq, %arg1, %c0_i32 : i32
    %1 = arith.extui %0 : i1 to i32
    %c0_i32_0 = arith.constant 0 : i32
    %2 = arith.cmpi ne, %1, %c0_i32_0 : i32
    scf.if %2 {
      %cst_32 = arith.constant 0.000000e+00 : f32
      %44 = vector.broadcast %cst_32 : f32 to vector<1x1x16xf32>
      %c0_33 = arith.constant 0 : index
      %c0_34 = arith.constant 0 : index
      %c0_35 = arith.constant 0 : index
      %45 = vector.load %arg6[%c0_33, %c0_34, %c0_35] : memref<1x1x16xf32, #tpu.memory_space<vmem>>, vector<1x1x16xf32>
      tpu.vector_store %arg6[%c0_33, %c0_34, %c0_35], %44 {strides = array<i32>} : memref<1x1x16xf32, #tpu.memory_space<vmem>>, vector<1x1x16xf32>,
      %cst_36 = arith.constant 0.000000e+00 : f32
      %46 = vector.broadcast %cst_36 : f32 to vector<1x1x16xf32>
      %c0_37 = arith.constant 0 : index
      %c0_38 = arith.constant 0 : index
      %c0_39 = arith.constant 0 : index
      %47 = vector.load %arg7[%c0_37, %c0_38, %c0_39] : memref<1x1x16xf32, #tpu.memory_space<vmem>>, vector<1x1x16xf32>
      tpu.vector_store %arg7[%c0_37, %c0_38, %c0_39], %46 {strides = array<i32>} : memref<1x1x16xf32, #tpu.memory_space<vmem>>, vector<1x1x16xf32>,
      %cst_40 = arith.constant 0.000000e+00 : f32
      %48 = vector.broadcast %cst_40 : f32 to vector<1x1x4xf32>
      %c0_41 = arith.constant 0 : index
      %c0_42 = arith.constant 0 : index
      %c0_43 = arith.constant 0 : index
      %49 = vector.load %arg8[%c0_41, %c0_42, %c0_43] : memref<1x1x4xf32, #tpu.memory_space<vmem>>, vector<1x1x4xf32>
      tpu.vector_store %arg8[%c0_41, %c0_42, %c0_43], %48 {strides = array<i32>} : memref<1x1x4xf32, #tpu.memory_space<vmem>>, vector<1x1x4xf32>,
    } else {
    }
    %c0 = arith.constant 0 : index
    %c0_1 = arith.constant 0 : index
    %c0_2 = arith.constant 0 : index
    %3 = vector.load %arg2[%c0, %c0_1, %c0_2] : memref<1x128x4xbf16, #tpu.memory_space<vmem>>, vector<1x128x4xbf16>
    %4 = vector.shape_cast %3 : vector<1x128x4xbf16> to vector<128x4xbf16>
    %5 = arith.extf %4 : vector<128x4xbf16> to vector<128x4xf32>
    %c0_3 = arith.constant 0 : index
    %c0_4 = arith.constant 0 : index
    %c0_5 = arith.constant 0 : index
    %6 = vector.load %arg3[%c0_3, %c0_4, %c0_5] : memref<1x4x4xf32, #tpu.memory_space<vmem>>, vector<1x4x4xf32>
    %7 = vector.shape_cast %6 : vector<1x4x4xf32> to vector<4x4xf32>
    %8 = vector.extract_strided_slice %7 {offsets = [0, 0], sizes = [1, 4], strides = [1, 1]} : vector<4x4xf32> to vector<1x4xf32>
    %9 = vector.broadcast %8 : vector<1x4xf32> to vector<128x4xf32>
    %10 = arith.mulf %5, %9 : vector<128x4xf32>
    %11 = vector.extract_strided_slice %7 {offsets = [2, 0], sizes = [1, 4], strides = [1, 1]} : vector<4x4xf32> to vector<1x4xf32>
    %12 = vector.broadcast %11 : vector<1x4xf32> to vector<128x4xf32>
    %13 = arith.addf %10, %12 : vector<128x4xf32>
    %14 = vector.extract_strided_slice %7 {offsets = [1, 0], sizes = [1, 4], strides = [1, 1]} : vector<4x4xf32> to vector<1x4xf32>
    %15 = vector.broadcast %14 : vector<1x4xf32> to vector<128x4xf32>
    %16 = arith.mulf %5, %15 : vector<128x4xf32>
    %17 = vector.extract_strided_slice %7 {offsets = [3, 0], sizes = [1, 4], strides = [1, 1]} : vector<4x4xf32> to vector<1x4xf32>
    %18 = vector.broadcast %17 : vector<1x4xf32> to vector<128x4xf32>
    %19 = arith.addf %16, %18 : vector<128x4xf32>
    %20 = arith.maximumf %13, %19 : vector<128x4xf32>
    %21 = arith.truncf %20 : vector<128x4xf32> to vector<128x4xbf16>
    %c0_6 = arith.constant 0 : index
    %c0_7 = arith.constant 0 : index
    %22 = vector.load %arg4[%c0_6, %c0_7] : memref<4x16xbf16, #tpu.memory_space<vmem>>, vector<4x16xbf16>
    %cst = arith.constant dense<0.000000e+00> : vector<128x16xf32>
    %23 = tpu.matmul %21, %22, %cst {dimension_numbers = #tpu.dot_dimension_numbers<[1], [0], [0], [1], [0, 0, 1, 1], [], []>} : vector<128x4xbf16>, vector<4x16xbf16>, vector<128x16xf32> -> vector<128x16xf32>
    %24 = arith.truncf %23 : vector<128x16xf32> to vector<128x16xbf16>
    %c0_8 = arith.constant 0 : index
    %c0_9 = arith.constant 0 : index
    %c0_10 = arith.constant 0 : index
    %25 = vector.load %arg5[%c0_8, %c0_9, %c0_10] : memref<1x128x16xbf16, #tpu.memory_space<vmem>>, vector<1x128x16xbf16>
    %26 = vector.shape_cast %25 : vector<1x128x16xbf16> to vector<128x16xbf16>
    %27 = vector.shape_cast %24 : vector<128x16xbf16> to vector<1x128x16xbf16>
    tpu.vector_store %arg5[%c0_8, %c0_9, %c0_10], %27 {strides = array<i32>} : memref<1x128x16xbf16, #tpu.memory_space<vmem>>, vector<1x128x16xbf16>,
    %c0_11 = arith.constant 0 : index
    %c0_12 = arith.constant 0 : index
    %c0_13 = arith.constant 0 : index
    %28 = vector.load %arg6[%c0_11, %c0_12, %c0_13] : memref<1x1x16xf32, #tpu.memory_space<vmem>>, vector<1x1x16xf32>
    %cst_14 = arith.constant dense<0.000000e+00> : vector<16xf32>
    %29 = vector.multi_reduction <add>, %23, %cst_14 [0] : vector<128x16xf32> to vector<16xf32>
    %30 = vector.shape_cast %29 : vector<16xf32> to vector<1x1x16xf32>
    %31 = arith.addf %28, %30 : vector<1x1x16xf32>
    %c0_15 = arith.constant 0 : index
    %c0_16 = arith.constant 0 : index
    %c0_17 = arith.constant 0 : index
    %32 = vector.load %arg6[%c0_15, %c0_16, %c0_17] : memref<1x1x16xf32, #tpu.memory_space<vmem>>, vector<1x1x16xf32>
    tpu.vector_store %arg6[%c0_15, %c0_16, %c0_17], %31 {strides = array<i32>} : memref<1x1x16xf32, #tpu.memory_space<vmem>>, vector<1x1x16xf32>,
    %c0_18 = arith.constant 0 : index
    %c0_19 = arith.constant 0 : index
    %c0_20 = arith.constant 0 : index
    %33 = vector.load %arg7[%c0_18, %c0_19, %c0_20] : memref<1x1x16xf32, #tpu.memory_space<vmem>>, vector<1x1x16xf32>
    %34 = arith.mulf %23, %23 : vector<128x16xf32>
    %cst_21 = arith.constant dense<0.000000e+00> : vector<16xf32>
    %35 = vector.multi_reduction <add>, %34, %cst_21 [0] : vector<128x16xf32> to vector<16xf32>
    %36 = vector.shape_cast %35 : vector<16xf32> to vector<1x1x16xf32>
    %37 = arith.addf %33, %36 : vector<1x1x16xf32>
    %c0_22 = arith.constant 0 : index
    %c0_23 = arith.constant 0 : index
    %c0_24 = arith.constant 0 : index
    %38 = vector.load %arg7[%c0_22, %c0_23, %c0_24] : memref<1x1x16xf32, #tpu.memory_space<vmem>>, vector<1x1x16xf32>
    tpu.vector_store %arg7[%c0_22, %c0_23, %c0_24], %37 {strides = array<i32>} : memref<1x1x16xf32, #tpu.memory_space<vmem>>, vector<1x1x16xf32>,
    %c0_25 = arith.constant 0 : index
    %c0_26 = arith.constant 0 : index
    %c0_27 = arith.constant 0 : index
    %39 = vector.load %arg8[%c0_25, %c0_26, %c0_27] : memref<1x1x4xf32, #tpu.memory_space<vmem>>, vector<1x1x4xf32>
    %cst_28 = arith.constant dense<0.000000e+00> : vector<4xf32>
    %40 = vector.multi_reduction <add>, %20, %cst_28 [0] : vector<128x4xf32> to vector<4xf32>
    %41 = vector.shape_cast %40 : vector<4xf32> to vector<1x1x4xf32>
    %42 = arith.addf %39, %41 : vector<1x1x4xf32>
    %c0_29 = arith.constant 0 : index
    %c0_30 = arith.constant 0 : index
    %c0_31 = arith.constant 0 : index
    %43 = vector.load %arg8[%c0_29, %c0_30, %c0_31] : memref<1x1x4xf32, #tpu.memory_space<vmem>>, vector<1x1x4xf32>
    tpu.vector_store %arg8[%c0_29, %c0_30, %c0_31], %42 {strides = array<i32>} : memref<1x1x4xf32, #tpu.memory_space<vmem>>, vector<1x1x4xf32>,
    return
  }
  func.func @transform_0(%arg0: i32, %arg1: i32) -> (i32, i32, i32) {
    %c0_i32 = arith.constant 0 : i32
    %c0_i32_0 = arith.constant 0 : i32
    return %arg0, %arg1, %c0_i32 : i32, i32, i32
  }
  func.func @transform_1(%arg0: i32, %arg1: i32) -> (i32, i32, i32) {
    %c0_i32 = arith.constant 0 : i32
    %c0_i32_0 = arith.constant 0 : i32
    %c0_i32_1 = arith.constant 0 : i32
    return %arg0, %c0_i32, %c0_i32_0 : i32, i32, i32
  }
  func.func @transform_2(%arg0: i32, %arg1: i32) -> (i32, i32) {
    %c0_i32 = arith.constant 0 : i32
    %c0_i32_0 = arith.constant 0 : i32
    %c0_i32_1 = arith.constant 0 : i32
    return %c0_i32, %c0_i32_0 : i32, i32
  }
  func.func @transform_3(%arg0: i32, %arg1: i32) -> (i32, i32, i32) {
    %c0_i32 = arith.constant 0 : i32
    %c0_i32_0 = arith.constant 0 : i32
    return %arg0, %arg1, %c0_i32 : i32, i32, i32
  }
  func.func @transform_4(%arg0: i32, %arg1: i32) -> (i32, i32, i32) {
    %c0_i32 = arith.constant 0 : i32
    %c0_i32_0 = arith.constant 0 : i32
    %c0_i32_1 = arith.constant 0 : i32
    return %arg0, %c0_i32, %c0_i32_0 : i32, i32, i32
  }
  func.func @transform_5(%arg0: i32, %arg1: i32) -> (i32, i32, i32) {
    %c0_i32 = arith.constant 0 : i32
    %c0_i32_0 = arith.constant 0 : i32
    %c0_i32_1 = arith.constant 0 : i32
    return %arg0, %c0_i32, %c0_i32_0 : i32, i32, i32
  }
  func.func @transform_6(%arg0: i32, %arg1: i32) -> (i32, i32, i32) {
    %c0_i32 = arith.constant 0 : i32
    %c0_i32_0 = arith.constant 0 : i32
    %c0_i32_1 = arith.constant 0 : i32
    return %arg0, %c0_i32, %c0_i32_0 : i32, i32, i32
  }
}

module attributes {stable_mosaic.version = 11 : i64} {
  func.func @_conv3x3_act_stats_kernel(%arg0: i32, %arg1: i32, %arg2: memref<1x256x4xbf16, #tpu.memory_space<vmem>>, %arg3: memref<1x4x4xf32, #tpu.memory_space<vmem>>, %arg4: memref<9x4x4xbf16, #tpu.memory_space<vmem>>, %arg5: memref<1x128x4xbf16, #tpu.memory_space<vmem>>, %arg6: memref<1x1x4xf32, #tpu.memory_space<vmem>>, %arg7: memref<1x1x4xf32, #tpu.memory_space<vmem>>, %arg8: memref<160x4xf32, #tpu.memory_space<vmem>>, %arg9: memref<2x160x4xf32, #tpu.memory_space<vmem>>) attributes {dimension_semantics = [#tpu.dimension_semantics<parallel>, #tpu.dimension_semantics<arbitrary>], iteration_bounds = array<i64: 2, 2>, scalar_prefetch = 0 : i64, scratch_operands = 2 : i64, tpu.core_type = #tpu.core_type<tc>, window_params = [{transform_indices = @transform_0, window_bounds = array<i64: 1, 256, 4>}, {transform_indices = @transform_1, window_bounds = array<i64: 1, 4, 4>}, {pipeline_mode = #tpu.pipeline_mode<synchronous>, transform_indices = @transform_2, window_bounds = array<i64: 9, 4, 4>}, {transform_indices = @transform_3, window_bounds = array<i64: 1, 128, 4>}, {transform_indices = @transform_4, window_bounds = array<i64: 1, 1, 4>}, {transform_indices = @transform_5, window_bounds = array<i64: 1, 1, 4>}]} {
    %c128_i32 = arith.constant 128 : i32
    %0 = arith.muli %arg1, %c128_i32 : i32
    %1 = tpu.assume_multiple %0, 128 : i32
    %c0_i32 = arith.constant 0 : i32
    %2 = arith.cmpi eq, %arg1, %c0_i32 : i32
    %3 = arith.extui %2 : i1 to i32
    %c0_i32_0 = arith.constant 0 : i32
    %4 = arith.cmpi ne, %3, %c0_i32_0 : i32
    scf.if %4 {
      %cst_105 = arith.constant 0.000000e+00 : f32
      %156 = vector.broadcast %cst_105 : f32 to vector<1x1x4xf32>
      %c0_106 = arith.constant 0 : index
      %c0_107 = arith.constant 0 : index
      %c0_108 = arith.constant 0 : index
      %157 = vector.load %arg6[%c0_106, %c0_107, %c0_108] : memref<1x1x4xf32, #tpu.memory_space<vmem>>, vector<1x1x4xf32>
      tpu.vector_store %arg6[%c0_106, %c0_107, %c0_108], %156 {strides = array<i32>} : memref<1x1x4xf32, #tpu.memory_space<vmem>>, vector<1x1x4xf32>,
      %cst_109 = arith.constant 0.000000e+00 : f32
      %158 = vector.broadcast %cst_109 : f32 to vector<1x1x4xf32>
      %c0_110 = arith.constant 0 : index
      %c0_111 = arith.constant 0 : index
      %c0_112 = arith.constant 0 : index
      %159 = vector.load %arg7[%c0_110, %c0_111, %c0_112] : memref<1x1x4xf32, #tpu.memory_space<vmem>>, vector<1x1x4xf32>
      tpu.vector_store %arg7[%c0_110, %c0_111, %c0_112], %158 {strides = array<i32>} : memref<1x1x4xf32, #tpu.memory_space<vmem>>, vector<1x1x4xf32>,
    } else {
    }
    %c0 = arith.constant 0 : index
    %c0_1 = arith.constant 0 : index
    %c0_2 = arith.constant 0 : index
    %5 = vector.load %arg3[%c0, %c0_1, %c0_2] : memref<1x4x4xf32, #tpu.memory_space<vmem>>, vector<1x4x4xf32>
    %6 = vector.shape_cast %5 : vector<1x4x4xf32> to vector<4x4xf32>
    %c0_3 = arith.constant 0 : index
    %7 = arith.index_cast %1 : i32 to index
    %c0_4 = arith.constant 0 : index
    %8 = vector.load %arg2[%c0_3, %7, %c0_4] : memref<1x256x4xbf16, #tpu.memory_space<vmem>>, vector<1x128x4xbf16>
    %9 = vector.shape_cast %8 : vector<1x128x4xbf16> to vector<128x4xbf16>
    %10 = arith.extf %9 : vector<128x4xbf16> to vector<128x4xf32>
    %11 = vector.extract_strided_slice %6 {offsets = [0, 0], sizes = [1, 4], strides = [1, 1]} : vector<4x4xf32> to vector<1x4xf32>
    %12 = vector.broadcast %11 : vector<1x4xf32> to vector<128x4xf32>
    %13 = arith.mulf %10, %12 : vector<128x4xf32>
    %14 = vector.extract_strided_slice %6 {offsets = [2, 0], sizes = [1, 4], strides = [1, 1]} : vector<4x4xf32> to vector<1x4xf32>
    %15 = vector.broadcast %14 : vector<1x4xf32> to vector<128x4xf32>
    %16 = arith.addf %13, %15 : vector<128x4xf32>
    %17 = vector.extract_strided_slice %6 {offsets = [1, 0], sizes = [1, 4], strides = [1, 1]} : vector<4x4xf32> to vector<1x4xf32>
    %18 = vector.broadcast %17 : vector<1x4xf32> to vector<128x4xf32>
    %19 = arith.mulf %10, %18 : vector<128x4xf32>
    %20 = vector.extract_strided_slice %6 {offsets = [3, 0], sizes = [1, 4], strides = [1, 1]} : vector<4x4xf32> to vector<1x4xf32>
    %21 = vector.broadcast %20 : vector<1x4xf32> to vector<128x4xf32>
    %22 = arith.addf %19, %21 : vector<128x4xf32>
    %23 = arith.maximumf %16, %22 : vector<128x4xf32>
    %c16 = arith.constant 16 : index
    %c0_5 = arith.constant 0 : index
    %24 = vector.load %arg8[%c16, %c0_5] : memref<160x4xf32, #tpu.memory_space<vmem>>, vector<128x4xf32>
    tpu.vector_store %arg8[%c16, %c0_5], %23 {strides = array<i32>} : memref<160x4xf32, #tpu.memory_space<vmem>>, vector<128x4xf32>,
    %c0_i32_6 = arith.constant 0 : i32
    %25 = arith.cmpi eq, %arg1, %c0_i32_6 : i32
    %26 = arith.extui %25 : i1 to i32
    %c0_i32_7 = arith.constant 0 : i32
    %27 = arith.cmpi ne, %26, %c0_i32_7 : i32
    scf.if %27 {
      %cst_105 = arith.constant 0.000000e+00 : f32
      %156 = vector.broadcast %cst_105 : f32 to vector<16x4xf32>
      %c0_106 = arith.constant 0 : index
      %c0_107 = arith.constant 0 : index
      %157 = vector.load %arg8[%c0_106, %c0_107] : memref<160x4xf32, #tpu.memory_space<vmem>>, vector<16x4xf32>
      tpu.vector_store %arg8[%c0_106, %c0_107], %156 {strides = array<i32>} : memref<160x4xf32, #tpu.memory_space<vmem>>, vector<16x4xf32>,
    } else {
    }
    %c0_i32_8 = arith.constant 0 : i32
    %28 = arith.cmpi sgt, %arg1, %c0_i32_8 : i32
    %29 = arith.extui %28 : i1 to i32
    %c0_i32_9 = arith.constant 0 : i32
    %30 = arith.cmpi ne, %29, %c0_i32_9 : i32
    scf.if %30 {
      %c16_i32_105 = arith.constant 16 : i32
      %156 = arith.subi %1, %c16_i32_105 : i32
      %c0_106 = arith.constant 0 : index
      %157 = arith.index_cast %156 : i32 to index
      %c0_107 = arith.constant 0 : index
      %158 = vector.load %arg2[%c0_106, %157, %c0_107] : memref<1x256x4xbf16, #tpu.memory_space<vmem>>, vector<1x16x4xbf16>
      %159 = vector.shape_cast %158 : vector<1x16x4xbf16> to vector<16x4xbf16>
      %160 = arith.extf %159 : vector<16x4xbf16> to vector<16x4xf32>
      %161 = vector.extract_strided_slice %6 {offsets = [0, 0], sizes = [1, 4], strides = [1, 1]} : vector<4x4xf32> to vector<1x4xf32>
      %162 = vector.broadcast %161 : vector<1x4xf32> to vector<16x4xf32>
      %163 = arith.mulf %160, %162 : vector<16x4xf32>
      %164 = vector.extract_strided_slice %6 {offsets = [2, 0], sizes = [1, 4], strides = [1, 1]} : vector<4x4xf32> to vector<1x4xf32>
      %165 = vector.broadcast %164 : vector<1x4xf32> to vector<16x4xf32>
      %166 = arith.addf %163, %165 : vector<16x4xf32>
      %167 = vector.extract_strided_slice %6 {offsets = [1, 0], sizes = [1, 4], strides = [1, 1]} : vector<4x4xf32> to vector<1x4xf32>
      %168 = vector.broadcast %167 : vector<1x4xf32> to vector<16x4xf32>
      %169 = arith.mulf %160, %168 : vector<16x4xf32>
      %170 = vector.extract_strided_slice %6 {offsets = [3, 0], sizes = [1, 4], strides = [1, 1]} : vector<4x4xf32> to vector<1x4xf32>
      %171 = vector.broadcast %170 : vector<1x4xf32> to vector<16x4xf32>
      %172 = arith.addf %169, %171 : vector<16x4xf32>
      %173 = arith.maximumf %166, %172 : vector<16x4xf32>
      %c0_108 = arith.constant 0 : index
      %c0_109 = arith.constant 0 : index
      %174 = vector.load %arg8[%c0_108, %c0_109] : memref<160x4xf32, #tpu.memory_space<vmem>>, vector<16x4xf32>
      tpu.vector_store %arg8[%c0_108, %c0_109], %173 {strides = array<i32>} : memref<160x4xf32, #tpu.memory_space<vmem>>, vector<16x4xf32>,
    } else {
    }
    %c1_i32 = arith.constant 1 : i32
    %31 = arith.cmpi eq, %arg1, %c1_i32 : i32
    %32 = arith.extui %31 : i1 to i32
    %c0_i32_10 = arith.constant 0 : i32
    %33 = arith.cmpi ne, %32, %c0_i32_10 : i32
    scf.if %33 {
      %cst_105 = arith.constant 0.000000e+00 : f32
      %156 = vector.broadcast %cst_105 : f32 to vector<16x4xf32>
      %c144 = arith.constant 144 : index
      %c0_106 = arith.constant 0 : index
      %157 = vector.load %arg8[%c144, %c0_106] : memref<160x4xf32, #tpu.memory_space<vmem>>, vector<16x4xf32>
      tpu.vector_store %arg8[%c144, %c0_106], %156 {strides = array<i32>} : memref<160x4xf32, #tpu.memory_space<vmem>>, vector<16x4xf32>,
    } else {
    }
    %c1_i32_11 = arith.constant 1 : i32
    %34 = arith.cmpi slt, %arg1, %c1_i32_11 : i32
    %35 = arith.extui %34 : i1 to i32
    %c0_i32_12 = arith.constant 0 : i32
    %36 = arith.cmpi ne, %35, %c0_i32_12 : i32
    scf.if %36 {
      %c128_i32_105 = arith.constant 128 : i32
      %156 = arith.addi %1, %c128_i32_105 : i32
      %c0_106 = arith.constant 0 : index
      %157 = arith.index_cast %156 : i32 to index
      %c0_107 = arith.constant 0 : index
      %158 = vector.load %arg2[%c0_106, %157, %c0_107] : memref<1x256x4xbf16, #tpu.memory_space<vmem>>, vector<1x16x4xbf16>
      %159 = vector.shape_cast %158 : vector<1x16x4xbf16> to vector<16x4xbf16>
      %160 = arith.extf %159 : vector<16x4xbf16> to vector<16x4xf32>
      %161 = vector.extract_strided_slice %6 {offsets = [0, 0], sizes = [1, 4], strides = [1, 1]} : vector<4x4xf32> to vector<1x4xf32>
      %162 = vector.broadcast %161 : vector<1x4xf32> to vector<16x4xf32>
      %163 = arith.mulf %160, %162 : vector<16x4xf32>
      %164 = vector.extract_strided_slice %6 {offsets = [2, 0], sizes = [1, 4], strides = [1, 1]} : vector<4x4xf32> to vector<1x4xf32>
      %165 = vector.broadcast %164 : vector<1x4xf32> to vector<16x4xf32>
      %166 = arith.addf %163, %165 : vector<16x4xf32>
      %167 = vector.extract_strided_slice %6 {offsets = [1, 0], sizes = [1, 4], strides = [1, 1]} : vector<4x4xf32> to vector<1x4xf32>
      %168 = vector.broadcast %167 : vector<1x4xf32> to vector<16x4xf32>
      %169 = arith.mulf %160, %168 : vector<16x4xf32>
      %170 = vector.extract_strided_slice %6 {offsets = [3, 0], sizes = [1, 4], strides = [1, 1]} : vector<4x4xf32> to vector<1x4xf32>
      %171 = vector.broadcast %170 : vector<1x4xf32> to vector<16x4xf32>
      %172 = arith.addf %169, %171 : vector<16x4xf32>
      %173 = arith.maximumf %166, %172 : vector<16x4xf32>
      %c144 = arith.constant 144 : index
      %c0_108 = arith.constant 0 : index
      %174 = vector.load %arg8[%c144, %c0_108] : memref<160x4xf32, #tpu.memory_space<vmem>>, vector<16x4xf32>
      tpu.vector_store %arg8[%c144, %c0_108], %173 {strides = array<i32>} : memref<160x4xf32, #tpu.memory_space<vmem>>, vector<16x4xf32>,
    } else {
    }
    %37 = tpu.iota {dimensions = array<i32: 0>} : vector<159x1xi32>
    %c16_i32 = arith.constant 16 : i32
    %c0_i32_13 = arith.constant 0 : i32
    %38 = arith.cmpi eq, %c16_i32, %c0_i32_13 : i32
    %c1_i32_14 = arith.constant 1 : i32
    %39 = arith.select %38, %c1_i32_14, %c16_i32 : i32
    %40 = vector.broadcast %39 : i32 to vector<159x1xi32>
    %41 = arith.remsi %37, %40 : vector<159x1xi32>
    %c0_i32_15 = arith.constant 0 : i32
    %42 = vector.broadcast %c0_i32_15 : i32 to vector<159x1xi32>
    %43 = arith.cmpi ne, %41, %42 : vector<159x1xi32>
    %c0_i32_16 = arith.constant 0 : i32
    %44 = vector.broadcast %c0_i32_16 : i32 to vector<159x1xi32>
    %45 = arith.cmpi slt, %41, %44 : vector<159x1xi32>
    %c0_i32_17 = arith.constant 0 : i32
    %46 = arith.cmpi slt, %39, %c0_i32_17 : i32
    %47 = vector.broadcast %46 : i1 to vector<159x1xi1>
    %48 = vector.broadcast %47 : vector<159x1xi1> to vector<159x1xi1>
    %49 = arith.xori %45, %48 : vector<159x1xi1>
    %50 = arith.andi %49, %43 : vector<159x1xi1>
    %51 = vector.broadcast %39 : i32 to vector<159x1xi32>
    %52 = arith.addi %41, %51 : vector<159x1xi32>
    %53 = arith.select %50, %52, %41 : vector<159x1xi1>, vector<159x1xi32>
    %c15_i32 = arith.constant 15 : i32
    %54 = vector.broadcast %c15_i32 : i32 to vector<159x1xi32>
    %55 = arith.cmpi eq, %53, %54 : vector<159x1xi32>
    %c0_18 = arith.constant 0 : index
    %c0_19 = arith.constant 0 : index
    %56 = vector.load %arg8[%c0_18, %c0_19] : memref<160x4xf32, #tpu.memory_space<vmem>>, vector<159x4xf32>
    %c1 = arith.constant 1 : index
    %c0_20 = arith.constant 0 : index
    %57 = vector.load %arg8[%c1, %c0_20] : memref<160x4xf32, #tpu.memory_space<vmem>>, vector<159x4xf32>
    %cst = arith.constant 0.000000e+00 : f32
    %58 = vector.broadcast %cst : f32 to vector<159x4xf32>
    %59 = vector.shape_cast %55 : vector<159x1xi1> to vector<159x1xi1>
    %60 = vector.broadcast %59 : vector<159x1xi1> to vector<159x4xi1>
    %61 = arith.select %60, %58, %56 : vector<159x4xi1>, vector<159x4xf32>
    %c0_21 = arith.constant 0 : index
    %c1_22 = arith.constant 1 : index
    %c0_23 = arith.constant 0 : index
    %62 = vector.load %arg9[%c0_21, %c1_22, %c0_23] : memref<2x160x4xf32, #tpu.memory_space<vmem>>, vector<1x159x4xf32>
    %63 = vector.shape_cast %62 : vector<1x159x4xf32> to vector<159x4xf32>
    %64 = vector.shape_cast %61 : vector<159x4xf32> to vector<1x159x4xf32>
    tpu.vector_store %arg9[%c0_21, %c1_22, %c0_23], %64 {strides = array<i32>} : memref<2x160x4xf32, #tpu.memory_space<vmem>>, vector<1x159x4xf32>,
    %cst_24 = arith.constant 0.000000e+00 : f32
    %65 = vector.broadcast %cst_24 : f32 to vector<1x4xf32>
    %c0_25 = arith.constant 0 : index
    %c0_26 = arith.constant 0 : index
    %c0_27 = arith.constant 0 : index
    %66 = vector.load %arg9[%c0_25, %c0_26, %c0_27] : memref<2x160x4xf32, #tpu.memory_space<vmem>>, vector<1x1x4xf32>
    %67 = vector.shape_cast %66 : vector<1x1x4xf32> to vector<1x4xf32>
    %68 = vector.shape_cast %65 : vector<1x4xf32> to vector<1x1x4xf32>
    tpu.vector_store %arg9[%c0_25, %c0_26, %c0_27], %68 {strides = array<i32>} : memref<2x160x4xf32, #tpu.memory_space<vmem>>, vector<1x1x4xf32>,
    %cst_28 = arith.constant 0.000000e+00 : f32
    %69 = vector.broadcast %cst_28 : f32 to vector<159x4xf32>
    %70 = vector.shape_cast %55 : vector<159x1xi1> to vector<159x1xi1>
    %71 = vector.broadcast %70 : vector<159x1xi1> to vector<159x4xi1>
    %72 = arith.select %71, %69, %57 : vector<159x4xi1>, vector<159x4xf32>
    %c1_29 = arith.constant 1 : index
    %c0_30 = arith.constant 0 : index
    %c0_31 = arith.constant 0 : index
    %73 = vector.load %arg9[%c1_29, %c0_30, %c0_31] : memref<2x160x4xf32, #tpu.memory_space<vmem>>, vector<1x159x4xf32>
    %74 = vector.shape_cast %73 : vector<1x159x4xf32> to vector<159x4xf32>
    %75 = vector.shape_cast %72 : vector<159x4xf32> to vector<1x159x4xf32>
    tpu.vector_store %arg9[%c1_29, %c0_30, %c0_31], %75 {strides = array<i32>} : memref<2x160x4xf32, #tpu.memory_space<vmem>>, vector<1x159x4xf32>,
    %cst_32 = arith.constant 0.000000e+00 : f32
    %76 = vector.broadcast %cst_32 : f32 to vector<1x4xf32>
    %c1_33 = arith.constant 1 : index
    %c159 = arith.constant 159 : index
    %c0_34 = arith.constant 0 : index
    %77 = vector.load %arg9[%c1_33, %c159, %c0_34] : memref<2x160x4xf32, #tpu.memory_space<vmem>>, vector<1x1x4xf32>
    %78 = vector.shape_cast %77 : vector<1x1x4xf32> to vector<1x4xf32>
    %79 = vector.shape_cast %76 : vector<1x4xf32> to vector<1x1x4xf32>
    tpu.vector_store %arg9[%c1_33, %c159, %c0_34], %79 {strides = array<i32>} : memref<2x160x4xf32, #tpu.memory_space<vmem>>, vector<1x1x4xf32>,
    %cst_35 = arith.constant 0.000000e+00 : f32
    %80 = vector.broadcast %cst_35 : f32 to vector<128x4xf32>
    %c0_36 = arith.constant 0 : index
    %c0_37 = arith.constant 0 : index
    %c0_38 = arith.constant 0 : index
    %81 = vector.load %arg9[%c0_36, %c0_37, %c0_38] : memref<2x160x4xf32, #tpu.memory_space<vmem>>, vector<1x128x4xf32>
    %82 = vector.shape_cast %81 : vector<1x128x4xf32> to vector<128x4xf32>
    %83 = arith.truncf %82 : vector<128x4xf32> to vector<128x4xbf16>
    %c0_39 = arith.constant 0 : index
    %c0_40 = arith.constant 0 : index
    %c0_41 = arith.constant 0 : index
    %84 = vector.load %arg4[%c0_39, %c0_40, %c0_41] : memref<9x4x4xbf16, #tpu.memory_space<vmem>>, vector<1x4x4xbf16>
    %85 = vector.shape_cast %84 : vector<1x4x4xbf16> to vector<4x4xbf16>
    %cst_42 = arith.constant dense<0.000000e+00> : vector<128x4xf32>
    %86 = tpu.matmul %83, %85, %cst_42 {dimension_numbers = #tpu.dot_dimension_numbers<[1], [0], [0], [1], [0, 0, 1, 1], [], []>} : vector<128x4xbf16>, vector<4x4xbf16>, vector<128x4xf32> -> vector<128x4xf32>
    %87 = arith.addf %80, %86 : vector<128x4xf32>
    %c0_43 = arith.constant 0 : index
    %c0_44 = arith.constant 0 : index
    %88 = vector.load %arg8[%c0_43, %c0_44] : memref<160x4xf32, #tpu.memory_space<vmem>>, vector<128x4xf32>
    %89 = arith.truncf %88 : vector<128x4xf32> to vector<128x4xbf16>
    %c1_45 = arith.constant 1 : index
    %c0_46 = arith.constant 0 : index
    %c0_47 = arith.constant 0 : index
    %90 = vector.load %arg4[%c1_45, %c0_46, %c0_47] : memref<9x4x4xbf16, #tpu.memory_space<vmem>>, vector<1x4x4xbf16>
    %91 = vector.shape_cast %90 : vector<1x4x4xbf16> to vector<4x4xbf16>
    %cst_48 = arith.constant dense<0.000000e+00> : vector<128x4xf32>
    %92 = tpu.matmul %89, %91, %cst_48 {dimension_numbers = #tpu.dot_dimension_numbers<[1], [0], [0], [1], [0, 0, 1, 1], [], []>} : vector<128x4xbf16>, vector<4x4xbf16>, vector<128x4xf32> -> vector<128x4xf32>
    %93 = arith.addf %87, %92 : vector<128x4xf32>
    %c1_49 = arith.constant 1 : index
    %c0_50 = arith.constant 0 : index
    %c0_51 = arith.constant 0 : index
    %94 = vector.load %arg9[%c1_49, %c0_50, %c0_51] : memref<2x160x4xf32, #tpu.memory_space<vmem>>, vector<1x128x4xf32>
    %95 = vector.shape_cast %94 : vector<1x128x4xf32> to vector<128x4xf32>
    %96 = arith.truncf %95 : vector<128x4xf32> to vector<128x4xbf16>
    %c2 = arith.constant 2 : index
    %c0_52 = arith.constant 0 : index
    %c0_53 = arith.constant 0 : index
    %97 = vector.load %arg4[%c2, %c0_52, %c0_53] : memref<9x4x4xbf16, #tpu.memory_space<vmem>>, vector<1x4x4xbf16>
    %98 = vector.shape_cast %97 : vector<1x4x4xbf16> to vector<4x4xbf16>
    %cst_54 = arith.constant dense<0.000000e+00> : vector<128x4xf32>
    %99 = tpu.matmul %96, %98, %cst_54 {dimension_numbers = #tpu.dot_dimension_numbers<[1], [0], [0], [1], [0, 0, 1, 1], [], []>} : vector<128x4xbf16>, vector<4x4xbf16>, vector<128x4xf32> -> vector<128x4xf32>
    %100 = arith.addf %93, %99 : vector<128x4xf32>
    %c0_55 = arith.constant 0 : index
    %c16_56 = arith.constant 16 : index
    %c0_57 = arith.constant 0 : index
    %101 = vector.load %arg9[%c0_55, %c16_56, %c0_57] : memref<2x160x4xf32, #tpu.memory_space<vmem>>, vector<1x128x4xf32>
    %102 = vector.shape_cast %101 : vector<1x128x4xf32> to vector<128x4xf32>
    %103 = arith.truncf %102 : vector<128x4xf32> to vector<128x4xbf16>
    %c3 = arith.constant 3 : index
    %c0_58 = arith.constant 0 : index
    %c0_59 = arith.constant 0 : index
    %104 = vector.load %arg4[%c3, %c0_58, %c0_59] : memref<9x4x4xbf16, #tpu.memory_space<vmem>>, vector<1x4x4xbf16>
    %105 = vector.shape_cast %104 : vector<1x4x4xbf16> to vector<4x4xbf16>
    %cst_60 = arith.constant dense<0.000000e+00> : vector<128x4xf32>
    %106 = tpu.matmul %103, %105, %cst_60 {dimension_numbers = #tpu.dot_dimension_numbers<[1], [0], [0], [1], [0, 0, 1, 1], [], []>} : vector<128x4xbf16>, vector<4x4xbf16>, vector<128x4xf32> -> vector<128x4xf32>
    %107 = arith.addf %100, %106 : vector<128x4xf32>
    %c16_61 = arith.constant 16 : index
    %c0_62 = arith.constant 0 : index
    %108 = vector.load %arg8[%c16_61, %c0_62] : memref<160x4xf32, #tpu.memory_space<vmem>>, vector<128x4xf32>
    %109 = arith.truncf %108 : vector<128x4xf32> to vector<128x4xbf16>
    %c4 = arith.constant 4 : index
    %c0_63 = arith.constant 0 : index
    %c0_64 = arith.constant 0 : index
    %110 = vector.load %arg4[%c4, %c0_63, %c0_64] : memref<9x4x4xbf16, #tpu.memory_space<vmem>>, vector<1x4x4xbf16>
    %111 = vector.shape_cast %110 : vector<1x4x4xbf16> to vector<4x4xbf16>
    %cst_65 = arith.constant dense<0.000000e+00> : vector<128x4xf32>
    %112 = tpu.matmul %109, %111, %cst_65 {dimension_numbers = #tpu.dot_dimension_numbers<[1], [0], [0], [1], [0, 0, 1, 1], [], []>} : vector<128x4xbf16>, vector<4x4xbf16>, vector<128x4xf32> -> vector<128x4xf32>
    %113 = arith.addf %107, %112 : vector<128x4xf32>
    %c1_66 = arith.constant 1 : index
    %c16_67 = arith.constant 16 : index
    %c0_68 = arith.constant 0 : index
    %114 = vector.load %arg9[%c1_66, %c16_67, %c0_68] : memref<2x160x4xf32, #tpu.memory_space<vmem>>, vector<1x128x4xf32>
    %115 = vector.shape_cast %114 : vector<1x128x4xf32> to vector<128x4xf32>
    %116 = arith.truncf %115 : vector<128x4xf32> to vector<128x4xbf16>
    %c5 = arith.constant 5 : index
    %c0_69 = arith.constant 0 : index
    %c0_70 = arith.constant 0 : index
    %117 = vector.load %arg4[%c5, %c0_69, %c0_70] : memref<9x4x4xbf16, #tpu.memory_space<vmem>>, vector<1x4x4xbf16>
    %118 = vector.shape_cast %117 : vector<1x4x4xbf16> to vector<4x4xbf16>
    %cst_71 = arith.constant dense<0.000000e+00> : vector<128x4xf32>
    %119 = tpu.matmul %116, %118, %cst_71 {dimension_numbers = #tpu.dot_dimension_numbers<[1], [0], [0], [1], [0, 0, 1, 1], [], []>} : vector<128x4xbf16>, vector<4x4xbf16>, vector<128x4xf32> -> vector<128x4xf32>
    %120 = arith.addf %113, %119 : vector<128x4xf32>
    %c0_72 = arith.constant 0 : index
    %c32 = arith.constant 32 : index
    %c0_73 = arith.constant 0 : index
    %121 = vector.load %arg9[%c0_72, %c32, %c0_73] : memref<2x160x4xf32, #tpu.memory_space<vmem>>, vector<1x128x4xf32>
    %122 = vector.shape_cast %121 : vector<1x128x4xf32> to vector<128x4xf32>
    %123 = arith.truncf %122 : vector<128x4xf32> to vector<128x4xbf16>
    %c6 = arith.constant 6 : index
    %c0_74 = arith.constant 0 : index
    %c0_75 = arith.constant 0 : index
    %124 = vector.load %arg4[%c6, %c0_74, %c0_75] : memref<9x4x4xbf16, #tpu.memory_space<vmem>>, vector<1x4x4xbf16>
    %125 = vector.shape_cast %124 : vector<1x4x4xbf16> to vector<4x4xbf16>
    %cst_76 = arith.constant dense<0.000000e+00> : vector<128x4xf32>
    %126 = tpu.matmul %123, %125, %cst_76 {dimension_numbers = #tpu.dot_dimension_numbers<[1], [0], [0], [1], [0, 0, 1, 1], [], []>} : vector<128x4xbf16>, vector<4x4xbf16>, vector<128x4xf32> -> vector<128x4xf32>
    %127 = arith.addf %120, %126 : vector<128x4xf32>
    %c32_77 = arith.constant 32 : index
    %c0_78 = arith.constant 0 : index
    %128 = vector.load %arg8[%c32_77, %c0_78] : memref<160x4xf32, #tpu.memory_space<vmem>>, vector<128x4xf32>
    %129 = arith.truncf %128 : vector<128x4xf32> to vector<128x4xbf16>
    %c7 = arith.constant 7 : index
    %c0_79 = arith.constant 0 : index
    %c0_80 = arith.constant 0 : index
    %130 = vector.load %arg4[%c7, %c0_79, %c0_80] : memref<9x4x4xbf16, #tpu.memory_space<vmem>>, vector<1x4x4xbf16>
    %131 = vector.shape_cast %130 : vector<1x4x4xbf16> to vector<4x4xbf16>
    %cst_81 = arith.constant dense<0.000000e+00> : vector<128x4xf32>
    %132 = tpu.matmul %129, %131, %cst_81 {dimension_numbers = #tpu.dot_dimension_numbers<[1], [0], [0], [1], [0, 0, 1, 1], [], []>} : vector<128x4xbf16>, vector<4x4xbf16>, vector<128x4xf32> -> vector<128x4xf32>
    %133 = arith.addf %127, %132 : vector<128x4xf32>
    %c1_82 = arith.constant 1 : index
    %c32_83 = arith.constant 32 : index
    %c0_84 = arith.constant 0 : index
    %134 = vector.load %arg9[%c1_82, %c32_83, %c0_84] : memref<2x160x4xf32, #tpu.memory_space<vmem>>, vector<1x128x4xf32>
    %135 = vector.shape_cast %134 : vector<1x128x4xf32> to vector<128x4xf32>
    %136 = arith.truncf %135 : vector<128x4xf32> to vector<128x4xbf16>
    %c8 = arith.constant 8 : index
    %c0_85 = arith.constant 0 : index
    %c0_86 = arith.constant 0 : index
    %137 = vector.load %arg4[%c8, %c0_85, %c0_86] : memref<9x4x4xbf16, #tpu.memory_space<vmem>>, vector<1x4x4xbf16>
    %138 = vector.shape_cast %137 : vector<1x4x4xbf16> to vector<4x4xbf16>
    %cst_87 = arith.constant dense<0.000000e+00> : vector<128x4xf32>
    %139 = tpu.matmul %136, %138, %cst_87 {dimension_numbers = #tpu.dot_dimension_numbers<[1], [0], [0], [1], [0, 0, 1, 1], [], []>} : vector<128x4xbf16>, vector<4x4xbf16>, vector<128x4xf32> -> vector<128x4xf32>
    %140 = arith.addf %133, %139 : vector<128x4xf32>
    %141 = arith.truncf %140 : vector<128x4xf32> to vector<128x4xbf16>
    %c0_88 = arith.constant 0 : index
    %c0_89 = arith.constant 0 : index
    %c0_90 = arith.constant 0 : index
    %142 = vector.load %arg5[%c0_88, %c0_89, %c0_90] : memref<1x128x4xbf16, #tpu.memory_space<vmem>>, vector<1x128x4xbf16>
    %143 = vector.shape_cast %142 : vector<1x128x4xbf16> to vector<128x4xbf16>
    %144 = vector.shape_cast %141 : vector<128x4xbf16> to vector<1x128x4xbf16>
    tpu.vector_store %arg5[%c0_88, %c0_89, %c0_90], %144 {strides = array<i32>} : memref<1x128x4xbf16, #tpu.memory_space<vmem>>, vector<1x128x4xbf16>,
    %c0_91 = arith.constant 0 : index
    %c0_92 = arith.constant 0 : index
    %c0_93 = arith.constant 0 : index
    %145 = vector.load %arg6[%c0_91, %c0_92, %c0_93] : memref<1x1x4xf32, #tpu.memory_space<vmem>>, vector<1x1x4xf32>
    %cst_94 = arith.constant dense<0.000000e+00> : vector<4xf32>
    %146 = vector.multi_reduction <add>, %140, %cst_94 [0] : vector<128x4xf32> to vector<4xf32>
    %147 = vector.shape_cast %146 : vector<4xf32> to vector<1x1x4xf32>
    %148 = arith.addf %145, %147 : vector<1x1x4xf32>
    %c0_95 = arith.constant 0 : index
    %c0_96 = arith.constant 0 : index
    %c0_97 = arith.constant 0 : index
    %149 = vector.load %arg6[%c0_95, %c0_96, %c0_97] : memref<1x1x4xf32, #tpu.memory_space<vmem>>, vector<1x1x4xf32>
    tpu.vector_store %arg6[%c0_95, %c0_96, %c0_97], %148 {strides = array<i32>} : memref<1x1x4xf32, #tpu.memory_space<vmem>>, vector<1x1x4xf32>,
    %c0_98 = arith.constant 0 : index
    %c0_99 = arith.constant 0 : index
    %c0_100 = arith.constant 0 : index
    %150 = vector.load %arg7[%c0_98, %c0_99, %c0_100] : memref<1x1x4xf32, #tpu.memory_space<vmem>>, vector<1x1x4xf32>
    %151 = arith.mulf %140, %140 : vector<128x4xf32>
    %cst_101 = arith.constant dense<0.000000e+00> : vector<4xf32>
    %152 = vector.multi_reduction <add>, %151, %cst_101 [0] : vector<128x4xf32> to vector<4xf32>
    %153 = vector.shape_cast %152 : vector<4xf32> to vector<1x1x4xf32>
    %154 = arith.addf %150, %153 : vector<1x1x4xf32>
    %c0_102 = arith.constant 0 : index
    %c0_103 = arith.constant 0 : index
    %c0_104 = arith.constant 0 : index
    %155 = vector.load %arg7[%c0_102, %c0_103, %c0_104] : memref<1x1x4xf32, #tpu.memory_space<vmem>>, vector<1x1x4xf32>
    tpu.vector_store %arg7[%c0_102, %c0_103, %c0_104], %154 {strides = array<i32>} : memref<1x1x4xf32, #tpu.memory_space<vmem>>, vector<1x1x4xf32>,
    return
  }
  func.func @transform_0(%arg0: i32, %arg1: i32) -> (i32, i32, i32) {
    %c0_i32 = arith.constant 0 : i32
    %c0_i32_0 = arith.constant 0 : i32
    %c0_i32_1 = arith.constant 0 : i32
    return %arg0, %c0_i32, %c0_i32_0 : i32, i32, i32
  }
  func.func @transform_1(%arg0: i32, %arg1: i32) -> (i32, i32, i32) {
    %c0_i32 = arith.constant 0 : i32
    %c0_i32_0 = arith.constant 0 : i32
    %c0_i32_1 = arith.constant 0 : i32
    return %arg0, %c0_i32, %c0_i32_0 : i32, i32, i32
  }
  func.func @transform_2(%arg0: i32, %arg1: i32) -> (i32, i32, i32) {
    %c0_i32 = arith.constant 0 : i32
    %c0_i32_0 = arith.constant 0 : i32
    %c0_i32_1 = arith.constant 0 : i32
    %c0_i32_2 = arith.constant 0 : i32
    return %c0_i32, %c0_i32_0, %c0_i32_1 : i32, i32, i32
  }
  func.func @transform_3(%arg0: i32, %arg1: i32) -> (i32, i32, i32) {
    %c0_i32 = arith.constant 0 : i32
    %c0_i32_0 = arith.constant 0 : i32
    return %arg0, %arg1, %c0_i32 : i32, i32, i32
  }
  func.func @transform_4(%arg0: i32, %arg1: i32) -> (i32, i32, i32) {
    %c0_i32 = arith.constant 0 : i32
    %c0_i32_0 = arith.constant 0 : i32
    %c0_i32_1 = arith.constant 0 : i32
    return %arg0, %c0_i32, %c0_i32_0 : i32, i32, i32
  }
  func.func @transform_5(%arg0: i32, %arg1: i32) -> (i32, i32, i32) {
    %c0_i32 = arith.constant 0 : i32
    %c0_i32_0 = arith.constant 0 : i32
    %c0_i32_1 = arith.constant 0 : i32
    return %arg0, %c0_i32, %c0_i32_0 : i32, i32, i32
  }
}

module attributes {stable_mosaic.version = 11 : i64} {
  func.func @_bn_res_act_kernel(%arg0: i32, %arg1: i32, %arg2: memref<1x256x16xbf16, #tpu.memory_space<vmem>>, %arg3: memref<1x256x16xbf16, #tpu.memory_space<vmem>>, %arg4: memref<1x6x16xf32, #tpu.memory_space<vmem>>, %arg5: memref<1x256x16xf32, #tpu.memory_space<vmem>>) attributes {dimension_semantics = [#tpu.dimension_semantics<parallel>, #tpu.dimension_semantics<parallel>], iteration_bounds = array<i64: 2, 1>, scalar_prefetch = 0 : i64, scratch_operands = 0 : i64, tpu.core_type = #tpu.core_type<tc>, window_params = [{transform_indices = @transform_0, window_bounds = array<i64: 1, 256, 16>}, {transform_indices = @transform_1, window_bounds = array<i64: 1, 256, 16>}, {transform_indices = @transform_2, window_bounds = array<i64: 1, 6, 16>}, {transform_indices = @transform_3, window_bounds = array<i64: 1, 256, 16>}]} {
    %c0 = arith.constant 0 : index
    %c0_0 = arith.constant 0 : index
    %c0_1 = arith.constant 0 : index
    %0 = vector.load %arg4[%c0, %c0_0, %c0_1] : memref<1x6x16xf32, #tpu.memory_space<vmem>>, vector<1x6x16xf32>
    %1 = vector.shape_cast %0 : vector<1x6x16xf32> to vector<6x16xf32>
    %c0_2 = arith.constant 0 : index
    %c0_3 = arith.constant 0 : index
    %c0_4 = arith.constant 0 : index
    %2 = vector.load %arg2[%c0_2, %c0_3, %c0_4] : memref<1x256x16xbf16, #tpu.memory_space<vmem>>, vector<1x256x16xbf16>
    %3 = vector.shape_cast %2 : vector<1x256x16xbf16> to vector<256x16xbf16>
    %4 = arith.extf %3 : vector<256x16xbf16> to vector<256x16xf32>
    %5 = vector.extract_strided_slice %1 {offsets = [0, 0], sizes = [1, 16], strides = [1, 1]} : vector<6x16xf32> to vector<1x16xf32>
    %6 = vector.broadcast %5 : vector<1x16xf32> to vector<256x16xf32>
    %7 = arith.mulf %4, %6 : vector<256x16xf32>
    %8 = vector.extract_strided_slice %1 {offsets = [1, 0], sizes = [1, 16], strides = [1, 1]} : vector<6x16xf32> to vector<1x16xf32>
    %9 = vector.broadcast %8 : vector<1x16xf32> to vector<256x16xf32>
    %10 = arith.addf %7, %9 : vector<256x16xf32>
    %c0_5 = arith.constant 0 : index
    %c0_6 = arith.constant 0 : index
    %c0_7 = arith.constant 0 : index
    %11 = vector.load %arg3[%c0_5, %c0_6, %c0_7] : memref<1x256x16xbf16, #tpu.memory_space<vmem>>, vector<1x256x16xbf16>
    %12 = vector.shape_cast %11 : vector<1x256x16xbf16> to vector<256x16xbf16>
    %13 = arith.extf %12 : vector<256x16xbf16> to vector<256x16xf32>
    %14 = arith.addf %10, %13 : vector<256x16xf32>
    %15 = vector.extract_strided_slice %1 {offsets = [2, 0], sizes = [1, 16], strides = [1, 1]} : vector<6x16xf32> to vector<1x16xf32>
    %16 = vector.broadcast %15 : vector<1x16xf32> to vector<256x16xf32>
    %17 = arith.mulf %14, %16 : vector<256x16xf32>
    %18 = vector.extract_strided_slice %1 {offsets = [4, 0], sizes = [1, 16], strides = [1, 1]} : vector<6x16xf32> to vector<1x16xf32>
    %19 = vector.broadcast %18 : vector<1x16xf32> to vector<256x16xf32>
    %20 = arith.addf %17, %19 : vector<256x16xf32>
    %21 = vector.extract_strided_slice %1 {offsets = [3, 0], sizes = [1, 16], strides = [1, 1]} : vector<6x16xf32> to vector<1x16xf32>
    %22 = vector.broadcast %21 : vector<1x16xf32> to vector<256x16xf32>
    %23 = arith.mulf %14, %22 : vector<256x16xf32>
    %24 = vector.extract_strided_slice %1 {offsets = [5, 0], sizes = [1, 16], strides = [1, 1]} : vector<6x16xf32> to vector<1x16xf32>
    %25 = vector.broadcast %24 : vector<1x16xf32> to vector<256x16xf32>
    %26 = arith.addf %23, %25 : vector<256x16xf32>
    %27 = arith.maximumf %20, %26 : vector<256x16xf32>
    %c0_8 = arith.constant 0 : index
    %c0_9 = arith.constant 0 : index
    %c0_10 = arith.constant 0 : index
    %28 = vector.load %arg5[%c0_8, %c0_9, %c0_10] : memref<1x256x16xf32, #tpu.memory_space<vmem>>, vector<1x256x16xf32>
    %29 = vector.shape_cast %28 : vector<1x256x16xf32> to vector<256x16xf32>
    %30 = vector.shape_cast %27 : vector<256x16xf32> to vector<1x256x16xf32>
    tpu.vector_store %arg5[%c0_8, %c0_9, %c0_10], %30 {strides = array<i32>} : memref<1x256x16xf32, #tpu.memory_space<vmem>>, vector<1x256x16xf32>,
    return
  }
  func.func @transform_0(%arg0: i32, %arg1: i32) -> (i32, i32, i32) {
    %c0_i32 = arith.constant 0 : i32
    %c0_i32_0 = arith.constant 0 : i32
    return %arg0, %arg1, %c0_i32 : i32, i32, i32
  }
  func.func @transform_1(%arg0: i32, %arg1: i32) -> (i32, i32, i32) {
    %c0_i32 = arith.constant 0 : i32
    %c0_i32_0 = arith.constant 0 : i32
    return %arg0, %arg1, %c0_i32 : i32, i32, i32
  }
  func.func @transform_2(%arg0: i32, %arg1: i32) -> (i32, i32, i32) {
    %c0_i32 = arith.constant 0 : i32
    %c0_i32_0 = arith.constant 0 : i32
    %c0_i32_1 = arith.constant 0 : i32
    return %arg0, %c0_i32, %c0_i32_0 : i32, i32, i32
  }
  func.func @transform_3(%arg0: i32, %arg1: i32) -> (i32, i32, i32) {
    %c0_i32 = arith.constant 0 : i32
    %c0_i32_0 = arith.constant 0 : i32
    return %arg0, %arg1, %c0_i32 : i32, i32, i32
  }
}

</mosaic_0001>

<bundles_post_ra>
// kernel: bottleneck_forward.6
= control target key start
LH: loop header
LB: loop body
LE: loop exit
PB: predicated region body
PF: predicated region fallthrough
CT: control target
= control target key end

     0   :  { %12 = vsyncpa [#allocation3], 0  ;;  %s1746_s0 = inlined_call_operand.vmem [shape: bf16[2,256,4], index: 0, kind: input, shape index: {}]   ;;  %s1747_s1 = inlined_call_operand.vmem [shape: f32[2,4,4], index: 1, kind: input, shape index: {}]   ;;  %s1748_s2 = inlined_call_operand.vmem [shape: bf16[4,16], index: 2, kind: input, shape index: {}]   ;;  %s1749_s3 = inlined_call_operand.vmem [shape: bf16[2,256,16], index: 3, kind: output, shape index: {0}]   ;;  %s1750_s4 = inlined_call_operand.vmem [shape: f32[2,1,16], index: 4, kind: output, shape index: {1}]   ;;  %s1751_s5 = inlined_call_operand.vmem [shape: f32[2,1,16], index: 5, kind: output, shape index: {2}]   ;;  %s1752_s6 = inlined_call_operand.hbm [shape: f32[2,1,4], index: 6, kind: output, shape index: {3}]  }
   0x1   :  { %14 = vsyncpa [#allocation3 + $0x1], 0  ;;  %s1356_s21 = smov 0   ;;  %s1358_s22 = smov 0  }
   0x2   :  { %s1360_s23 = smov 0   ;;  %s1362_s24 = smov 0  }
   0x3   :  { %s1364_s25 = smov 0   ;;  %s1366_s26 = smov 0  }
   0x4   :  { %s1368_s27 = smov 0   ;;  %s1370_s28 = smov 0  }
   0x5 LB: > { %1757 = sst [smem:[#allocation5_spill]] %s1297_s23  ;;  %s1025_s29 = sadd.s32 4294967295, %s1317_s28   ;;  %s1317_s28 = sphi %s1370_s28, %s20_s28   ;;  %s1313_s27 = sphi %s1368_s27, %s1772_s27   ;;  %s1309_s26 = sphi %s1366_s26, %s1775_s26   ;;  %s1305_s25 = sphi %s1364_s25, %s1770_s25   ;;  %s1301_s24 = sphi %s1362_s24, %s1769_s24   ;;  %s1297_s23 = sphi %s1360_s23, %s1768_s23   ;;  %s1293_s22 = sphi %s1358_s22, %s1774_s22   ;;  %s1289_s21 = sphi %s1356_s21, %s1773_s21  }
   0x6   : > { %1758 = sst [smem:[#allocation6_spill]] %s1309_s26  ;;  %s1026_s30 = sadd.s32 4294967294, %s1317_s28  }
   0x7   : > { %1759 = sst [smem:[#allocation7_spill]] %s1313_s27  ;;  %s29_s7 = sadd.s32 1, %s1309_s26 }
   0x8   : > { %p30_p0 = scmp.ge.s32.totalorder %s29_s7, 2  ;;  %s32_s8 = sadd.s32 1, %s1313_s27 }
   0x9   : > { %p204_p1 = scmp.ne.s32.totalorder %s1297_s23, %s1293_s22  ;;  %p205_p2 = scmp.eq.s32.totalorder %s1025_s29, 3 }
   0xa   : > { %s1777_s7 = smov (%p30_p0, %s29_s7), 0  ;;  %s1779_s8 = smov (!%p30_p0, %s32_s8), %s1313_s27 }
   0xb   : > { %1760 = sst [smem:[#allocation8_spill]] %s1777_s7  ;;  %p1405_p3 = por %p205_p2, %p204_p1 }
   0xc   : > { %p210_p4 = scmp.ne.s32.totalorder %s1293_s22, %s1289_s21  ;;  %p34_p5 = scmp.ge.s32.totalorder %s1779_s8, 2 }
   0xd   : > { %p211_p6 = scmp.eq.s32.totalorder %s1026_s30, 3  ;;  %p1029_p7 = scmp.ge.s32.totalorder %s1317_s28, 1 }
   0xe   : > { %p252_p8 = scmp.lt.s32.totalorder %s1317_s28, 5  ;;  %s1781_s8 = smov (%p34_p5, %s1779_s8), 0 }
   0xf   : > { %1762 = sst [smem:[#allocation9_spill]] %s1781_s8  ;;  %p1415_p9 = por %p211_p6, %p210_p4 }
  0x10   : > { %p253_p10 = pnand %p1029_p7, %p252_p8  ;;  %s191_s11 = ssub.s32 %s1313_s27, %s1781_s8 }
  0x11   : > { %s194_s12 = sadd.s32 1, %s1297_s23  ;;  %p192_p11 = scmp.eq.s32.totalorder %s191_s11, 0 }
  0x12   : > { %256 = sbr.rel (%p253_p10) target bundleno = 315 (0x13b), region = 32  ;;  %s1030_s15 = sshll.u32 (!%p253_p10), %s1301_s24, 4 }
  0x13   : > { %s1423_s13 = scalar_select %p192_p11, %s1297_s23, %s194_s12  }
  0x14   : > { %p305_p12 = scmp.lt.s32.totalorder (!%p253_p10), %s1305_s25, 1  ;;  %p307_p13 = scmp.lt.s32.totalorder (!%p253_p10), %s1030_s15, 31 }
  0x15   : > { %1764 = sst [smem:[#allocation10_spill]] %s1423_s13  ;;  %p1037_p0 = scmp.ne.s32.totalorder (!%p253_p10), %s1301_s24, 0 }
  0x19   : > { %s306_s16 = scalar_select %p305_p12, %s1305_s25, 1 }
  0x1a   : > { %s1783_s15 = smov (!%p307_p13, %s1030_s15), 31  ;;  %338 = sbr.rel (%p1037_p0) target bundleno = 34 (0x22), region = 36 }
  0x1b   : > { %s1031_s17 = sshll.u32 %s306_s16, 5  ;;  %s1033_s18 = sshll.u32 %s306_s16, 2  ;;  %vm339_vm0 = vcmask (!%p1037_p0), 122880   ;;  %vm342_vm1 = vcmask (!%p1037_p0), 24576   ;;  %v1319_v0 = vmov (!%p1037_p0), 0.0  }
  0x1c   : > { %s310_s19 = sadd.s32 %s1031_s17, %s1783_s15  ;;  %s1432_s30 = scalar_lea.vmem %s1747_s1, %s1033_s18 }
  0x1d   : > { %s1032_s11 = sshll.u32 %s310_s19, 2  ;;  %s1437_s7 = scalar_lea.vmem %s1750_s4, %s306_s16 }
  0x1e   : > { %s1442_s26 = scalar_lea.vmem %s1746_s0, %s1032_s11  ;;  %s1447_s15 = scalar_lea.vmem %s1749_s3, %s1032_s11  ;;  %340 = vst.msk [vmem:[%s1437_s7] sm:$0x1] (!%p1037_p0), %vm339_vm0, %v1319_v0 }
  0x1f   : > { %s1452_s18 = scalar_lea.vmem %s1751_s5, %s306_s16  ;;  %s1765_s19 = sand.u32 1, %s1293_s22  }
  0x20   : > { %s1456_s29 = scalar_lea.vmem [#allocation2], %s1765_s19  ;;  %341 = vst.msk [vmem:[%s1452_s18] sm:$0x1] (!%p1037_p0), %vm339_vm0, %v1319_v0 }
  0x21   : > { %343 = vst.msk [vmem:[%s1456_s29] sm:$0x1] %vm342_vm1, %v1319_v0 }
  0x22 PF: > { %v481_v1 = vld [vmem:[%s1748_s2] sm:$0x3]  ;;  %vm507_vm2 = vcmask 1041408   ;;  %v1113_v3 = vld [vmem:[%s1442_s26 + $0x8] sm:$0xff]   ;;  %v377_v4 = vlaneseq  ;;  %v1114_v7 = vld [vmem:[%s1442_s26 + $0x10] sm:$0xff]   ;;  %vm482_vm3 = vcmask 31744  }
  0x23   : > { %v1082_v2 = vld [vmem:[%s1442_s26] sm:$0xff]   ;;  %1149 = vmatprep.subr.msk.bf16.mxu0 %vm507_vm2, %v481_v1  ;;  %v509_v5 = vsel %vm507_vm2, %v481_v1, 0  ;;  %v1469_v8 = vld [vmem:[%s1442_s26 + $0x18] sm:$0xff]   ;;  %1150 = vmatprep.subr.msk.bf16.mxu1 %vm507_vm2, %v481_v1  ;;  %v1087_v10 = vunpack.c.l.bf16 %v1113_v3  ;;  %v1088_v12 = vunpack.c.h.bf16 %v1113_v3  ;;  %v1475_v14 = vld [vmem:[%s1442_s26 + $0x28] sm:$0xff]   ;;  %v1091_v16 = vunpack.c.l.bf16 %v1114_v7  ;;  %s1062_s24 = sshll.u32 %s1305_s25, 4  ;;  %s866_s14 = sshll.u32 %s1456_s29, 4  ;;  %s867_s14 = int_to_ptr.vmem [resolvable:$true] %s866_s14 }
  0x24   : > { %v1083_v6 = vunpack.c.l.bf16 %v1082_v2  ;;  %1130 = vmatpush3.bf16.msra.mxu0 %v509_v5  ;;  %v1084_v9 = vunpack.c.h.bf16 %v1082_v2  ;;  %v378_v11 = vshrl.u32 %v377_v4, 7  ;;  %1148 = vmatpush3.bf16.msra.mxu1 %v509_v5  ;;  %v1472_v13 = vld [vmem:[%s1442_s26 + $0x20] sm:$0xff]   ;;  %v1092_v17 = vunpack.c.h.bf16 %v1114_v7  ;;  %v1481_v24 = vld [vmem:[%s1442_s26 + $0x30] sm:$0xff]   ;;  %v1484_v25 = vld [vmem:[%s1442_s26 + $0x38] sm:$0xff]   ;;  %s1628_s13 = scalar_lea.hbm %s1752_s6, %s1062_s24  ;;  %s1766_s16 = sand.u32 1, %s1293_s22  }
  0x25   : > { %v376_v15 = vld [vmem:[%s1432_s30] sm:$0xf]  ;;  %v1095_v18 = vunpack.c.l.bf16 %v1469_v8  ;;  %v1096_v19 = vunpack.c.h.bf16 %v1469_v8  ;;  %v1099_v26 = vunpack.c.l.bf16 %v1472_v13  ;;  %v1100_v27 = vunpack.c.h.bf16 %v1472_v13  ;;  %s844_s30 = scalar_lea.sflag [#allocation3], %s1766_s16  ;;  %s1223_s11 = scalar_lea.vmem %s867_s14, 16 }
  0x26   : > { %v379_v20 = vsub.s32 0, %v378_v11  ;;  %v399_v21 = vsub.s32 2, %v378_v11  ;;  %v419_v22 = vsub.s32 1, %v378_v11  ;;  %v439_v23 = vsub.s32 3, %v378_v11  ;;  %p1224_p1 = scmp.ne.s32.totalorder %s867_s14, %s1223_s11  ;;  %s1320_s12 = smov [#allocation2]  }
  0x27   : > { %v1103_v28 = vunpack.c.l.bf16 %v1475_v14  ;;  %v1104_v29 = vunpack.c.h.bf16 %v1475_v14  ;;  %v1107_v34 = vunpack.c.l.bf16 %v1481_v24  ;;  %v1108_v35 = vunpack.c.h.bf16 %v1481_v24  ;;  %s1227_s17 = sshll.u32 %s1320_s12, 4  ;;  %s1228_s17 = int_to_ptr.vmem [resolvable:$false] %s1227_s17 }
  0x28   : > { %v1490_v30 = vrot.slane %v376_v15, %v379_v20  ;;  %v1492_v31 = vrot.slane %v376_v15, %v399_v21  ;;  %v1494_v32 = vrot.slane %v376_v15, %v419_v22  ;;  %v1496_v33 = vrot.slane %v376_v15, %v439_v23  ;;  %p1225_p2 = pnand %p1224_p1, %p1405_p3  ;;  %s1229_s20 = scalar_lea.vmem %s1228_s17, 32 }
  0x29   : > { %v1111_v36 = vunpack.c.l.bf16 %v1484_v25  ;;  %v1112_v37 = vunpack.c.h.bf16 %v1484_v25  ;;  %vm826_vm4 = vcmask 24576   ;;  %p1230_p5 = scmp.lt.s32.totalorder %s867_s14, %s1228_s17  ;;  %p1231_p6 = scmp.lt.s32.totalorder %s1229_s20, %s1223_s11 }
  0x2a   : > { %v381_v38 = vmul.f32 %v1083_v6, %v1490_v30  ;;  %v382_v39 = vmul.f32 %v1084_v9, %v1490_v30  ;;  %v383_v40 = vmul.f32 %v1087_v10, %v1490_v30  ;;  %v421_v41 = vmul.f32 %v1083_v6, %v1494_v32  ;;  %p1226_p4 = pneg %p1225_p2 }
  0x2b   : > { %v422_v42 = vmul.f32 %v1084_v9, %v1494_v32  ;;  %v423_v43 = vmul.f32 %v1087_v10, %v1494_v32  ;;  %v384_v44 = vmul.f32 %v1088_v12, %v1490_v30  ;;  %v424_v45 = vmul.f32 %v1088_v12, %v1494_v32  ;;  %p1232_p7 = por %p1231_p6, %p1230_p5 }
  0x2c   : > { %v401_v46 = vadd.f32 %v1492_v31, %v381_v38  ;;  %v402_v47 = vadd.f32 %v1492_v31, %v382_v39  ;;  %v403_v48 = vadd.f32 %v1492_v31, %v383_v40  ;;  %v441_v49 = vadd.f32 %v1496_v33, %v421_v41 }
  0x2d   : > { %v442_v50 = vadd.f32 %v1496_v33, %v422_v42  ;;  %v443_v51 = vadd.f32 %v1496_v33, %v423_v43  ;;  %v404_v52 = vadd.f32 %v1492_v31, %v384_v44  ;;  %v444_v53 = vadd.f32 %v1496_v33, %v424_v45  ;;  %p1233_p8 = pnand %p1232_p7, %p1226_p4 }
  0x2e   : > { %v457_v54 = vmax.f32 %v401_v46, %v441_v49  ;;  %v385_v55 = vmul.f32 %v1091_v16, %v1490_v30  ;;  %v386_v56 = vmul.f32 %v1092_v17, %v1490_v30  ;;  %v425_v57 = vmul.f32 %v1091_v16, %v1494_v32 }
  0x2f   : > { %v458_v58 = vmax.f32 %v402_v47, %v442_v50  ;;  %v459_v59 = vmax.f32 %v403_v48, %v443_v51  ;;  %v460_v60 = vmax.f32 %v404_v52, %v444_v53  ;;  %v426_v61 = vmul.f32 %v1092_v17, %v1494_v32 }
  0x30   : > { %v788_v62 = vsel %vm482_vm3, %v457_v54, 0.0  ;;  %v405_v63 = vadd.f32 %v1492_v31, %v385_v55  ;;  %v406_v0 = vadd.f32 %v1492_v31, %v386_v56  ;;  %v445_v1 = vadd.f32 %v1496_v33, %v425_v57 }
  0x31   : > { %v473_v2 = vpack.c.bf16 %v458_v58, %v457_v54  ;;  %v789_v3 = vsel %vm482_vm3, %v458_v58, 0.0  ;;  %v791_v4 = vsel %vm482_vm3, %v459_v59, 0.0  ;;  %v474_v5 = vpack.c.bf16 %v460_v60, %v459_v59 }
  0x32   : > { %v790_v6 = vadd.f32 %v789_v3, %v788_v62  ;;  %v793_v7 = vsel %vm482_vm3, %v460_v60, 0.0  ;;  %v446_v8 = vadd.f32 %v1496_v33, %v426_v61  ;;  %v461_v9 = vmax.f32 %v405_v63, %v445_v1 }
  0x33   : > { %1131 = vmatprep.mubr.msk.bf16.mxu0 %vm482_vm3, %v473_v2  ;;  %v387_v10 = vmul.f32 %v1095_v18, %v1490_v30  ;;  %v388_v11 = vmul.f32 %v1096_v19, %v1490_v30  ;;  %v427_v12 = vmul.f32 %v1095_v18, %v1494_v32  ;;  %v428_v15 = vmul.f32 %v1096_v19, %v1494_v32 }
  0x34   : > { %v792_v16 = vadd.f32 %v791_v4, %v790_v6  ;;  %1132 = vmatmul.mubr.msk.bf16.vlgmr.msra.gmra.mrb[0].mxu0 %vm482_vm3, %v474_v5  ;;  %v462_v17 = vmax.f32 %v406_v0, %v446_v8  ;;  %v795_v20 = vsel %vm482_vm3, %v461_v9, 0.0  ;;  %v389_v21 = vmul.f32 %v1099_v26, %v1490_v30 }
  0x35   : > { %v407_v22 = vadd.f32 %v1492_v31, %v387_v10  ;;  %v408_v23 = vadd.f32 %v1492_v31, %v388_v11  ;;  %v447_v38 = vadd.f32 %v1496_v33, %v427_v12  ;;  %v448_v18 = vadd.f32 %v1496_v33, %v428_v15 }
  0x36   : > { %v794_v39 = vadd.f32 %v793_v7, %v792_v16  ;;  %v475_v19 = vpack.c.bf16 %v462_v17, %v461_v9  ;;  %v797_v40 = vsel %vm482_vm3, %v462_v17, 0.0  ;;  %v390_v41 = vmul.f32 %v1100_v27, %v1490_v30 }
  0x37   : > { %v463_v42 = vmax.f32 %v407_v22, %v447_v38  ;;  %v464_v43 = vmax.f32 %v408_v23, %v448_v18  ;;  %v391_v44 = vmul.f32 %v1103_v28, %v1490_v30  ;;  %v409_v45 = vadd.f32 %v1492_v31, %v389_v21 }
  0x38   : > { %1135 = vmatprep.mubr.msk.bf16.mxu0 %vm482_vm3, %v475_v19  ;;  %v796_v46 = vadd.f32 %v795_v20, %v794_v39  ;;  %v410_v47 = vadd.f32 %v1492_v31, %v390_v41  ;;  %v429_v48 = vmul.f32 %v1099_v26, %v1494_v32  ;;  %v430_v49 = vmul.f32 %v1100_v27, %v1494_v32 }
  0x39   : > { %v476_v50 = vpack.c.bf16 %v464_v43, %v463_v42  ;;  %v411_v51 = vadd.f32 %v1492_v31, %v391_v44  ;;  %v431_v52 = vmul.f32 %v1103_v28, %v1494_v32  ;;  %v799_v53 = vsel %vm482_vm3, %v463_v42, 0.0 }
  0x3a   : > { %v449_v54 = vadd.f32 %v1496_v33, %v429_v48  ;;  %v450_v55 = vadd.f32 %v1496_v33, %v430_v49  ;;  %v798_v56 = vadd.f32 %v797_v40, %v796_v46  ;;  %v801_v26 = vsel %vm482_vm3, %v464_v43, 0.0 }
  0x3b   : > { %v451_v57 = vadd.f32 %v1496_v33, %v431_v52  ;;  %v392_v13 = vmul.f32 %v1104_v29, %v1490_v30  ;;  %v432_v27 = vmul.f32 %v1104_v29, %v1494_v32  ;;  %v393_v28 = vmul.f32 %v1107_v34, %v1490_v30 }
  0x3c   : > { %1136 = vmatmul.mubr.msk.bf16.gmra.mrb[4].mxu0 %vm482_vm3, %v476_v50  ;;  %v465_v58 = vmax.f32 %v409_v45, %v449_v54  ;;  %v466_v59 = vmax.f32 %v410_v47, %v450_v55  ;;  %v800_v60 = vadd.f32 %v799_v53, %v798_v56  ;;  %v394_v61 = vmul.f32 %v1108_v35, %v1490_v30 }
  0x3d   : > { %v467_v62 = vmax.f32 %v411_v51, %v451_v57  ;;  %v412_v63 = vadd.f32 %v1492_v31, %v392_v13  ;;  %v452_v0 = vadd.f32 %v1496_v33, %v432_v27  ;;  %v413_v14 = vadd.f32 %v1492_v31, %v393_v28  ;;  %v787_v51 = vld [vmem:[%s1456_s29] sm:$0x1] }
  0x3e   : > { %v477_v29 = vpack.c.bf16 %v466_v59, %v465_v58  ;;  %v802_v1 = vadd.f32 %v801_v26, %v800_v60  ;;  %v803_v2 = vsel %vm482_vm3, %v465_v58, 0.0  ;;  %v805_v3 = vsel %vm482_vm3, %v466_v59, 0.0 }
  0x3f   : > { %v807_v4 = vsel %vm482_vm3, %v467_v62, 0.0  ;;  %v468_v5 = vmax.f32 %v412_v63, %v452_v0  ;;  %v414_v6 = vadd.f32 %v1492_v31, %v394_v61  ;;  %v433_v7 = vmul.f32 %v1107_v34, %v1494_v32 }
  0x40   : > { %1139 = vmatprep.mubr.msk.bf16.mxu1 %vm482_vm3, %v477_v29  ;;  %v804_v8 = vadd.f32 %v803_v2, %v802_v1  ;;  %v434_v9 = vmul.f32 %v1108_v35, %v1494_v32  ;;  %v395_v10 = vmul.f32 %v1111_v36, %v1490_v30  ;;  %v396_v11 = vmul.f32 %v1112_v37, %v1490_v30 }
  0x41   : > { %v478_v12 = vpack.c.bf16 %v468_v5, %v467_v62  ;;  %v809_v15 = vsel %vm482_vm3, %v468_v5, 0.0  ;;  %v453_v34 = vadd.f32 %v1496_v33, %v433_v7  ;;  %v435_v16 = vmul.f32 %v1111_v36, %v1494_v32 }
  0x42   : > { %v806_v17 = vadd.f32 %v805_v3, %v804_v8  ;;  %v454_v24 = vadd.f32 %v1496_v33, %v434_v9  ;;  %v415_v35 = vadd.f32 %v1492_v31, %v395_v10  ;;  %v416_v21 = vadd.f32 %v1492_v31, %v396_v11 }
  0x43   : > { %1140 = vmatmul.mubr.msk.bf16.vlgmr.msra.gmra.mrb[0].mxu1 %vm482_vm3, %v478_v12  ;;  %v469_v20 = vmax.f32 %v413_v14, %v453_v34  ;;  %v436_v30 = vmul.f32 %v1112_v37, %v1494_v32  ;;  %v455_v22 = vadd.f32 %v1496_v33, %v435_v16 }
  0x44   : > { %v808_v23 = vadd.f32 %v807_v4, %v806_v17  ;;  %v470_v38 = vmax.f32 %v414_v6, %v454_v24 }
  0x45   : > { %v811_v36 = vsel %vm482_vm3, %v469_v20, 0.0  ;;  %v456_v18 = vadd.f32 %v1496_v33, %v436_v30  ;;  %v471_v39 = vmax.f32 %v415_v35, %v455_v22 }
  0x46   : > { %v810_v19 = vadd.f32 %v809_v15, %v808_v23  ;;  %v479_v40 = vpack.c.bf16 %v470_v38, %v469_v20  ;;  %v813_v41 = vsel %vm482_vm3, %v470_v38, 0.0 }
  0x47   : > { %v472_v42 = vmax.f32 %v416_v21, %v456_v18  ;;  %v815_v31 = vsel %vm482_vm3, %v471_v39, 0.0 }
  0x48   : > { %1143 = vmatprep.mubr.msk.bf16.mxu1 %vm482_vm3, %v479_v40  ;;  %v812_v25 = vadd.f32 %v811_v36, %v810_v19 }
  0x49   : > { %v480_v32 = vpack.c.bf16 %v472_v42, %v471_v39  ;;  %v817_v37 = vsel %vm482_vm3, %v472_v42, 0.0 }
  0x4a   : > { %v814_v43 = vadd.f32 %v813_v41, %v812_v25 }
  0x4b   : > { %1144 = vmatmul.mubr.msk.bf16.gmra.mrb[4].mxu1 %vm482_vm3, %v480_v32 }
  0x4c   : > { %v816_v33 = vadd.f32 %v815_v31, %v814_v43 }
  0x4e   : > { %v818_v44 = vadd.f32 %v817_v37, %v816_v33 }
  0x50   : > { %v819_v45 = vrot.slane %v818_v44, 4 }
  0x52   : > { %v820_v46 = vadd.f32 %v819_v45, %v818_v44 }
  0x54   : > { %v821_v47 = vrot.slane %v820_v46, 2 }
  0x56   : > { %v822_v48 = vadd.f32 %v821_v47, %v820_v46 }
  0x58   : > { %v823_v49 = vrot.slane %v822_v48, 1 }
  0x5a   : > { %v824_v50 = vadd.f32 %v823_v49, %v822_v48 }
  0x5c   : > { %v825_v52 = vadd.f32 %v824_v50, %v787_v51 }
  0x5e   : > { %827 = vst.msk [vmem:[%s1456_s29] sm:$0x1] %vm826_vm4, %v825_v52 }
  0x5f   : > { %1236 = shalt.err (!%p1233_p8)
}
  0x60   : > { %s1237_s25 = scalar_lea.hbm %s1628_s13, 16  ;;  %s1241_s23 = scalar_lea.hbm %s1752_s6, 32 }
  0x61   : > { %p1238_p10 = scmp.ne.s32.totalorder %s1628_s13, %s1237_s25  ;;  %p1242_p13 = scmp.lt.u32.totalorder %s1628_s13, %s1752_s6 }
  0x62   : > { %p1243_p0 = scmp.lt.u32.totalorder %s1241_s23, %s1237_s25  ;;  %p1245_p2 = scmp.lt.u32.totalorder %s1237_s25, %s1628_s13 }
  0x63   : > { %p1239_p11 = pnand %p1238_p10, %p1405_p3 }
  0x64   : > { %p1244_p1 = por %p1243_p0, %p1242_p13 }
  0x65   : > { %p1240_p12 = pneg %p1239_p11 }
  0x66   : > { %p1246_p4 = por %p1245_p2, %p1244_p1 }
  0x68   : > { %p1247_p5 = pnand %p1246_p4, %p1240_p12 }
  0x6a   : > { %1250 = shalt.err (!%p1247_p5)
}
  0x6b   : > { %1151 = dma.vmem_to_hbm [thread:$0]  (%p1405_p3), %s867_s14, 16, %s1628_s13, %s844_s30   ;;  %vm672_vm5 = vcmask 125952   ;;  %vm690_vm6 = vcmask 130048   ;;  %vm729_vm7 = vcmask 122880  }
 0x107   : > { %v1133_v53 = vpop.f32.mrb[0].mxu0 }
 0x108   : > { %v1067_v54 = vpack.c.bf16 %v1133_v53, %v1133_v53  ;;  %v545_v55 = vpop.f32.mrb[1].mxu0  ;;  %v734_v13 = vmul.f32 %v1133_v53, %v1133_v53  ;;  %v694_v0 = vsel %vm690_vm6, %v1133_v53, 0.0 }
 0x109   : > { %v1065_v56 = vpack.c.bf16 %v545_v55, %v545_v55  ;;  %v732_v26 = vmul.f32 %v545_v55, %v545_v55  ;;  %v1134_v57 = vpop.f32.mrb[2].mxu0  ;;  %v691_v58 = vsel %vm690_vm6, %v545_v55, 0.0 }
 0x10a   : > { %675 = vst.msk [vmem:[%s1447_s15 + $0x8] sm:$0xf] %vm672_vm5, %v1067_v54  ;;  %v1068_v27 = vpack.c.bf16 %v1134_v57, %v1134_v57  ;;  %v548_v28 = vpop.f32.mrb[3].mxu0  ;;  %v735_v62 = vmul.f32 %v1134_v57, %v1134_v57  ;;  %v751_v3 = vsel %vm690_vm6, %v734_v13, 0.0  ;;  %v696_v5 = vsel %vm690_vm6, %v1134_v57, 0.0 }
 0x10b   : > { %673 = vst.msk [vmem:[%s1447_s15] sm:$0xf] %vm672_vm5, %v1065_v56  ;;  %v1066_v59 = vpack.c.bf16 %v548_v28, %v548_v28  ;;  %v692_v60 = vsel %vm690_vm6, %v548_v28, 0.0  ;;  %v733_v61 = vmul.f32 %v548_v28, %v548_v28  ;;  %v748_v14 = vsel %vm690_vm6, %v732_v26, 0.0 }
 0x10c   : > { %676 = vst.msk [vmem:[%s1447_s15 + $0xc] sm:$0xf] %vm672_vm5, %v1068_v27  ;;  %v693_v63 = vadd.f32 %v692_v60, %v691_v58  ;;  %v753_v6 = vsel %vm690_vm6, %v735_v62, 0.0 }
 0x10d   : > { %674 = vst.msk [vmem:[%s1447_s15 + $0x4] sm:$0xf] %vm672_vm5, %v1066_v59  ;;  %v749_v29 = vsel %vm690_vm6, %v733_v61, 0.0 }
 0x10e   : > { %v695_v1 = vadd.f32 %v694_v0, %v693_v63  ;;  %v750_v2 = vadd.f32 %v749_v29, %v748_v14 }
 0x10f   : > { %v1137_v4 = vpop.f32.mrb[4].mxu0 }
 0x110   : > { %v752_v7 = vadd.f32 %v751_v3, %v750_v2  ;;  %v1071_v8 = vpack.c.bf16 %v1137_v4, %v1137_v4  ;;  %v561_v9 = vpop.f32.mrb[5].mxu0  ;;  %v697_v11 = vadd.f32 %v696_v5, %v695_v1  ;;  %v738_v35 = vmul.f32 %v1137_v4, %v1137_v4 }
 0x111   : > { %v1069_v10 = vpack.c.bf16 %v561_v9, %v561_v9  ;;  %v698_v12 = vsel %vm690_vm6, %v561_v9, 0.0  ;;  %v736_v15 = vmul.f32 %v561_v9, %v561_v9  ;;  %v1138_v34 = vpop.f32.mrb[6].mxu0  ;;  %v702_v18 = vsel %vm690_vm6, %v1137_v4, 0.0 }
 0x112   : > { %679 = vst.msk [vmem:[%s1447_s15 + $0x18] sm:$0xf] %vm672_vm5, %v1071_v8  ;;  %v754_v16 = vadd.f32 %v753_v6, %v752_v7  ;;  %v1072_v17 = vpack.c.bf16 %v1138_v34, %v1138_v34  ;;  %v564_v24 = vpop.f32.mrb[7].mxu0  ;;  %v699_v20 = vadd.f32 %v698_v12, %v697_v11  ;;  %v739_v39 = vmul.f32 %v1138_v34, %v1138_v34 }
 0x113   : > { %677 = vst.msk [vmem:[%s1447_s15 + $0x10] sm:$0xf] %vm672_vm5, %v1069_v10  ;;  %v755_v21 = vsel %vm690_vm6, %v736_v15, 0.0  ;;  %v1070_v30 = vpack.c.bf16 %v564_v24, %v564_v24  ;;  %v700_v23 = vsel %vm690_vm6, %v564_v24, 0.0  ;;  %v737_v38 = vmul.f32 %v564_v24, %v564_v24 }
 0x114   : > { %v756_v22 = vadd.f32 %v755_v21, %v754_v16  ;;  %680 = vst.msk [vmem:[%s1447_s15 + $0x1c] sm:$0xf] %vm672_vm5, %v1072_v17  ;;  %v701_v36 = vadd.f32 %v700_v23, %v699_v20  ;;  %v759_v41 = vsel %vm690_vm6, %v738_v35, 0.0  ;;  %v704_v37 = vsel %vm690_vm6, %v1138_v34, 0.0 }
 0x115   : > { %678 = vst.msk [vmem:[%s1447_s15 + $0x14] sm:$0xf] %vm672_vm5, %v1070_v30  ;;  %v757_v19 = vsel %vm690_vm6, %v737_v38, 0.0  ;;  %v761_v50 = vsel %vm690_vm6, %v739_v39, 0.0 }
 0x116   : > { %v1141_v40 = vpop.f32.mrb[0].mxu1  ;;  %v703_v42 = vadd.f32 %v702_v18, %v701_v36  ;;  %v758_v31 = vadd.f32 %v757_v19, %v756_v22 }
 0x117   : > { %v1075_v25 = vpack.c.bf16 %v1141_v40, %v1141_v40  ;;  %v577_v32 = vpop.f32.mrb[1].mxu1  ;;  %v742_v56 = vmul.f32 %v1141_v40, %v1141_v40  ;;  %v710_v27 = vsel %vm690_vm6, %v1141_v40, 0.0 }
 0x118   : > { %v1073_v43 = vpack.c.bf16 %v577_v32, %v577_v32  ;;  %v706_v33 = vsel %vm690_vm6, %v577_v32, 0.0  ;;  %v740_v44 = vmul.f32 %v577_v32, %v577_v32  ;;  %v1142_v45 = vpop.f32.mrb[2].mxu1  ;;  %v760_v46 = vadd.f32 %v759_v41, %v758_v31 }
 0x119   : > { %683 = vst.msk [vmem:[%s1447_s15 + $0x28] sm:$0xf] %vm672_vm5, %v1075_v25  ;;  %v705_v47 = vadd.f32 %v704_v37, %v703_v42  ;;  %v1076_v48 = vpack.c.bf16 %v1142_v45, %v1142_v45  ;;  %v580_v49 = vpop.f32.mrb[3].mxu1  ;;  %v743_v28 = vmul.f32 %v1142_v45, %v1142_v45  ;;  %v712_v60 = vsel %vm690_vm6, %v1142_v45, 0.0 }
 0x11a   : > { %681 = vst.msk [vmem:[%s1447_s15 + $0x20] sm:$0xf] %vm672_vm5, %v1073_v43  ;;  %v763_v51 = vsel %vm690_vm6, %v740_v44, 0.0  ;;  %v1074_v52 = vpack.c.bf16 %v580_v49, %v580_v49  ;;  %v762_v54 = vadd.f32 %v761_v50, %v760_v46  ;;  %v741_v55 = vmul.f32 %v580_v49, %v580_v49  ;;  %v689_v44 = vld [vmem:[%s1437_s7] sm:$0x1] }
 0x11b   : > { %v707_v53 = vadd.f32 %v706_v33, %v705_v47  ;;  %684 = vst.msk [vmem:[%s1447_s15 + $0x2c] sm:$0xf] %vm672_vm5, %v1076_v48  ;;  %v708_v26 = vsel %vm690_vm6, %v580_v49, 0.0  ;;  %v767_v14 = vsel %vm690_vm6, %v742_v56, 0.0  ;;  %v769_v8 = vsel %vm690_vm6, %v743_v28, 0.0 }
 0x11c   : > { %682 = vst.msk [vmem:[%s1447_s15 + $0x24] sm:$0xf] %vm672_vm5, %v1074_v52  ;;  %v764_v57 = vadd.f32 %v763_v51, %v762_v54  ;;  %v765_v58 = vsel %vm690_vm6, %v741_v55, 0.0  ;;  %v731_v47 = vld [vmem:[%s1452_s18] sm:$0x1] }
 0x11d   : > { %v709_v13 = vadd.f32 %v708_v26, %v707_v53 }
 0x11e   : > { %v1145_v59 = vpop.f32.mrb[4].mxu1  ;;  %v766_v62 = vadd.f32 %v765_v58, %v764_v57 }
 0x11f   : > { %v711_v61 = vadd.f32 %v710_v27, %v709_v13  ;;  %v1079_v63 = vpack.c.bf16 %v1145_v59, %v1145_v59  ;;  %v593_v0 = vpop.f32.mrb[5].mxu1  ;;  %v746_v34 = vmul.f32 %v1145_v59, %v1145_v59  ;;  %v718_v35 = vsel %vm690_vm6, %v1145_v59, 0.0 }
 0x120   : > { %v1077_v29 = vpack.c.bf16 %v593_v0, %v593_v0  ;;  %v714_v1 = vsel %vm690_vm6, %v593_v0, 0.0  ;;  %v744_v2 = vmul.f32 %v593_v0, %v593_v0  ;;  %v1146_v3 = vpop.f32.mrb[6].mxu1  ;;  %v768_v4 = vadd.f32 %v767_v14, %v766_v62 }
 0x121   : > { %687 = vst.msk [vmem:[%s1447_s15 + $0x38] sm:$0xf] %vm672_vm5, %v1079_v63  ;;  %v713_v5 = vadd.f32 %v712_v60, %v711_v61  ;;  %v1080_v6 = vpack.c.bf16 %v1146_v3, %v1146_v3  ;;  %v596_v7 = vpop.f32.mrb[7].mxu1  ;;  %v747_v20 = vmul.f32 %v1146_v3, %v1146_v3  ;;  %v775_v23 = vsel %vm690_vm6, %v746_v34, 0.0 }
 0x122   : > { %685 = vst.msk [vmem:[%s1447_s15 + $0x30] sm:$0xf] %vm672_vm5, %v1077_v29  ;;  %v771_v9 = vsel %vm690_vm6, %v744_v2, 0.0  ;;  %v1078_v10 = vpack.c.bf16 %v596_v7, %v596_v7  ;;  %v770_v12 = vadd.f32 %v769_v8, %v768_v4  ;;  %v745_v15 = vmul.f32 %v596_v7, %v596_v7 }
 0x123   : > { %v715_v11 = vadd.f32 %v714_v1, %v713_v5  ;;  %688 = vst.msk [vmem:[%s1447_s15 + $0x3c] sm:$0xf] %vm672_vm5, %v1080_v6  ;;  %v716_v16 = vsel %vm690_vm6, %v596_v7, 0.0  ;;  %v720_v38 = vsel %vm690_vm6, %v1146_v3, 0.0  ;;  %v777_v39 = vsel %vm690_vm6, %v747_v20, 0.0 }
 0x124   : > { %686 = vst.msk [vmem:[%s1447_s15 + $0x34] sm:$0xf] %vm672_vm5, %v1078_v10  ;;  %v772_v17 = vadd.f32 %v771_v9, %v770_v12  ;;  %v773_v21 = vsel %vm690_vm6, %v745_v15, 0.0 }
 0x125   : > { %v717_v24 = vadd.f32 %v716_v16, %v715_v11 }
 0x126   : > { %v774_v22 = vadd.f32 %v773_v21, %v772_v17 }
 0x127   : > { %v719_v30 = vadd.f32 %v718_v35, %v717_v24 }
 0x128   : > { %v776_v18 = vadd.f32 %v775_v23, %v774_v22 }
 0x129   : > { %v721_v36 = vadd.f32 %v720_v38, %v719_v30 }
 0x12a   : > { %v778_v40 = vadd.f32 %v777_v39, %v776_v18 }
 0x12b   : > { %v722_v19 = vrot.slane %v721_v36, 4 }
 0x12c   : > { %v779_v42 = vrot.slane %v778_v40, 4 }
 0x12d   : > { %v723_v41 = vadd.f32 %v722_v19, %v721_v36 }
 0x12e   : > { %v780_v25 = vadd.f32 %v779_v42, %v778_v40 }
 0x12f   : > { %v724_v31 = vrot.slane %v723_v41, 2 }
 0x130   : > { %v781_v37 = vrot.slane %v780_v25, 2 }
 0x131   : > { %v725_v32 = vadd.f32 %v724_v31, %v723_v41 }
 0x132   : > { %v782_v33 = vadd.f32 %v781_v37, %v780_v25 }
 0x133   : > { %v726_v43 = vrot.slane %v725_v32, 1 }
 0x134   : > { %v783_v46 = vrot.slane %v782_v33, 1 }
 0x135   : > { %v727_v45 = vadd.f32 %v726_v43, %v725_v32 }
 0x136   : > { %v784_v49 = vadd.f32 %v783_v46, %v782_v33 }
 0x137   : > { %v728_v48 = vadd.f32 %v727_v45, %v689_v44 }
 0x138   : > { %v785_v50 = vadd.f32 %v784_v49, %v731_v47 }
 0x139   : > { %730 = vst.msk [vmem:[%s1437_s7] sm:$0x1] %vm729_vm7, %v728_v48 }
 0x13a   : > { %786 = vst.msk [vmem:[%s1452_s18] sm:$0x1] %vm729_vm7, %v785_v50 }
 0x13b PF: > { %p1157_p3 = scmp.ge.s32.totalorder %s1317_s28, 2  ;;  %s902_s9 = sand.u32 1, %s1289_s21  }
 0x13c   : > { %s903_s15 = scalar_lea.sflag [#allocation3], %s902_s9 }
 0x13d   : > { %p1154_p6 = pnand %p1157_p3, %p1415_p9 }
 0x13f   : > { %1284 = dma.done.wait (!%p1154_p6), %s903_s15, 16  }
 0x140   : > { %1286 = vsyncadd (!%p1154_p6), %s903_s15, 4294967280  ;;  %s20_s28 = sadd.s32 1, %s1317_s28   ;;  %s1767_s26 = sld [smem:[#allocation5_spill]] }
 0x141   : > { %p17_p7 = scmp.ge.s32.totalorder %s20_s28, 6   ;;  %s1768_s23 = sld [smem:[#allocation10_spill]] }
 0x142   : > { %s1769_s24 = sld [smem:[#allocation6_spill]]  ;;  %s1770_s25 = sld [smem:[#allocation7_spill]] }
 0x143   : > { %s1771_s7 = sld [smem:[#allocation8_spill]]  ;;  %s1772_s27 = sld [smem:[#allocation9_spill]] }
 0x144   : > { %s1773_s21 = smov %s1293_s22  ;;  %19 = sbr.rel (!%p17_p7) target bundleno = 5 (0x5), region = 110 }
 0x146   : > { %s1774_s22 = smov %s1767_s26 }
 0x149   : > { %s1775_s26 = smov %s1771_s7 }
 0x14b   :  { %907 = vsyncpa [#allocation3], 1 }
 0x14c   :  { %909 = vsyncpa [#allocation3 + $0x1], 1 }

// kernel: bottleneck_forward.4
= control target key start
LH: loop header
LB: loop body
LE: loop exit
PB: predicated region body
PF: predicated region fallthrough
CT: control target
= control target key end

     0   :  { %s1168_s21 = smov 0   ;;  %s1170_s22 = smov 0   ;;  %s1364_s0 = inlined_call_operand.vmem [shape: bf16[2,256,16], index: 0, kind: input, shape index: {}]   ;;  %s1365_s1 = inlined_call_operand.vmem [shape: f32[2,4,16], index: 1, kind: input, shape index: {}]   ;;  %s1366_s2 = inlined_call_operand.vmem [shape: bf16[16,4], index: 2, kind: input, shape index: {}]   ;;  %s1367_s3 = inlined_call_operand.vmem [shape: bf16[2,256,4], index: 3, kind: output, shape index: {0}]   ;;  %s1368_s4 = inlined_call_operand.vmem [shape: f32[2,1,4], index: 4, kind: output, shape index: {1}]   ;;  %s1369_s5 = inlined_call_operand.vmem [shape: f32[2,1,4], index: 5, kind: output, shape index: {2}]   ;;  %s1370_s6 = inlined_call_operand.vmem [shape: f32[2,1,16], index: 6, kind: output, shape index: {3}]  }
   0x1   :  { %s1172_s1 = smov 0   ;;  %s1174_s23 = smov 0  }
   0x2   :  { %s1176_s24 = smov 0  }
   0x3 LB: > { %s26_s25 = sadd.s32 1, %s1122_s1  ;;  %s29_s26 = sadd.s32 1, %s1126_s23  ;;  %s1130_s24 = sphi %s1176_s24, %s17_s24   ;;  %s1126_s23 = sphi %s1174_s23, %s1374_s23   ;;  %s1122_s1 = sphi %s1172_s1, %s1373_s1   ;;  %s1118_s22 = sphi %s1170_s22, %s1372_s22   ;;  %s1114_s21 = sphi %s1168_s21, %s1371_s21  }
   0x4   : > { %p27_p0 = scmp.ge.s32.totalorder %s26_s25, 2  ;;  %p946_p1 = scmp.ge.s32.totalorder %s1130_s24, 1 }
   0x5   : > { %p249_p2 = scmp.lt.s32.totalorder %s1130_s24, 5 }
   0x6   : > { %s1376_s25 = smov (%p27_p0, %s26_s25), 0  ;;  %s1378_s26 = smov (!%p27_p0, %s29_s26), %s1126_s23 }
   0x7   : > { %p250_p3 = pnand %p946_p1, %p249_p2  ;;  %p31_p4 = scmp.ge.s32.totalorder %s1378_s26, 2 }
   0x8   : > { %s947_s27 = sshll.u32 (!%p250_p3), %s1114_s21, 4  ;;  %p301_p5 = scmp.lt.s32.totalorder (!%p250_p3), %s1118_s22, 1 }
   0x9   : > { %s1380_s26 = smov (%p31_p4, %s1378_s26), 0  ;;  %253 = sbr.rel (%p250_p3) target bundleno = 296 (0x128), region = 32 }
   0xa   : > { %p303_p6 = scmp.lt.s32.totalorder (!%p250_p3), %s947_s27, 31  ;;  %p953_p7 = scmp.ne.s32.totalorder (!%p250_p3), %s1114_s21, 0 }
  0x10   : > { %s1382_s22 = smov (!%p301_p5, %s1118_s22), 1  ;;  %s1384_s27 = smov (!%p303_p6, %s947_s27), 31 }
  0x11   : > { %s948_s28 = sshll.u32 %s1382_s22, 5  ;;  %s1204_s7 = scalar_lea.vmem %s1368_s4, %s1382_s22  ;;  %vm338_vm0 = vcmask (!%p953_p7), 24576   ;;  %vm341_vm1 = vcmask (!%p953_p7), 122880   ;;  %v1132_v0 = vmov (!%p953_p7), 0.0  }
  0x12   : > { %s306_s8 = sadd.s32 %s948_s28, %s1384_s27  ;;  %s1209_s11 = scalar_lea.vmem %s1369_s5, %s1382_s22  ;;  %339 = vst.msk [vmem:[%s1204_s7] sm:$0x1] (!%p953_p7), %vm338_vm0, %v1132_v0 }
  0x13   : > { %s949_s12 = sshll.u32 %s306_s8, 2  ;;  %s1214_s15 = scalar_lea.vmem %s1370_s6, %s1382_s22  ;;  %340 = vst.msk [vmem:[%s1209_s11] sm:$0x1] (!%p953_p7), %vm338_vm0, %v1132_v0 }
  0x14   : > { %s1219_s18 = scalar_lea.vmem %s1364_s0, %s949_s12  ;;  %s1224_s27 = scalar_lea.vmem %s1367_s3, %s949_s12  ;;  %342 = vst.msk [vmem:[%s1214_s15] sm:$0x1] (!%p953_p7), %vm341_vm1, %v1132_v0 }
  0x15   : > { %337 = sbr.rel (%p953_p7) target bundleno = 28 (0x1c), region = 36 }
  0x1c PF: > { %v1075_v1 = vld [vmem:[%s1366_s2] sm:$0xff]   ;;  %v345_v3 = vld [vmem:[%s1219_s18 + $0x8] sm:$0xff]   ;;  %vm423_vm2 = vcmask 130048   ;;  %v347_v4 = vld [vmem:[%s1219_s18 + $0x10] sm:$0xff]   ;;  %vm763_vm3 = vcmask 122880   ;;  %vm609_vm4 = vcmask 27648  }
  0x1d   : > { %v343_v2 = vld [vmem:[%s1219_s18] sm:$0xff]   ;;  %1014 = vmatprep.subr.bf16.mxu0 %v1075_v1  ;;  %v361_v7 = vunpack.c.l.bf16 %v345_v3  ;;  %1032 = vmatprep.subr.bf16.mxu1 %v1075_v1  ;;  %v362_v8 = vunpack.c.h.bf16 %v345_v3  ;;  %v363_v9 = vunpack.c.l.bf16 %v347_v4  ;;  %v364_v16 = vunpack.c.h.bf16 %v347_v4  ;;  %v353_v17 = vld [vmem:[%s1219_s18 + $0x28] sm:$0xff]   ;;  %v349_v19 = vld [vmem:[%s1219_s18 + $0x18] sm:$0xff]  }
  0x1e   : > { %v359_v5 = vunpack.c.l.bf16 %v343_v2  ;;  %v360_v6 = vunpack.c.h.bf16 %v343_v2  ;;  %1015 = vmatpush3.bf16.msra.mxu0 %v1075_v1  ;;  %1033 = vmatpush3.bf16.msra.mxu1 %v1075_v1  ;;  %v351_v13 = vld [vmem:[%s1219_s18 + $0x20] sm:$0xff]   ;;  %v355_v20 = vld [vmem:[%s1219_s18 + $0x30] sm:$0xff]   ;;  %v365_v22 = vunpack.c.l.bf16 %v349_v19  ;;  %v366_v25 = vunpack.c.h.bf16 %v349_v19  ;;  %v357_v29 = vld [vmem:[%s1219_s18 + $0x38] sm:$0xff]  }
  0x1f   : > { %1016 = vmatprep.mubr.msk.bf16.mxu0 %vm423_vm2, %v343_v2  ;;  %v728_v12 = vsel %vm423_vm2, %v361_v7, 0.0  ;;  %v730_v15 = vsel %vm423_vm2, %v362_v8, 0.0  ;;  %v732_v21 = vsel %vm423_vm2, %v363_v9, 0.0  ;;  %1024 = vmatprep.mubr.msk.bf16.mxu1 %vm423_vm2, %v351_v13  ;;  %v734_v24 = vsel %vm423_vm2, %v364_v16, 0.0  ;;  %v724_v62 = vld [vmem:[%s1214_s15] sm:$0x1] }
  0x20   : > { %v725_v10 = vsel %vm423_vm2, %v359_v5, 0.0  ;;  %v726_v11 = vsel %vm423_vm2, %v360_v6, 0.0  ;;  %v367_v27 = vunpack.c.l.bf16 %v351_v13  ;;  %v736_v28 = vsel %vm423_vm2, %v365_v22, 0.0 }
  0x21   : > { %v727_v14 = vadd.f32 %v726_v11, %v725_v10  ;;  %1017 = vmatmul.mubr.msk.bf16.vlgmr.msra.gmra.mrb[0].mxu0 %vm423_vm2, %v345_v3  ;;  %1025 = vmatmul.mubr.msk.bf16.vlgmr.msra.gmra.mrb[0].mxu1 %vm423_vm2, %v353_v17  ;;  %v368_v31 = vunpack.c.h.bf16 %v351_v13  ;;  %v738_v32 = vsel %vm423_vm2, %v366_v25, 0.0  ;;  %v369_v34 = vunpack.c.l.bf16 %v353_v17 }
  0x22   : > { %1020 = vmatprep.mubr.msk.bf16.mxu0 %vm423_vm2, %v347_v4  ;;  %1028 = vmatprep.mubr.msk.bf16.mxu1 %vm423_vm2, %v355_v20  ;;  %v740_v35 = vsel %vm423_vm2, %v367_v27, 0.0  ;;  %v370_v38 = vunpack.c.h.bf16 %v353_v17  ;;  %v371_v41 = vunpack.c.l.bf16 %v355_v20  ;;  %v372_v44 = vunpack.c.h.bf16 %v355_v20 }
  0x23   : > { %v729_v18 = vadd.f32 %v728_v12, %v727_v14  ;;  %v742_v37 = vsel %vm423_vm2, %v368_v31, 0.0  ;;  %v744_v40 = vsel %vm423_vm2, %v369_v34, 0.0  ;;  %v373_v47 = vunpack.c.l.bf16 %v357_v29 }
  0x24   : > { %v746_v43 = vsel %vm423_vm2, %v370_v38, 0.0  ;;  %v748_v46 = vsel %vm423_vm2, %v371_v41, 0.0  ;;  %v750_v49 = vsel %vm423_vm2, %v372_v44, 0.0  ;;  %v374_v50 = vunpack.c.h.bf16 %v357_v29 }
  0x25   : > { %v731_v23 = vadd.f32 %v730_v15, %v729_v18  ;;  %v752_v52 = vsel %vm423_vm2, %v373_v47, 0.0  ;;  %vm627_vm5 = vcmask 31744   ;;  %vm666_vm6 = vcmask 24576  }
  0x26   : > { %v754_v54 = vsel %vm423_vm2, %v374_v50, 0.0 }
  0x27   : > { %v733_v26 = vadd.f32 %v732_v21, %v731_v23 }
  0x29   : > { %v735_v30 = vadd.f32 %v734_v24, %v733_v26  ;;  %1021 = vmatmul.mubr.msk.bf16.gmra.mrb[4].mxu0 %vm423_vm2, %v349_v19  ;;  %1029 = vmatmul.mubr.msk.bf16.gmra.mrb[4].mxu1 %vm423_vm2, %v357_v29 }
  0x2b   : > { %v737_v33 = vadd.f32 %v736_v28, %v735_v30 }
  0x2d   : > { %v739_v36 = vadd.f32 %v738_v32, %v737_v33 }
  0x2f   : > { %v741_v39 = vadd.f32 %v740_v35, %v739_v36 }
  0x31   : > { %v743_v42 = vadd.f32 %v742_v37, %v741_v39 }
  0x33   : > { %v745_v45 = vadd.f32 %v744_v40, %v743_v42 }
  0x35   : > { %v747_v48 = vadd.f32 %v746_v43, %v745_v45 }
  0x37   : > { %v749_v51 = vadd.f32 %v748_v46, %v747_v48 }
  0x39   : > { %v751_v53 = vadd.f32 %v750_v49, %v749_v51 }
  0x3b   : > { %v753_v55 = vadd.f32 %v752_v52, %v751_v53 }
  0x3d   : > { %v755_v56 = vadd.f32 %v754_v54, %v753_v55 }
  0x3f   : > { %v756_v57 = vrot.slane %v755_v56, 4 }
  0x41   : > { %v757_v58 = vadd.f32 %v756_v57, %v755_v56 }
  0x43   : > { %v758_v59 = vrot.slane %v757_v58, 2 }
  0x45   : > { %v759_v60 = vadd.f32 %v758_v59, %v757_v58 }
  0x47   : > { %v760_v61 = vrot.slane %v759_v60, 1 }
  0x49   : > { %v761_v63 = vadd.f32 %v760_v61, %v759_v60 }
  0x4b   : > { %v762_v0 = vadd.f32 %v761_v63, %v724_v62 }
  0x4d   : > { %764 = vst.msk [vmem:[%s1214_s15] sm:$0x1] %vm763_vm3, %v762_v0 }
  0xf4   : > { %v1018_v1 = vpop.f32.mrb[0].mxu0  ;;  %v1275_v16 = vpop.f32.mrb[0].mxu1 }
  0xf5   : > { %v991_v2 = vpack.c.bf16 %v1018_v1, %v1018_v1  ;;  %v482_v3 = vpop.f32.mrb[1].mxu0  ;;  %v671_v7 = vmul.f32 %v1018_v1, %v1018_v1  ;;  %v631_v17 = vsel %vm627_vm5, %v1018_v1, 0.0  ;;  %v999_v20 = vpack.c.bf16 %v1275_v16, %v1275_v16  ;;  %v514_v21 = vpop.f32.mrb[1].mxu1 }
  0xf6   : > { %v989_v4 = vpack.c.bf16 %v482_v3, %v482_v3  ;;  %v669_v5 = vmul.f32 %v482_v3, %v482_v3  ;;  %v1019_v6 = vpop.f32.mrb[2].mxu0  ;;  %v628_v10 = vsel %vm627_vm5, %v482_v3, 0.0  ;;  %v997_v24 = vpack.c.bf16 %v514_v21, %v514_v21  ;;  %v1284_v25 = vpop.f32.mrb[2].mxu1 }
  0xf7   : > { %612 = vst.msk [vmem:[%s1224_s27 + $0x8] sm:$0xf] %vm609_vm4, %v991_v2  ;;  %v992_v8 = vpack.c.bf16 %v1019_v6, %v1019_v6  ;;  %v485_v9 = vpop.f32.mrb[3].mxu0  ;;  %v672_v14 = vmul.f32 %v1019_v6, %v1019_v6  ;;  %v688_v26 = vsel %vm627_vm5, %v671_v7, 0.0  ;;  %620 = vst.msk [vmem:[%s1224_s27 + $0x28] sm:$0xf] %vm609_vm4, %v999_v20  ;;  %v1000_v28 = vpack.c.bf16 %v1284_v25, %v1284_v25 }
  0xf8   : > { %610 = vst.msk [vmem:[%s1224_s27] sm:$0xf] %vm609_vm4, %v989_v4  ;;  %v990_v11 = vpack.c.bf16 %v485_v9, %v485_v9  ;;  %v629_v12 = vsel %vm627_vm5, %v485_v9, 0.0  ;;  %v670_v13 = vmul.f32 %v485_v9, %v485_v9  ;;  %v685_v18 = vsel %vm627_vm5, %v669_v5, 0.0  ;;  %v517_v29 = vpop.f32.mrb[3].mxu1 }
  0xf9   : > { %613 = vst.msk [vmem:[%s1224_s27 + $0xc] sm:$0xf] %vm609_vm4, %v992_v8  ;;  %v630_v15 = vadd.f32 %v629_v12, %v628_v10  ;;  %v633_v30 = vsel %vm627_vm5, %v1019_v6, 0.0  ;;  %v690_v31 = vsel %vm627_vm5, %v672_v14, 0.0  ;;  %618 = vst.msk [vmem:[%s1224_s27 + $0x20] sm:$0xf] %vm609_vm4, %v997_v24  ;;  %v677_v52 = vmul.f32 %v514_v21, %v514_v21 }
  0xfa   : > { %611 = vst.msk [vmem:[%s1224_s27 + $0x4] sm:$0xf] %vm609_vm4, %v990_v11  ;;  %v686_v19 = vsel %vm627_vm5, %v670_v13, 0.0  ;;  %621 = vst.msk [vmem:[%s1224_s27 + $0x2c] sm:$0xf] %vm609_vm4, %v1000_v28  ;;  %v998_v53 = vpack.c.bf16 %v517_v29, %v517_v29  ;;  %v643_v1 = vsel %vm627_vm5, %v514_v21, 0.0  ;;  %v678_v8 = vmul.f32 %v517_v29, %v517_v29 }
  0xfb   : > { %v632_v22 = vadd.f32 %v631_v17, %v630_v15  ;;  %v687_v23 = vadd.f32 %v686_v19, %v685_v18  ;;  %v700_v7 = vsel %vm627_vm5, %v677_v52, 0.0  ;;  %v679_v12 = vmul.f32 %v1275_v16, %v1275_v16 }
  0xfc   : > { %v1022_v27 = vpop.f32.mrb[4].mxu0  ;;  %v1030_v50 = vpop.f32.mrb[4].mxu1  ;;  %619 = vst.msk [vmem:[%s1224_s27 + $0x24] sm:$0xf] %vm609_vm4, %v998_v53  ;;  %v645_v13 = vsel %vm627_vm5, %v517_v29, 0.0  ;;  %v647_v17 = vsel %vm627_vm5, %v1275_v16, 0.0  ;;  %v680_v18 = vmul.f32 %v1284_v25, %v1284_v25 }
  0xfd   : > { %v689_v32 = vadd.f32 %v688_v26, %v687_v23  ;;  %v995_v33 = vpack.c.bf16 %v1022_v27, %v1022_v27  ;;  %v498_v34 = vpop.f32.mrb[5].mxu0  ;;  %v634_v36 = vadd.f32 %v633_v30, %v632_v22  ;;  %v675_v46 = vmul.f32 %v1022_v27, %v1022_v27  ;;  %v530_v54 = vpop.f32.mrb[5].mxu1 }
  0xfe   : > { %v993_v35 = vpack.c.bf16 %v498_v34, %v498_v34  ;;  %v635_v37 = vsel %vm627_vm5, %v498_v34, 0.0  ;;  %v673_v38 = vmul.f32 %v498_v34, %v498_v34  ;;  %v1023_v39 = vpop.f32.mrb[6].mxu0  ;;  %v639_v55 = vsel %vm627_vm5, %v1022_v27, 0.0  ;;  %v1031_v59 = vpop.f32.mrb[6].mxu1 }
  0xff   : > { %616 = vst.msk [vmem:[%s1224_s27 + $0x18] sm:$0xf] %vm609_vm4, %v995_v33  ;;  %v691_v40 = vadd.f32 %v690_v31, %v689_v32  ;;  %v996_v41 = vpack.c.bf16 %v1023_v39, %v1023_v39  ;;  %v501_v42 = vpop.f32.mrb[7].mxu0  ;;  %v636_v43 = vadd.f32 %v635_v37, %v634_v36  ;;  %v676_v56 = vmul.f32 %v1023_v39, %v1023_v39  ;;  %v533_v62 = vpop.f32.mrb[7].mxu1 }
 0x100   : > { %614 = vst.msk [vmem:[%s1224_s27 + $0x10] sm:$0xf] %vm609_vm4, %v993_v35  ;;  %v692_v44 = vsel %vm627_vm5, %v673_v38, 0.0  ;;  %v994_v45 = vpack.c.bf16 %v501_v42, %v501_v42  ;;  %v637_v48 = vsel %vm627_vm5, %v501_v42, 0.0  ;;  %v674_v49 = vmul.f32 %v501_v42, %v501_v42 }
 0x101   : > { %v693_v47 = vadd.f32 %v692_v44, %v691_v40  ;;  %617 = vst.msk [vmem:[%s1224_s27 + $0x1c] sm:$0xf] %vm609_vm4, %v996_v41  ;;  %v638_v51 = vadd.f32 %v637_v48, %v636_v43  ;;  %v1003_v58 = vpack.c.bf16 %v1030_v50, %v1030_v50  ;;  %v696_v63 = vsel %vm627_vm5, %v675_v46, 0.0 }
 0x102   : > { %615 = vst.msk [vmem:[%s1224_s27 + $0x14] sm:$0xf] %vm609_vm4, %v994_v45  ;;  %v694_v57 = vsel %vm627_vm5, %v674_v49, 0.0  ;;  %v641_v0 = vsel %vm627_vm5, %v1023_v39, 0.0  ;;  %v1001_v2 = vpack.c.bf16 %v530_v54, %v530_v54  ;;  %v1004_v5 = vpack.c.bf16 %v1031_v59, %v1031_v59 }
 0x103   : > { %v640_v60 = vadd.f32 %v639_v55, %v638_v51  ;;  %v695_v61 = vadd.f32 %v694_v57, %v693_v47  ;;  %624 = vst.msk [vmem:[%s1224_s27 + $0x38] sm:$0xf] %vm609_vm4, %v1003_v58  ;;  %v698_v6 = vsel %vm627_vm5, %v676_v56, 0.0  ;;  %v1002_v9 = vpack.c.bf16 %v533_v62, %v533_v62  ;;  %v626_v56 = vld [vmem:[%s1204_s7] sm:$0x1] }
 0x104   : > { %622 = vst.msk [vmem:[%s1224_s27 + $0x30] sm:$0xf] %vm609_vm4, %v1001_v2  ;;  %625 = vst.msk [vmem:[%s1224_s27 + $0x3c] sm:$0xf] %vm609_vm4, %v1004_v5  ;;  %v702_v19 = vsel %vm627_vm5, %v678_v8, 0.0  ;;  %v681_v20 = vmul.f32 %v530_v54, %v530_v54  ;;  %v704_v23 = vsel %vm627_vm5, %v679_v12, 0.0  ;;  %v682_v30 = vmul.f32 %v533_v62, %v533_v62 }
 0x105   : > { %v697_v3 = vadd.f32 %v696_v63, %v695_v61  ;;  %v642_v4 = vadd.f32 %v641_v0, %v640_v60  ;;  %623 = vst.msk [vmem:[%s1224_s27 + $0x34] sm:$0xf] %vm609_vm4, %v1002_v9  ;;  %v649_v24 = vsel %vm627_vm5, %v1284_v25, 0.0  ;;  %v651_v26 = vsel %vm627_vm5, %v530_v54, 0.0 }
 0x106   : > { %v706_v29 = vsel %vm627_vm5, %v680_v18, 0.0  ;;  %v708_v16 = vsel %vm627_vm5, %v681_v20, 0.0  ;;  %v683_v33 = vmul.f32 %v1030_v50, %v1030_v50  ;;  %v653_v34 = vsel %vm627_vm5, %v533_v62, 0.0 }
 0x107   : > { %v644_v10 = vadd.f32 %v643_v1, %v642_v4  ;;  %v699_v11 = vadd.f32 %v698_v6, %v697_v3  ;;  %v655_v37 = vsel %vm627_vm5, %v1030_v50, 0.0  ;;  %v684_v38 = vmul.f32 %v1031_v59, %v1031_v59 }
 0x108   : > { %v710_v25 = vsel %vm627_vm5, %v682_v30, 0.0  ;;  %v712_v41 = vsel %vm627_vm5, %v683_v33, 0.0  ;;  %v657_v42 = vsel %vm627_vm5, %v1031_v59, 0.0  ;;  %v668_v59 = vld [vmem:[%s1209_s11] sm:$0x1] }
 0x109   : > { %v701_v14 = vadd.f32 %v700_v7, %v699_v11  ;;  %v646_v15 = vadd.f32 %v645_v13, %v644_v10  ;;  %v714_v45 = vsel %vm627_vm5, %v684_v38, 0.0 }
 0x10b   : > { %v648_v21 = vadd.f32 %v647_v17, %v646_v15  ;;  %v703_v22 = vadd.f32 %v702_v19, %v701_v14 }
 0x10d   : > { %v705_v27 = vadd.f32 %v704_v23, %v703_v22  ;;  %v650_v28 = vadd.f32 %v649_v24, %v648_v21 }
 0x10f   : > { %v652_v31 = vadd.f32 %v651_v26, %v650_v28  ;;  %v707_v32 = vadd.f32 %v706_v29, %v705_v27 }
 0x111   : > { %v709_v35 = vadd.f32 %v708_v16, %v707_v32  ;;  %v654_v36 = vadd.f32 %v653_v34, %v652_v31 }
 0x113   : > { %v656_v39 = vadd.f32 %v655_v37, %v654_v36  ;;  %v711_v40 = vadd.f32 %v710_v25, %v709_v35 }
 0x115   : > { %v658_v43 = vadd.f32 %v657_v42, %v656_v39  ;;  %v713_v44 = vadd.f32 %v712_v41, %v711_v40 }
 0x117   : > { %v659_v46 = vrot.slane %v658_v43, 4  ;;  %v715_v47 = vadd.f32 %v714_v45, %v713_v44 }
 0x119   : > { %v660_v48 = vadd.f32 %v659_v46, %v658_v43  ;;  %v716_v49 = vrot.slane %v715_v47, 4 }
 0x11b   : > { %v661_v50 = vrot.slane %v660_v48, 2  ;;  %v717_v51 = vadd.f32 %v716_v49, %v715_v47 }
 0x11d   : > { %v662_v52 = vadd.f32 %v661_v50, %v660_v48  ;;  %v718_v53 = vrot.slane %v717_v51, 2 }
 0x11f   : > { %v663_v54 = vrot.slane %v662_v52, 1  ;;  %v719_v55 = vadd.f32 %v718_v53, %v717_v51 }
 0x121   : > { %v664_v57 = vadd.f32 %v663_v54, %v662_v52  ;;  %v720_v58 = vrot.slane %v719_v55, 1 }
 0x123   : > { %v665_v60 = vadd.f32 %v664_v57, %v626_v56  ;;  %v721_v61 = vadd.f32 %v720_v58, %v719_v55 }
 0x125   : > { %667 = vst.msk [vmem:[%s1204_s7] sm:$0x1] %vm666_vm6, %v665_v60  ;;  %v722_v62 = vadd.f32 %v721_v61, %v668_v59 }
 0x127   : > { %723 = vst.msk [vmem:[%s1209_s11] sm:$0x1] %vm666_vm6, %v722_v62 }
 0x128 PF: > { %s17_s24 = sadd.s32 1, %s1130_s24   ;;  %s1371_s21 = smov %s1122_s1 }
 0x129   : > { %p14_p8 = scmp.ge.s32.totalorder %s17_s24, 6   ;;  %s1372_s22 = smov %s1126_s23 }
 0x12a   : > { %s1373_s1 = smov %s1376_s25  ;;  %s1374_s23 = smov %s1380_s26 }
 0x12b   :  { %16 = sbr.rel (!%p14_p8) target bundleno = 3 (0x3), region = 105 }

// kernel: bottleneck_forward.7
= control target key start
LH: loop header
LB: loop body
LE: loop exit
PB: predicated region body
PF: predicated region fallthrough
CT: control target
= control target key end

     0   :  { %s1065_s12 = smov 0   ;;  %s1067_s13 = smov 0   ;;  %s1423_s0 = inlined_call_operand.vmem [shape: bf16[2,256,16], index: 0, kind: input, shape index: {}]   ;;  %s1424_s1 = inlined_call_operand.vmem [shape: bf16[2,256,16], index: 1, kind: input, shape index: {}]   ;;  %s1425_s2 = inlined_call_operand.vmem [shape: f32[2,6,16], index: 2, kind: input, shape index: {}]   ;;  %s1426_s3 = inlined_call_operand.vmem [shape: f32[2,256,16], index: 3, kind: output, shape index: {}]  }
   0x1   :  { %s1069_s14 = smov 0  }
   0x2 LB: > { %s25_s15 = sadd.s32 1, %s1039_s13  ;;  %p826_p0 = scmp.ge.s32.totalorder %s1043_s14, 1  ;;  %s1043_s14 = sphi %s1069_s14, %s13_s14   ;;  %s1039_s13 = sphi %s1067_s13, %s1428_s13   ;;  %s1035_s12 = sphi %s1065_s12, %s1427_s12  }
   0x3   : > { %p27_p1 = scmp.ge.s32.totalorder %s25_s15, 2  ;;  %p184_p2 = scmp.lt.s32.totalorder %s1043_s14, 3 }
   0x5   : > { %s1430_s15 = smov (%p27_p1, %s25_s15), 0  ;;  %p185_p3 = pnand %p826_p0, %p184_p2 }
   0x6   : > { %p230_p4 = scmp.lt.s32.totalorder (!%p185_p3), %s1035_s12, 1  ;;  %v328_v0 = vlaneseq (!%p185_p3)  ;;  %vm672_vm0 = vcmask (!%p185_p3), 130048  }
   0x7   : > { %188 = sbr.rel (%p185_p3) target bundleno = 108 (0x6c), region = 32 }
   0x8   : > { %v329_v1 = vshrl.u32 (!%p185_p3), %v328_v0, 7 }
   0xa   : > { %v330_v2 = vsub.s32 (!%p185_p3), 0, %v329_v1  ;;  %v366_v3 = vsub.s32 (!%p185_p3), 1, %v329_v1  ;;  %v498_v4 = vsub.s32 (!%p185_p3), 2, %v329_v1  ;;  %v534_v5 = vsub.s32 (!%p185_p3), 4, %v329_v1 }
   0xb   : > { %v570_v6 = vsub.s32 (!%p185_p3), 3, %v329_v1  ;;  %v606_v7 = vsub.s32 (!%p185_p3), 5, %v329_v1 }
   0xe   : > { %s1432_s12 = smov (!%p230_p4, %s1035_s12), 1 }
   0xf   : > { %s836_s16 = sshll.u32 %s1432_s12, 7  ;;  %s831_s17 = sshll.u32 %s1432_s12, 3 }
  0x10   : > { %s1090_s20 = scalar_lea.vmem %s1423_s0, %s836_s16  ;;  %s1095_s23 = scalar_lea.vmem %s1424_s1, %s836_s16 }
  0x11   : > { %s252_s26 = scalar_lea.vmem %s1425_s2, %s831_s17  ;;  %v840_v8 = vld [vmem:[%s1090_s20] sm:$0xff]   ;;  %v967_v10 = vld [vmem:[%s1090_s20 + $0x8] sm:$0xff]   ;;  %v968_v21 = vld [vmem:[%s1090_s20 + $0x10] sm:$0xff]   ;;  %s838_s27 = sshll.u32 %s1432_s12, 8 }
  0x12   : > { %v904_v9 = vld [vmem:[%s1095_s23] sm:$0xff]   ;;  %v841_v12 = vunpack.c.l.bf16 %v840_v8  ;;  %v842_v14 = vunpack.c.h.bf16 %v840_v8  ;;  %v982_v16 = vld [vmem:[%s1095_s23 + $0x8] sm:$0xff]   ;;  %v983_v22 = vld [vmem:[%s1095_s23 + $0x10] sm:$0xff]   ;;  %v845_v25 = vunpack.c.l.bf16 %v967_v10  ;;  %v846_v29 = vunpack.c.h.bf16 %v967_v10  ;;  %s1153_s30 = scalar_lea.vmem %s1426_s3, %s838_s27 }
  0x13   : > { %v263_v11 = vld [vmem:[%s252_s26] sm:$0x3f]  ;;  %v905_v13 = vunpack.c.l.bf16 %v904_v9  ;;  %v906_v15 = vunpack.c.h.bf16 %v904_v9  ;;  %v909_v26 = vunpack.c.l.bf16 %v982_v16  ;;  %v910_v30 = vunpack.c.h.bf16 %v982_v16  ;;  %v1121_v31 = vld [vmem:[%s1090_s20 + $0x18] sm:$0xff]  }
  0x14   : > { %v1104_v17 = vrot.slane %v263_v11, %v330_v2  ;;  %v1106_v18 = vrot.slane %v263_v11, %v366_v3  ;;  %v1108_v19 = vrot.slane %v263_v11, %v498_v4  ;;  %v1110_v20 = vrot.slane %v263_v11, %v534_v5  ;;  %v1125_v36 = vld [vmem:[%s1095_s23 + $0x18] sm:$0xff]  }
  0x15   : > { %v1114_v23 = vrot.slane %v263_v11, %v570_v6  ;;  %v1116_v24 = vrot.slane %v263_v11, %v606_v7  ;;  %v849_v33 = vunpack.c.l.bf16 %v968_v21  ;;  %v913_v34 = vunpack.c.l.bf16 %v983_v22 }
  0x16   : > { %v332_v27 = vmul.f32 %v841_v12, %v1104_v17  ;;  %v333_v28 = vmul.f32 %v842_v14, %v1104_v17  ;;  %v334_v32 = vmul.f32 %v845_v25, %v1104_v17  ;;  %v850_v35 = vunpack.c.h.bf16 %v968_v21 }
  0x17   : > { %v335_v39 = vmul.f32 %v846_v29, %v1104_v17  ;;  %v914_v40 = vunpack.c.h.bf16 %v983_v22  ;;  %v336_v42 = vmul.f32 %v849_v33, %v1104_v17  ;;  %v853_v44 = vunpack.c.l.bf16 %v1121_v31  ;;  %v985_v22 = vld [vmem:[%s1095_s23 + $0x20] sm:$0xff]  }
  0x18   : > { %v368_v37 = vadd.f32 %v1106_v18, %v332_v27  ;;  %v369_v38 = vadd.f32 %v1106_v18, %v333_v28  ;;  %v370_v41 = vadd.f32 %v1106_v18, %v334_v32  ;;  %v337_v43 = vmul.f32 %v850_v35, %v1104_v17 }
  0x19   : > { %v371_v47 = vadd.f32 %v1106_v18, %v335_v39  ;;  %v917_v48 = vunpack.c.l.bf16 %v1125_v36  ;;  %v372_v50 = vadd.f32 %v1106_v18, %v336_v42  ;;  %v338_v52 = vmul.f32 %v853_v44, %v1104_v17  ;;  %v986_v42 = vld [vmem:[%s1095_s23 + $0x28] sm:$0xff]  }
  0x1a   : > { %v464_v45 = vadd.f32 %v905_v13, %v368_v37  ;;  %v465_v46 = vadd.f32 %v906_v15, %v369_v38  ;;  %v466_v49 = vadd.f32 %v909_v26, %v370_v41  ;;  %v373_v51 = vadd.f32 %v1106_v18, %v337_v43  ;;  %v970_v13 = vld [vmem:[%s1090_s20 + $0x20] sm:$0xff]  }
  0x1b   : > { %v467_v59 = vadd.f32 %v910_v30, %v371_v47  ;;  %v468_v60 = vadd.f32 %v913_v34, %v372_v50  ;;  %v374_v16 = vadd.f32 %v1106_v18, %v338_v52  ;;  %v854_v21 = vunpack.c.h.bf16 %v1121_v31  ;;  %v971_v34 = vld [vmem:[%s1090_s20 + $0x28] sm:$0xff]  }
  0x1c   : > { %v500_v53 = vmul.f32 %v1108_v19, %v464_v45  ;;  %v572_v54 = vmul.f32 %v1114_v23, %v464_v45  ;;  %v501_v55 = vmul.f32 %v1108_v19, %v465_v46  ;;  %v573_v56 = vmul.f32 %v1114_v23, %v465_v46 }
  0x1d   : > { %v502_v57 = vmul.f32 %v1108_v19, %v466_v49  ;;  %v574_v58 = vmul.f32 %v1114_v23, %v466_v49  ;;  %v503_v3 = vmul.f32 %v1108_v19, %v467_v59  ;;  %v575_v4 = vmul.f32 %v1114_v23, %v467_v59 }
  0x1e   : > { %v536_v61 = vadd.f32 %v1110_v20, %v500_v53  ;;  %v608_v62 = vadd.f32 %v1116_v24, %v572_v54  ;;  %v537_v63 = vadd.f32 %v1110_v20, %v501_v55  ;;  %v609_v0 = vadd.f32 %v1116_v24, %v573_v56 }
  0x1f   : > { %v538_v1 = vadd.f32 %v1110_v20, %v502_v57  ;;  %v610_v2 = vadd.f32 %v1116_v24, %v574_v58  ;;  %v504_v7 = vmul.f32 %v1108_v19, %v468_v60  ;;  %v576_v8 = vmul.f32 %v1114_v23, %v468_v60 }
  0x20   : > { %v640_v5 = vmax.f32 %v536_v61, %v608_v62  ;;  %v641_v6 = vmax.f32 %v537_v63, %v609_v0  ;;  %v539_v10 = vadd.f32 %v1110_v20, %v503_v3  ;;  %v611_v11 = vadd.f32 %v1116_v24, %v575_v4  ;;  %v972_v63 = vld [vmem:[%s1090_s20 + $0x30] sm:$0xff]  }
  0x21   : > { %v642_v9 = vmax.f32 %v538_v1, %v610_v2  ;;  %v469_v12 = vadd.f32 %v914_v40, %v373_v51  ;;  %v540_v14 = vadd.f32 %v1110_v20, %v504_v7  ;;  %v612_v15 = vadd.f32 %v1116_v24, %v576_v8  ;;  %v987_v8 = vld [vmem:[%s1095_s23 + $0x30] sm:$0xff]  }
  0x22   : > { %673 = vst.msk [vmem:[%s1153_s30] sm:$0xff] %vm672_vm0, %v640_v5  ;;  %674 = vst.msk [vmem:[%s1153_s30 + $0x8] sm:$0xff] %vm672_vm0, %v641_v6  ;;  %v643_v25 = vmax.f32 %v539_v10, %v611_v11  ;;  %v918_v28 = vunpack.c.h.bf16 %v1125_v36  ;;  %v470_v30 = vadd.f32 %v917_v48, %v374_v16  ;;  %v339_v32 = vmul.f32 %v854_v21, %v1104_v17 }
  0x23   : > { %675 = vst.msk [vmem:[%s1153_s30 + $0x10] sm:$0xff] %vm672_vm0, %v642_v9  ;;  %v505_v26 = vmul.f32 %v1108_v19, %v469_v12  ;;  %v577_v27 = vmul.f32 %v1114_v23, %v469_v12  ;;  %v644_v29 = vmax.f32 %v540_v14, %v612_v15  ;;  %v857_v33 = vunpack.c.l.bf16 %v970_v13 }
  0x24   : > { %676 = vst.msk [vmem:[%s1153_s30 + $0x18] sm:$0xff] %vm672_vm0, %v643_v25  ;;  %v921_v37 = vunpack.c.l.bf16 %v985_v22  ;;  %v858_v38 = vunpack.c.h.bf16 %v970_v13  ;;  %v506_v36 = vmul.f32 %v1108_v19, %v470_v30  ;;  %v578_v39 = vmul.f32 %v1114_v23, %v470_v30 }
  0x25   : > { %v541_v31 = vadd.f32 %v1110_v20, %v505_v26  ;;  %v613_v35 = vadd.f32 %v1116_v24, %v577_v27  ;;  %677 = vst.msk [vmem:[%s1153_s30 + $0x20] sm:$0xff] %vm672_vm0, %v644_v29  ;;  %v375_v40 = vadd.f32 %v1106_v18, %v339_v32  ;;  %v340_v41 = vmul.f32 %v857_v33, %v1104_v17  ;;  %v973_v27 = vld [vmem:[%s1090_s20 + $0x38] sm:$0xff]  }
  0x26   : > { %v341_v44 = vmul.f32 %v858_v38, %v1104_v17  ;;  %v922_v45 = vunpack.c.h.bf16 %v985_v22  ;;  %v861_v46 = vunpack.c.l.bf16 %v971_v34  ;;  %v542_v47 = vadd.f32 %v1110_v20, %v506_v36  ;;  %v974_v38 = vld [vmem:[%s1090_s20 + $0x40] sm:$0xff]  }
  0x27   : > { %v645_v43 = vmax.f32 %v541_v31, %v613_v35  ;;  %v614_v48 = vadd.f32 %v1116_v24, %v578_v39  ;;  %v471_v49 = vadd.f32 %v918_v28, %v375_v40  ;;  %v376_v50 = vadd.f32 %v1106_v18, %v340_v41  ;;  %v988_v28 = vld [vmem:[%s1095_s23 + $0x38] sm:$0xff]  }
  0x28   : > { %v377_v51 = vadd.f32 %v1106_v18, %v341_v44  ;;  %v342_v52 = vmul.f32 %v861_v46, %v1104_v17  ;;  %v925_v53 = vunpack.c.l.bf16 %v986_v42  ;;  %v862_v54 = vunpack.c.h.bf16 %v971_v34  ;;  %v989_v46 = vld [vmem:[%s1095_s23 + $0x40] sm:$0xff]  }
  0x29   : > { %678 = vst.msk [vmem:[%s1153_s30 + $0x28] sm:$0xff] %vm672_vm0, %v645_v43  ;;  %v646_v55 = vmax.f32 %v542_v47, %v614_v48  ;;  %v507_v56 = vmul.f32 %v1108_v19, %v471_v49  ;;  %v579_v57 = vmul.f32 %v1114_v23, %v471_v49  ;;  %v472_v58 = vadd.f32 %v921_v37, %v376_v50 }
  0x2a   : > { %v473_v59 = vadd.f32 %v922_v45, %v377_v51  ;;  %v378_v60 = vadd.f32 %v1106_v18, %v342_v52  ;;  %v343_v61 = vmul.f32 %v862_v54, %v1104_v17  ;;  %v926_v62 = vunpack.c.h.bf16 %v986_v42 }
  0x2b   : > { %679 = vst.msk [vmem:[%s1153_s30 + $0x30] sm:$0xff] %vm672_vm0, %v646_v55  ;;  %v543_v0 = vadd.f32 %v1110_v20, %v507_v56  ;;  %v615_v1 = vadd.f32 %v1116_v24, %v579_v57  ;;  %v508_v2 = vmul.f32 %v1108_v19, %v472_v58  ;;  %v580_v3 = vmul.f32 %v1114_v23, %v472_v58 }
  0x2c   : > { %v509_v4 = vmul.f32 %v1108_v19, %v473_v59  ;;  %v581_v5 = vmul.f32 %v1114_v23, %v473_v59  ;;  %v474_v6 = vadd.f32 %v925_v53, %v378_v60  ;;  %v379_v7 = vadd.f32 %v1106_v18, %v343_v61 }
  0x2d   : > { %v647_v9 = vmax.f32 %v543_v0, %v615_v1  ;;  %v544_v10 = vadd.f32 %v1110_v20, %v508_v2  ;;  %v616_v11 = vadd.f32 %v1116_v24, %v580_v3  ;;  %v865_v12 = vunpack.c.l.bf16 %v972_v63 }
  0x2e   : > { %v545_v13 = vadd.f32 %v1110_v20, %v509_v4  ;;  %v617_v14 = vadd.f32 %v1116_v24, %v581_v5  ;;  %v510_v15 = vmul.f32 %v1108_v19, %v474_v6  ;;  %v582_v16 = vmul.f32 %v1114_v23, %v474_v6 }
  0x2f   : > { %680 = vst.msk [vmem:[%s1153_s30 + $0x38] sm:$0xff] %vm672_vm0, %v647_v9  ;;  %v648_v21 = vmax.f32 %v544_v10, %v616_v11  ;;  %v475_v22 = vadd.f32 %v926_v62, %v379_v7  ;;  %v344_v25 = vmul.f32 %v865_v12, %v1104_v17  ;;  %v929_v26 = vunpack.c.l.bf16 %v987_v8  ;;  %v975_v7 = vld [vmem:[%s1090_s20 + $0x48] sm:$0xff]  }
  0x30   : > { %v649_v29 = vmax.f32 %v545_v13, %v617_v14  ;;  %v546_v30 = vadd.f32 %v1110_v20, %v510_v15  ;;  %v618_v32 = vadd.f32 %v1116_v24, %v582_v16  ;;  %v866_v33 = vunpack.c.h.bf16 %v972_v63  ;;  %v990_v16 = vld [vmem:[%s1095_s23 + $0x48] sm:$0xff]  }
  0x31   : > { %681 = vst.msk [vmem:[%s1153_s30 + $0x40] sm:$0xff] %vm672_vm0, %v648_v21  ;;  %v511_v34 = vmul.f32 %v1108_v19, %v475_v22  ;;  %v583_v31 = vmul.f32 %v1114_v23, %v475_v22  ;;  %v380_v35 = vadd.f32 %v1106_v18, %v344_v25  ;;  %v930_v37 = vunpack.c.h.bf16 %v987_v8 }
  0x32   : > { %682 = vst.msk [vmem:[%s1153_s30 + $0x48] sm:$0xff] %vm672_vm0, %v649_v29  ;;  %v650_v36 = vmax.f32 %v546_v30, %v618_v32  ;;  %v345_v39 = vmul.f32 %v866_v33, %v1104_v17  ;;  %v869_v40 = vunpack.c.l.bf16 %v973_v27  ;;  %v933_v41 = vunpack.c.l.bf16 %v988_v28 }
  0x33   : > { %v547_v42 = vadd.f32 %v1110_v20, %v511_v34  ;;  %v619_v43 = vadd.f32 %v1116_v24, %v583_v31  ;;  %v476_v44 = vadd.f32 %v929_v26, %v380_v35  ;;  %v870_v45 = vunpack.c.h.bf16 %v973_v27  ;;  %v976_v35 = vld [vmem:[%s1090_s20 + $0x50] sm:$0xff]  }
  0x34   : > { %683 = vst.msk [vmem:[%s1153_s30 + $0x50] sm:$0xff] %vm672_vm0, %v650_v36  ;;  %v381_v47 = vadd.f32 %v1106_v18, %v345_v39  ;;  %v346_v48 = vmul.f32 %v869_v40, %v1104_v17  ;;  %v934_v49 = vunpack.c.h.bf16 %v988_v28  ;;  %v873_v50 = vunpack.c.l.bf16 %v974_v38 }
  0x35   : > { %v651_v51 = vmax.f32 %v547_v42, %v619_v43  ;;  %v512_v52 = vmul.f32 %v1108_v19, %v476_v44  ;;  %v584_v53 = vmul.f32 %v1114_v23, %v476_v44  ;;  %v347_v54 = vmul.f32 %v870_v45, %v1104_v17  ;;  %v977_v45 = vld [vmem:[%s1090_s20 + $0x58] sm:$0xff]  }
  0x36   : > { %v477_v55 = vadd.f32 %v930_v37, %v381_v47  ;;  %v382_v56 = vadd.f32 %v1106_v18, %v346_v48  ;;  %v348_v57 = vmul.f32 %v873_v50, %v1104_v17  ;;  %v937_v58 = vunpack.c.l.bf16 %v989_v46  ;;  %v991_v37 = vld [vmem:[%s1095_s23 + $0x50] sm:$0xff]  }
  0x37   : > { %684 = vst.msk [vmem:[%s1153_s30 + $0x58] sm:$0xff] %vm672_vm0, %v651_v51  ;;  %v548_v59 = vadd.f32 %v1110_v20, %v512_v52  ;;  %v620_v60 = vadd.f32 %v1116_v24, %v584_v53  ;;  %v383_v61 = vadd.f32 %v1106_v18, %v347_v54  ;;  %v874_v62 = vunpack.c.h.bf16 %v974_v38  ;;  %v992_v54 = vld [vmem:[%s1095_s23 + $0x58] sm:$0xff]  }
  0x38   : > { %v513_v63 = vmul.f32 %v1108_v19, %v477_v55  ;;  %v585_v0 = vmul.f32 %v1114_v23, %v477_v55  ;;  %v478_v1 = vadd.f32 %v933_v41, %v382_v56  ;;  %v384_v2 = vadd.f32 %v1106_v18, %v348_v57 }
  0x39   : > { %v652_v3 = vmax.f32 %v548_v59, %v620_v60  ;;  %v479_v4 = vadd.f32 %v934_v49, %v383_v61  ;;  %v349_v5 = vmul.f32 %v874_v62, %v1104_v17  ;;  %v938_v6 = vunpack.c.h.bf16 %v989_v46 }
  0x3a   : > { %v549_v8 = vadd.f32 %v1110_v20, %v513_v63  ;;  %v621_v9 = vadd.f32 %v1116_v24, %v585_v0  ;;  %v514_v10 = vmul.f32 %v1108_v19, %v478_v1  ;;  %v586_v11 = vmul.f32 %v1114_v23, %v478_v1 }
  0x3b   : > { %685 = vst.msk [vmem:[%s1153_s30 + $0x60] sm:$0xff] %vm672_vm0, %v652_v3  ;;  %v515_v12 = vmul.f32 %v1108_v19, %v479_v4  ;;  %v587_v13 = vmul.f32 %v1114_v23, %v479_v4  ;;  %v480_v14 = vadd.f32 %v937_v58, %v384_v2  ;;  %v385_v15 = vadd.f32 %v1106_v18, %v349_v5 }
  0x3c   : > { %v653_v21 = vmax.f32 %v549_v8, %v621_v9  ;;  %v550_v22 = vadd.f32 %v1110_v20, %v514_v10  ;;  %v622_v25 = vadd.f32 %v1116_v24, %v586_v11  ;;  %v877_v26 = vunpack.c.l.bf16 %v975_v7 }
  0x3d   : > { %v551_v27 = vadd.f32 %v1110_v20, %v515_v12  ;;  %v623_v28 = vadd.f32 %v1116_v24, %v587_v13  ;;  %v516_v29 = vmul.f32 %v1108_v19, %v480_v14  ;;  %v588_v30 = vmul.f32 %v1114_v23, %v480_v14 }
  0x3e   : > { %686 = vst.msk [vmem:[%s1153_s30 + $0x68] sm:$0xff] %vm672_vm0, %v653_v21  ;;  %v654_v32 = vmax.f32 %v550_v22, %v622_v25  ;;  %v481_v33 = vadd.f32 %v938_v6, %v385_v15  ;;  %v350_v34 = vmul.f32 %v877_v26, %v1104_v17  ;;  %v941_v31 = vunpack.c.l.bf16 %v990_v16  ;;  %v978_v15 = vld [vmem:[%s1090_s20 + $0x60] sm:$0xff]  }
  0x3f   : > { %v655_v38 = vmax.f32 %v551_v27, %v623_v28  ;;  %v552_v36 = vadd.f32 %v1110_v20, %v516_v29  ;;  %v624_v39 = vadd.f32 %v1116_v24, %v588_v30  ;;  %v878_v40 = vunpack.c.h.bf16 %v975_v7  ;;  %v993_v30 = vld [vmem:[%s1095_s23 + $0x60] sm:$0xff]  }
  0x40   : > { %687 = vst.msk [vmem:[%s1153_s30 + $0x70] sm:$0xff] %vm672_vm0, %v654_v32  ;;  %v517_v41 = vmul.f32 %v1108_v19, %v481_v33  ;;  %v589_v42 = vmul.f32 %v1114_v23, %v481_v33  ;;  %v386_v43 = vadd.f32 %v1106_v18, %v350_v34  ;;  %v942_v44 = vunpack.c.h.bf16 %v990_v16 }
  0x41   : > { %688 = vst.msk [vmem:[%s1153_s30 + $0x78] sm:$0xff] %vm672_vm0, %v655_v38  ;;  %v656_v46 = vmax.f32 %v552_v36, %v624_v39  ;;  %v351_v47 = vmul.f32 %v878_v40, %v1104_v17  ;;  %v881_v48 = vunpack.c.l.bf16 %v976_v35  ;;  %v945_v49 = vunpack.c.l.bf16 %v991_v37 }
  0x42   : > { %v553_v50 = vadd.f32 %v1110_v20, %v517_v41  ;;  %v625_v51 = vadd.f32 %v1116_v24, %v589_v42  ;;  %v482_v52 = vadd.f32 %v941_v31, %v386_v43  ;;  %v882_v53 = vunpack.c.h.bf16 %v976_v35  ;;  %v979_v43 = vld [vmem:[%s1090_s20 + $0x68] sm:$0xff]  }
  0x43   : > { %689 = vst.msk [vmem:[%s1153_s30 + $0x80] sm:$0xff] %vm672_vm0, %v656_v46  ;;  %v387_v55 = vadd.f32 %v1106_v18, %v351_v47  ;;  %v352_v56 = vmul.f32 %v881_v48, %v1104_v17  ;;  %v946_v57 = vunpack.c.h.bf16 %v991_v37  ;;  %v885_v58 = vunpack.c.l.bf16 %v977_v45 }
  0x44   : > { %v657_v59 = vmax.f32 %v553_v50, %v625_v51  ;;  %v518_v60 = vmul.f32 %v1108_v19, %v482_v52  ;;  %v590_v61 = vmul.f32 %v1114_v23, %v482_v52  ;;  %v353_v62 = vmul.f32 %v882_v53, %v1104_v17  ;;  %v980_v53 = vld [vmem:[%s1090_s20 + $0x70] sm:$0xff]  }
  0x45   : > { %v483_v63 = vadd.f32 %v942_v44, %v387_v55  ;;  %v388_v0 = vadd.f32 %v1106_v18, %v352_v56  ;;  %v354_v1 = vmul.f32 %v885_v58, %v1104_v17  ;;  %v949_v2 = vunpack.c.l.bf16 %v992_v54  ;;  %v994_v44 = vld [vmem:[%s1095_s23 + $0x68] sm:$0xff]  }
  0x46   : > { %690 = vst.msk [vmem:[%s1153_s30 + $0x88] sm:$0xff] %vm672_vm0, %v657_v59  ;;  %v554_v3 = vadd.f32 %v1110_v20, %v518_v60  ;;  %v626_v4 = vadd.f32 %v1116_v24, %v590_v61  ;;  %v389_v5 = vadd.f32 %v1106_v18, %v353_v62  ;;  %v886_v6 = vunpack.c.h.bf16 %v977_v45  ;;  %v995_v62 = vld [vmem:[%s1095_s23 + $0x70] sm:$0xff]  }
  0x47   : > { %v519_v7 = vmul.f32 %v1108_v19, %v483_v63  ;;  %v591_v8 = vmul.f32 %v1114_v23, %v483_v63  ;;  %v484_v9 = vadd.f32 %v945_v49, %v388_v0  ;;  %v390_v10 = vadd.f32 %v1106_v18, %v354_v1 }
  0x48   : > { %v658_v11 = vmax.f32 %v554_v3, %v626_v4  ;;  %v485_v12 = vadd.f32 %v946_v57, %v389_v5  ;;  %v355_v13 = vmul.f32 %v886_v6, %v1104_v17  ;;  %v950_v14 = vunpack.c.h.bf16 %v992_v54 }
  0x49   : > { %v555_v16 = vadd.f32 %v1110_v20, %v519_v7  ;;  %v627_v21 = vadd.f32 %v1116_v24, %v591_v8  ;;  %v520_v22 = vmul.f32 %v1108_v19, %v484_v9  ;;  %v592_v25 = vmul.f32 %v1114_v23, %v484_v9 }
  0x4a   : > { %691 = vst.msk [vmem:[%s1153_s30 + $0x90] sm:$0xff] %vm672_vm0, %v658_v11  ;;  %v521_v26 = vmul.f32 %v1108_v19, %v485_v12  ;;  %v593_v27 = vmul.f32 %v1114_v23, %v485_v12  ;;  %v486_v28 = vadd.f32 %v949_v2, %v390_v10  ;;  %v391_v29 = vadd.f32 %v1106_v18, %v355_v13 }
  0x4b   : > { %v659_v32 = vmax.f32 %v555_v16, %v627_v21  ;;  %v556_v33 = vadd.f32 %v1110_v20, %v520_v22  ;;  %v628_v34 = vadd.f32 %v1116_v24, %v592_v25  ;;  %v889_v31 = vunpack.c.l.bf16 %v978_v15 }
  0x4c   : > { %v557_v35 = vadd.f32 %v1110_v20, %v521_v26  ;;  %v629_v37 = vadd.f32 %v1116_v24, %v593_v27  ;;  %v522_v38 = vmul.f32 %v1108_v19, %v486_v28  ;;  %v594_v36 = vmul.f32 %v1114_v23, %v486_v28 }
  0x4d   : > { %692 = vst.msk [vmem:[%s1153_s30 + $0x98] sm:$0xff] %vm672_vm0, %v659_v32  ;;  %v660_v39 = vmax.f32 %v556_v33, %v628_v34  ;;  %v487_v40 = vadd.f32 %v950_v14, %v391_v29  ;;  %v356_v41 = vmul.f32 %v889_v31, %v1104_v17  ;;  %v953_v42 = vunpack.c.l.bf16 %v993_v30  ;;  %v981_v29 = vld [vmem:[%s1090_s20 + $0x78] sm:$0xff]  }
  0x4e   : > { %v661_v45 = vmax.f32 %v557_v35, %v629_v37  ;;  %v558_v46 = vadd.f32 %v1110_v20, %v522_v38  ;;  %v630_v47 = vadd.f32 %v1116_v24, %v594_v36  ;;  %v890_v48 = vunpack.c.h.bf16 %v978_v15  ;;  %v996_v36 = vld [vmem:[%s1095_s23 + $0x78] sm:$0xff]  }
  0x4f   : > { %693 = vst.msk [vmem:[%s1153_s30 + $0xa0] sm:$0xff] %vm672_vm0, %v660_v39  ;;  %v523_v49 = vmul.f32 %v1108_v19, %v487_v40  ;;  %v595_v50 = vmul.f32 %v1114_v23, %v487_v40  ;;  %v392_v51 = vadd.f32 %v1106_v18, %v356_v41  ;;  %v954_v52 = vunpack.c.h.bf16 %v993_v30 }
  0x50   : > { %694 = vst.msk [vmem:[%s1153_s30 + $0xa8] sm:$0xff] %vm672_vm0, %v661_v45  ;;  %v662_v54 = vmax.f32 %v558_v46, %v630_v47  ;;  %v357_v55 = vmul.f32 %v890_v48, %v1104_v17  ;;  %v893_v56 = vunpack.c.l.bf16 %v979_v43  ;;  %v957_v57 = vunpack.c.l.bf16 %v994_v44 }
  0x51   : > { %v559_v58 = vadd.f32 %v1110_v20, %v523_v49  ;;  %v631_v59 = vadd.f32 %v1116_v24, %v595_v50  ;;  %v488_v60 = vadd.f32 %v953_v42, %v392_v51  ;;  %v894_v61 = vunpack.c.h.bf16 %v979_v43 }
  0x52   : > { %695 = vst.msk [vmem:[%s1153_s30 + $0xb0] sm:$0xff] %vm672_vm0, %v662_v54  ;;  %v393_v63 = vadd.f32 %v1106_v18, %v357_v55  ;;  %v358_v0 = vmul.f32 %v893_v56, %v1104_v17  ;;  %v958_v1 = vunpack.c.h.bf16 %v994_v44  ;;  %v897_v2 = vunpack.c.l.bf16 %v980_v53 }
  0x53   : > { %v663_v3 = vmax.f32 %v559_v58, %v631_v59  ;;  %v524_v4 = vmul.f32 %v1108_v19, %v488_v60  ;;  %v596_v5 = vmul.f32 %v1114_v23, %v488_v60  ;;  %v359_v6 = vmul.f32 %v894_v61, %v1104_v17 }
  0x54   : > { %v489_v7 = vadd.f32 %v954_v52, %v393_v63  ;;  %v394_v8 = vadd.f32 %v1106_v18, %v358_v0  ;;  %v360_v9 = vmul.f32 %v897_v2, %v1104_v17  ;;  %v961_v10 = vunpack.c.l.bf16 %v995_v62 }
  0x55   : > { %696 = vst.msk [vmem:[%s1153_s30 + $0xb8] sm:$0xff] %vm672_vm0, %v663_v3  ;;  %v560_v11 = vadd.f32 %v1110_v20, %v524_v4  ;;  %v632_v12 = vadd.f32 %v1116_v24, %v596_v5  ;;  %v395_v13 = vadd.f32 %v1106_v18, %v359_v6  ;;  %v898_v14 = vunpack.c.h.bf16 %v980_v53 }
  0x56   : > { %v525_v15 = vmul.f32 %v1108_v19, %v489_v7  ;;  %v597_v16 = vmul.f32 %v1114_v23, %v489_v7  ;;  %v490_v21 = vadd.f32 %v957_v57, %v394_v8  ;;  %v396_v22 = vadd.f32 %v1106_v18, %v360_v9 }
  0x57   : > { %v664_v25 = vmax.f32 %v560_v11, %v632_v12  ;;  %v491_v26 = vadd.f32 %v958_v1, %v395_v13  ;;  %v361_v27 = vmul.f32 %v898_v14, %v1104_v17  ;;  %v962_v28 = vunpack.c.h.bf16 %v995_v62 }
  0x58   : > { %v561_v30 = vadd.f32 %v1110_v20, %v525_v15  ;;  %v633_v32 = vadd.f32 %v1116_v24, %v597_v16  ;;  %v526_v33 = vmul.f32 %v1108_v19, %v490_v21  ;;  %v598_v34 = vmul.f32 %v1114_v23, %v490_v21 }
  0x59   : > { %697 = vst.msk [vmem:[%s1153_s30 + $0xc0] sm:$0xff] %vm672_vm0, %v664_v25  ;;  %v527_v31 = vmul.f32 %v1108_v19, %v491_v26  ;;  %v599_v35 = vmul.f32 %v1114_v23, %v491_v26  ;;  %v492_v37 = vadd.f32 %v961_v10, %v396_v22  ;;  %v397_v38 = vadd.f32 %v1106_v18, %v361_v27 }
  0x5a   : > { %v665_v39 = vmax.f32 %v561_v30, %v633_v32  ;;  %v562_v40 = vadd.f32 %v1110_v20, %v526_v33  ;;  %v634_v41 = vadd.f32 %v1116_v24, %v598_v34  ;;  %v901_v42 = vunpack.c.l.bf16 %v981_v29 }
  0x5b   : > { %v563_v43 = vadd.f32 %v1110_v20, %v527_v31  ;;  %v635_v44 = vadd.f32 %v1116_v24, %v599_v35  ;;  %v528_v45 = vmul.f32 %v1108_v19, %v492_v37  ;;  %v600_v46 = vmul.f32 %v1114_v23, %v492_v37 }
  0x5c   : > { %698 = vst.msk [vmem:[%s1153_s30 + $0xc8] sm:$0xff] %vm672_vm0, %v665_v39  ;;  %v666_v47 = vmax.f32 %v562_v40, %v634_v41  ;;  %v493_v48 = vadd.f32 %v962_v28, %v397_v38  ;;  %v362_v49 = vmul.f32 %v901_v42, %v1104_v17  ;;  %v965_v50 = vunpack.c.l.bf16 %v996_v36 }
  0x5d   : > { %v667_v51 = vmax.f32 %v563_v43, %v635_v44  ;;  %v564_v52 = vadd.f32 %v1110_v20, %v528_v45  ;;  %v636_v53 = vadd.f32 %v1116_v24, %v600_v46  ;;  %v902_v54 = vunpack.c.h.bf16 %v981_v29 }
  0x5e   : > { %699 = vst.msk [vmem:[%s1153_s30 + $0xd0] sm:$0xff] %vm672_vm0, %v666_v47  ;;  %v529_v55 = vmul.f32 %v1108_v19, %v493_v48  ;;  %v601_v56 = vmul.f32 %v1114_v23, %v493_v48  ;;  %v398_v57 = vadd.f32 %v1106_v18, %v362_v49  ;;  %v966_v60 = vunpack.c.h.bf16 %v996_v36 }
  0x5f   : > { %700 = vst.msk [vmem:[%s1153_s30 + $0xd8] sm:$0xff] %vm672_vm0, %v667_v51  ;;  %v668_v58 = vmax.f32 %v564_v52, %v636_v53  ;;  %v363_v59 = vmul.f32 %v902_v54, %v1104_v17 }
  0x60   : > { %v565_v61 = vadd.f32 %v1110_v20, %v529_v55  ;;  %v637_v62 = vadd.f32 %v1116_v24, %v601_v56  ;;  %v494_v63 = vadd.f32 %v965_v50, %v398_v57 }
  0x61   : > { %701 = vst.msk [vmem:[%s1153_s30 + $0xe0] sm:$0xff] %vm672_vm0, %v668_v58  ;;  %v399_v0 = vadd.f32 %v1106_v18, %v363_v59 }
  0x62   : > { %v669_v1 = vmax.f32 %v565_v61, %v637_v62  ;;  %v530_v2 = vmul.f32 %v1108_v19, %v494_v63  ;;  %v602_v3 = vmul.f32 %v1114_v23, %v494_v63 }
  0x63   : > { %v495_v4 = vadd.f32 %v966_v60, %v399_v0 }
  0x64   : > { %702 = vst.msk [vmem:[%s1153_s30 + $0xe8] sm:$0xff] %vm672_vm0, %v669_v1  ;;  %v566_v17 = vadd.f32 %v1110_v20, %v530_v2  ;;  %v638_v5 = vadd.f32 %v1116_v24, %v602_v3 }
  0x65   : > { %v531_v6 = vmul.f32 %v1108_v19, %v495_v4  ;;  %v603_v7 = vmul.f32 %v1114_v23, %v495_v4 }
  0x66   : > { %v670_v8 = vmax.f32 %v566_v17, %v638_v5 }
  0x67   : > { %v567_v9 = vadd.f32 %v1110_v20, %v531_v6  ;;  %v639_v18 = vadd.f32 %v1116_v24, %v603_v7 }
  0x68   : > { %703 = vst.msk [vmem:[%s1153_s30 + $0xf0] sm:$0xff] %vm672_vm0, %v670_v8 }
  0x69   : > { %v671_v10 = vmax.f32 %v567_v9, %v639_v18 }
  0x6b   : > { %704 = vst.msk [vmem:[%s1153_s30 + $0xf8] sm:$0xff] %vm672_vm0, %v671_v10 }
  0x6c PF: > { %s13_s14 = sadd.s32 1, %s1043_s14   ;;  %s1427_s12 = smov %s1039_s13 }
  0x6d   : > { %p10_p5 = scmp.ge.s32.totalorder %s13_s14, 4   ;;  %s1428_s13 = smov %s1430_s15 }
  0x6f   :  { %12 = sbr.rel (!%p10_p5) target bundleno = 2 (0x2), region = 68 }

// kernel: bottleneck_forward.5
= control target key start
LH: loop header
LB: loop body
LE: loop exit
PB: predicated region body
PF: predicated region fallthrough
CT: control target
= control target key end

     0   :  { %s3423_s18 = smov 0   ;;  %s3425_s19 = smov 0   ;;  %s4100_s0 = inlined_call_operand.vmem [shape: bf16[2,256,4], index: 0, kind: input, shape index: {}]   ;;  %s4101_s1 = inlined_call_operand.vmem [shape: f32[2,4,4], index: 1, kind: input, shape index: {}]   ;;  %s4102_s2 = inlined_call_operand.vmem [shape: bf16[9,4,4], index: 2, kind: input, shape index: {}]   ;;  %s4103_s3 = inlined_call_operand.vmem [shape: bf16[2,256,4], index: 3, kind: output, shape index: {0}]   ;;  %s4104_s4 = inlined_call_operand.vmem [shape: f32[2,1,4], index: 4, kind: output, shape index: {1}]   ;;  %s4105_s5 = inlined_call_operand.vmem [shape: f32[2,1,4], index: 5, kind: output, shape index: {2}]  }
   0x1   :  { %s3427_s20 = smov 0   ;;  %s3429_s21 = smov 0  }
   0x2   :  { %s3431_s22 = smov 0  }
   0x3 LB: > { %s25_s23 = sadd.s32 1, %s3379_s20  ;;  %s28_s24 = sadd.s32 1, %s3383_s21  ;;  %s3387_s22 = sphi %s3431_s22, %s16_s22   ;;  %s3383_s21 = sphi %s3429_s21, %s4131_s21   ;;  %s3379_s20 = sphi %s3427_s20, %s4130_s20   ;;  %s3375_s19 = sphi %s3425_s19, %s4129_s19   ;;  %s3371_s18 = sphi %s3423_s18, %s4128_s18  }
   0x4   : > { %p26_p0 = scmp.ge.s32.totalorder %s25_s23, 2  ;;  %p2743_p1 = scmp.ge.s32.totalorder %s3387_s22, 1 }
   0x5   : > { %p215_p2 = scmp.lt.s32.totalorder %s3387_s22, 5 }
   0x6   : > { %s4133_s23 = smov (%p26_p0, %s25_s23), 0  ;;  %s4135_s24 = smov (!%p26_p0, %s28_s24), %s3383_s21 }
   0x7   : > { %p216_p3 = pnand %p2743_p1, %p215_p2  ;;  %p30_p4 = scmp.ge.s32.totalorder %s4135_s24, 2 }
   0x8   : > { %p257_p5 = scmp.lt.s32.totalorder (!%p216_p3), %s3375_s19, 1  ;;  %s2747_s25 = sshll.u32 (!%p216_p3), %s3371_s18, 4 }
   0x9   : > { %s4137_s24 = smov (%p30_p4, %s4135_s24), 0  ;;  %219 = sbr.rel (%p216_p3) target bundleno = 484 (0x1e4), region = 32 }
   0xa   : > { %4106 = sst [smem:[#allocation4_spill]] %s4137_s24  ;;  %p269_p6 = scmp.lt.s32.totalorder (!%p216_p3), %s2747_s25, 31 }
   0xb   : > { %s3457_s26 = sshll.u32 (!%p216_p3), %s3371_s18, 7  ;;  %p2751_p7 = scmp.ne.s32.totalorder (!%p216_p3), %s3371_s18, 0 }
  0x10   : > { %s4139_s19 = smov (!%p257_p5, %s3375_s19), 1  ;;  %s4141_s25 = smov (!%p269_p6, %s2747_s25), 31 }
  0x11   : > { %s2858_s27 = sshll.u32 %s4139_s19, 7  ;;  %s2746_s28 = sshll.u32 %s4139_s19, 2  ;;  %vm288_vm0 = vcmask (!%p2751_p7), 24576   ;;  %v3389_v0 = vmov (!%p2751_p7), 0.0  }
  0x12   : > { %s3462_s6 = scalar_lea.vmem %s4100_s0, %s2858_s27  ;;  %s265_s9 = scalar_lea.vmem %s4101_s1, %s2746_s28 }
  0x13   : > { %s2748_s10 = sshll.u32 %s4139_s19, 5  ;;  %s3470_s13 = scalar_lea.vmem %s4104_s4, %s4139_s19 }
  0x14   : > { %s272_s14 = sadd.s32 %s2748_s10, %s4141_s25  ;;  %s3475_s17 = scalar_lea.vmem %s4105_s5, %s4139_s19  ;;  %289 = vst.msk [vmem:[%s3470_s13] sm:$0x1] (!%p2751_p7), %vm288_vm0, %v3389_v0 }
  0x15   : > { %s2749_s24 = sshll.u32 %s272_s14, 2  ;;  %287 = sbr.rel (%p2751_p7) target bundleno = 28 (0x1c), region = 36  ;;  %290 = vst.msk [vmem:[%s3475_s17] sm:$0x1] (!%p2751_p7), %vm288_vm0, %v3389_v0 }
  0x16   : > { %s3480_s30 = scalar_lea.vmem %s4103_s3, %s2749_s24 }
  0x1c PF: > { %s292_s19 = sshra.s32 %s3457_s26, 3  ;;  %v328_v1 = vlaneseq  ;;  %v291_v2 = vld [vmem:[%s265_s9] sm:$0xf]  ;;  %vm424_vm1 = vcmask 31744  }
  0x1d   : > { %s2752_s25 = sshll.u32 %s292_s19, 2 }
  0x1e   : > { %s3489_s24 = scalar_lea.vmem %s3462_s6, %s2752_s25  ;;  %v3491_v3 = vshrl.u32 %v328_v1, 7 }
  0x1f   : > { %v2876_v4 = vld [vmem:[%s3489_s24] sm:$0xff]   ;;  %v2915_v5 = vld [vmem:[%s3489_s24 + $0x8] sm:$0xff]   ;;  %v2916_v6 = vld [vmem:[%s3489_s24 + $0x10] sm:$0xff]  }
  0x20   : > { %v2877_v7 = vunpack.c.l.bf16 %v2876_v4  ;;  %v330_v8 = vsub.s32 0, %v3491_v3  ;;  %v350_v9 = vsub.s32 2, %v3491_v3  ;;  %v370_v10 = vsub.s32 1, %v3491_v3  ;;  %v2917_v11 = vld [vmem:[%s3489_s24 + $0x18] sm:$0xff]   ;;  %v2918_v48 = vld [vmem:[%s3489_s24 + $0x20] sm:$0xff]   ;;  %v2919_v57 = vld [vmem:[%s3489_s24 + $0x28] sm:$0xff]  }
  0x21   : > { %v390_v12 = vsub.s32 3, %v3491_v3  ;;  %v2878_v13 = vunpack.c.h.bf16 %v2876_v4  ;;  %v2881_v14 = vunpack.c.l.bf16 %v2915_v5  ;;  %v2882_v15 = vunpack.c.h.bf16 %v2915_v5 }
  0x22   : > { %v3501_v16 = vrot.slane %v291_v2, %v330_v8  ;;  %v3503_v17 = vrot.slane %v291_v2, %v350_v9  ;;  %v3505_v18 = vrot.slane %v291_v2, %v370_v10  ;;  %v2885_v19 = vunpack.c.l.bf16 %v2916_v6 }
  0x23   : > { %v3507_v20 = vrot.slane %v291_v2, %v390_v12  ;;  %v2886_v21 = vunpack.c.h.bf16 %v2916_v6  ;;  %v2889_v22 = vunpack.c.l.bf16 %v2917_v11  ;;  %v2890_v23 = vunpack.c.h.bf16 %v2917_v11  ;;  %v2920_v11 = vld [vmem:[%s3489_s24 + $0x30] sm:$0xff]  }
  0x24   : > { %v332_v24 = vmul.f32 %v2877_v7, %v3501_v16  ;;  %v372_v25 = vmul.f32 %v2877_v7, %v3505_v18  ;;  %v333_v26 = vmul.f32 %v2878_v13, %v3501_v16  ;;  %v373_v27 = vmul.f32 %v2878_v13, %v3505_v18 }
  0x25   : > { %v334_v28 = vmul.f32 %v2881_v14, %v3501_v16  ;;  %v374_v29 = vmul.f32 %v2881_v14, %v3505_v18  ;;  %v335_v30 = vmul.f32 %v2882_v15, %v3501_v16  ;;  %v375_v31 = vmul.f32 %v2882_v15, %v3505_v18 }
  0x26   : > { %v352_v32 = vadd.f32 %v3503_v17, %v332_v24  ;;  %v392_v33 = vadd.f32 %v3507_v20, %v372_v25  ;;  %v353_v34 = vadd.f32 %v3503_v17, %v333_v26  ;;  %v393_v35 = vadd.f32 %v3507_v20, %v373_v27  ;;  %v2921_v24 = vld [vmem:[%s3489_s24 + $0x38] sm:$0xff]  }
  0x27   : > { %v354_v36 = vadd.f32 %v3503_v17, %v334_v28  ;;  %v394_v37 = vadd.f32 %v3507_v20, %v374_v29  ;;  %v355_v38 = vadd.f32 %v3503_v17, %v335_v30  ;;  %v395_v39 = vadd.f32 %v3507_v20, %v375_v31 }
  0x28   : > { %v408_v40 = vmax.f32 %v352_v32, %v392_v33  ;;  %v409_v41 = vmax.f32 %v353_v34, %v393_v35  ;;  %v336_v42 = vmul.f32 %v2885_v19, %v3501_v16  ;;  %v376_v43 = vmul.f32 %v2885_v19, %v3505_v18 }
  0x29   : > { %v410_v44 = vmax.f32 %v354_v36, %v394_v37  ;;  %v411_v45 = vmax.f32 %v355_v38, %v395_v39  ;;  %v337_v46 = vmul.f32 %v2886_v21, %v3501_v16  ;;  %v377_v47 = vmul.f32 %v2886_v21, %v3505_v18 }
  0x2a   : > { %425 = vst.msk [vmem:[#allocation2 + $0x10] sm:$0xff] %vm424_vm1, %v408_v40  ;;  %426 = vst.msk [vmem:[#allocation2 + $0x18] sm:$0xff] %vm424_vm1, %v409_v41  ;;  %v356_v49 = vadd.f32 %v3503_v17, %v336_v42  ;;  %v396_v50 = vadd.f32 %v3507_v20, %v376_v43  ;;  %v338_v51 = vmul.f32 %v2889_v22, %v3501_v16  ;;  %v2893_v61 = vunpack.c.l.bf16 %v2918_v48 }
  0x2b   : > { %v378_v52 = vmul.f32 %v2889_v22, %v3505_v18  ;;  %427 = vst.msk [vmem:[#allocation2 + $0x20] sm:$0xff] %vm424_vm1, %v410_v44  ;;  %428 = vst.msk [vmem:[#allocation2 + $0x28] sm:$0xff] %vm424_vm1, %v411_v45  ;;  %v357_v53 = vadd.f32 %v3503_v17, %v337_v46  ;;  %v397_v54 = vadd.f32 %v3507_v20, %v377_v47  ;;  %v2894_v1 = vunpack.c.h.bf16 %v2918_v48 }
  0x2c   : > { %v339_v55 = vmul.f32 %v2890_v23, %v3501_v16  ;;  %v379_v56 = vmul.f32 %v2890_v23, %v3505_v18  ;;  %v412_v58 = vmax.f32 %v356_v49, %v396_v50  ;;  %v358_v59 = vadd.f32 %v3503_v17, %v338_v51 }
  0x2d   : > { %v398_v60 = vadd.f32 %v3507_v20, %v378_v52  ;;  %v413_v62 = vmax.f32 %v357_v53, %v397_v54  ;;  %v340_v4 = vmul.f32 %v2893_v61, %v3501_v16  ;;  %v380_v5 = vmul.f32 %v2893_v61, %v3505_v18 }
  0x2e   : > { %v359_v63 = vadd.f32 %v3503_v17, %v339_v55  ;;  %v399_v0 = vadd.f32 %v3507_v20, %v379_v56  ;;  %429 = vst.msk [vmem:[#allocation2 + $0x30] sm:$0xff] %vm424_vm1, %v412_v58  ;;  %v2897_v6 = vunpack.c.l.bf16 %v2919_v57  ;;  %v341_v8 = vmul.f32 %v2894_v1, %v3501_v16 }
  0x2f   : > { %v414_v2 = vmax.f32 %v358_v59, %v398_v60  ;;  %430 = vst.msk [vmem:[#allocation2 + $0x38] sm:$0xff] %vm424_vm1, %v413_v62  ;;  %v381_v9 = vmul.f32 %v2894_v1, %v3505_v18  ;;  %v2898_v10 = vunpack.c.h.bf16 %v2919_v57  ;;  %v360_v12 = vadd.f32 %v3503_v17, %v340_v4 }
  0x30   : > { %v415_v7 = vmax.f32 %v359_v63, %v399_v0  ;;  %v400_v13 = vadd.f32 %v3507_v20, %v380_v5  ;;  %v342_v14 = vmul.f32 %v2897_v6, %v3501_v16  ;;  %v382_v15 = vmul.f32 %v2897_v6, %v3505_v18 }
  0x31   : > { %431 = vst.msk [vmem:[#allocation2 + $0x40] sm:$0xff] %vm424_vm1, %v414_v2  ;;  %v361_v19 = vadd.f32 %v3503_v17, %v341_v8  ;;  %v401_v21 = vadd.f32 %v3507_v20, %v381_v9  ;;  %v343_v22 = vmul.f32 %v2898_v10, %v3501_v16  ;;  %v383_v23 = vmul.f32 %v2898_v10, %v3505_v18 }
  0x32   : > { %432 = vst.msk [vmem:[#allocation2 + $0x48] sm:$0xff] %vm424_vm1, %v415_v7  ;;  %v416_v25 = vmax.f32 %v360_v12, %v400_v13  ;;  %v362_v26 = vadd.f32 %v3503_v17, %v342_v14  ;;  %v402_v27 = vadd.f32 %v3507_v20, %v382_v15  ;;  %v2901_v28 = vunpack.c.l.bf16 %v2920_v11 }
  0x33   : > { %v417_v29 = vmax.f32 %v361_v19, %v401_v21  ;;  %v363_v30 = vadd.f32 %v3503_v17, %v343_v22  ;;  %v403_v31 = vadd.f32 %v3507_v20, %v383_v23  ;;  %v2902_v32 = vunpack.c.h.bf16 %v2920_v11 }
  0x34   : > { %433 = vst.msk [vmem:[#allocation2 + $0x50] sm:$0xff] %vm424_vm1, %v416_v25  ;;  %v418_v33 = vmax.f32 %v362_v26, %v402_v27  ;;  %v344_v34 = vmul.f32 %v2901_v28, %v3501_v16  ;;  %v384_v35 = vmul.f32 %v2901_v28, %v3505_v18  ;;  %v2905_v36 = vunpack.c.l.bf16 %v2921_v24 }
  0x35   : > { %434 = vst.msk [vmem:[#allocation2 + $0x58] sm:$0xff] %vm424_vm1, %v417_v29  ;;  %v419_v37 = vmax.f32 %v363_v30, %v403_v31  ;;  %v345_v38 = vmul.f32 %v2902_v32, %v3501_v16  ;;  %v385_v39 = vmul.f32 %v2902_v32, %v3505_v18  ;;  %v2906_v40 = vunpack.c.h.bf16 %v2921_v24 }
  0x36   : > { %435 = vst.msk [vmem:[#allocation2 + $0x60] sm:$0xff] %vm424_vm1, %v418_v33  ;;  %v364_v41 = vadd.f32 %v3503_v17, %v344_v34  ;;  %v404_v42 = vadd.f32 %v3507_v20, %v384_v35  ;;  %v346_v43 = vmul.f32 %v2905_v36, %v3501_v16  ;;  %v386_v44 = vmul.f32 %v2905_v36, %v3505_v18 }
  0x37   : > { %436 = vst.msk [vmem:[#allocation2 + $0x68] sm:$0xff] %vm424_vm1, %v419_v37  ;;  %v365_v45 = vadd.f32 %v3503_v17, %v345_v38  ;;  %v405_v46 = vadd.f32 %v3507_v20, %v385_v39  ;;  %v347_v47 = vmul.f32 %v2906_v40, %v3501_v16  ;;  %v387_v48 = vmul.f32 %v2906_v40, %v3505_v18  ;;  %443 = sbr.rel (%p2751_p7) target bundleno = 62 (0x3e), region = 40 }
  0x38   : > { %v420_v49 = vmax.f32 %v364_v41, %v404_v42  ;;  %v366_v50 = vadd.f32 %v3503_v17, %v346_v43  ;;  %v406_v51 = vadd.f32 %v3507_v20, %v386_v44  ;;  %v3390_v57 = vmov (!%p2751_p7), 0.0  }
  0x39   : > { %v421_v52 = vmax.f32 %v365_v45, %v405_v46  ;;  %v367_v53 = vadd.f32 %v3503_v17, %v347_v47  ;;  %v407_v54 = vadd.f32 %v3507_v20, %v387_v48  ;;  %444 = vst.msk [vmem:[#allocation2] sm:$0xff] (!%p2751_p7), %vm424_vm1, %v3390_v57  ;;  %445 = vst.msk [vmem:[#allocation2 + $0x8] sm:$0xff] (!%p2751_p7), %vm424_vm1, %v3390_v57 }
  0x3a   : > { %437 = vst.msk [vmem:[#allocation2 + $0x70] sm:$0xff] %vm424_vm1, %v420_v49  ;;  %v422_v55 = vmax.f32 %v366_v50, %v406_v51 }
  0x3b   : > { %438 = vst.msk [vmem:[#allocation2 + $0x78] sm:$0xff] %vm424_vm1, %v421_v52  ;;  %v423_v56 = vmax.f32 %v367_v53, %v407_v54 }
  0x3c   : > { %439 = vst.msk [vmem:[#allocation2 + $0x80] sm:$0xff] %vm424_vm1, %v422_v55 }
  0x3d   : > { %440 = vst.msk [vmem:[#allocation2 + $0x88] sm:$0xff] %vm424_vm1, %v423_v56 }
  0x3e PF: > { %p2754_p8 = scmp.le.s32.totalorder %s3371_s18, 0 }
  0x3f   : > { %s2755_s28 = sadd.s32 (!%p2754_p8), 4294967280, %s3457_s26 }
  0x40   : > { %449 = sbr.rel (%p2754_p8) target bundleno = 77 (0x4d), region = 44  ;;  %s451_s7 = sshra.s32 (!%p2754_p8), %s2755_s28, 3 }
  0x41   : > { %s2756_s8 = sshll.u32 (!%p2754_p8), %s451_s7, 2 }
  0x42   : > { %s454_s9 = scalar_lea.vmem (!%p2754_p8), %s3462_s6, %s2756_s8 }
  0x43   : > { %v2908_v58 = vld [vmem:[%s454_s9] sm:$0xff] (!%p2754_p8)  }
  0x44   : > { %v2909_v59 = vunpack.c.l.bf16 (!%p2754_p8), %v2908_v58  ;;  %v2910_v60 = vunpack.c.h.bf16 (!%p2754_p8), %v2908_v58 }
  0x46   : > { %v459_v61 = vmul.f32 (!%p2754_p8), %v2909_v59, %v3501_v16  ;;  %v463_v62 = vmul.f32 (!%p2754_p8), %v2909_v59, %v3505_v18  ;;  %v460_v63 = vmul.f32 (!%p2754_p8), %v2910_v60, %v3501_v16  ;;  %v464_v0 = vmul.f32 (!%p2754_p8), %v2910_v60, %v3505_v18 }
  0x48   : > { %v461_v1 = vadd.f32 %v459_v61, %v3503_v17  ;;  %v465_v2 = vadd.f32 %v463_v62, %v3507_v20  ;;  %v462_v4 = vadd.f32 %v460_v63, %v3503_v17  ;;  %v466_v5 = vadd.f32 %v464_v0, %v3507_v20 }
  0x4a   : > { %v467_v6 = vmax.f32 %v461_v1, %v465_v2  ;;  %v468_v7 = vmax.f32 %v462_v4, %v466_v5 }
  0x4c   : > { %469 = vst.msk [vmem:[#allocation2] sm:$0xff] %vm424_vm1, %v467_v6  ;;  %470 = vst.msk [vmem:[#allocation2 + $0x8] sm:$0xff] %vm424_vm1, %v468_v7 }
  0x4d PF: > { %p2757_p9 = scmp.ne.s32.totalorder %s3371_s18, 1 }
  0x4e   : > { %v3391_v8 = vmov (!%p2757_p9), 0.0  }
  0x4f   : > { %474 = sbr.rel (%p2757_p9) target bundleno = 86 (0x56), region = 48  ;;  %475 = vst.msk [vmem:[#allocation2 + $0x90] sm:$0xff] (!%p2757_p9), %vm424_vm1, %v3391_v8  ;;  %476 = vst.msk [vmem:[#allocation2 + $0x98] sm:$0xff] (!%p2757_p9), %vm424_vm1, %v3391_v8 }
  0x56 PF: > { %p2758_p10 = scmp.ge.s32.totalorder %s3371_s18, 1 }
  0x57   : > { %s481_s10 = sadd.s32 (!%p2758_p10), 128, %s3457_s26 }
  0x58   : > { %480 = sbr.rel (%p2758_p10) target bundleno = 101 (0x65), region = 52  ;;  %s482_s11 = sshra.s32 (!%p2758_p10), %s481_s10, 3 }
  0x59   : > { %s2759_s12 = sshll.u32 (!%p2758_p10), %s482_s11, 2 }
  0x5a   : > { %s485_s14 = scalar_lea.vmem (!%p2758_p10), %s3462_s6, %s2759_s12 }
  0x5b   : > { %v2912_v9 = vld [vmem:[%s485_s14] sm:$0xff] (!%p2758_p10)  }
  0x5c   : > { %v2913_v10 = vunpack.c.l.bf16 (!%p2758_p10), %v2912_v9  ;;  %v2914_v11 = vunpack.c.h.bf16 (!%p2758_p10), %v2912_v9 }
  0x5e   : > { %v490_v12 = vmul.f32 (!%p2758_p10), %v2913_v10, %v3501_v16  ;;  %v494_v13 = vmul.f32 (!%p2758_p10), %v2913_v10, %v3505_v18  ;;  %v491_v14 = vmul.f32 (!%p2758_p10), %v2914_v11, %v3501_v16  ;;  %v495_v15 = vmul.f32 (!%p2758_p10), %v2914_v11, %v3505_v18 }
  0x60   : > { %v492_v19 = vadd.f32 %v490_v12, %v3503_v17  ;;  %v496_v21 = vadd.f32 %v494_v13, %v3507_v20  ;;  %v493_v22 = vadd.f32 %v491_v14, %v3503_v17  ;;  %v497_v23 = vadd.f32 %v495_v15, %v3507_v20 }
  0x62   : > { %v498_v24 = vmax.f32 %v492_v19, %v496_v21  ;;  %v499_v25 = vmax.f32 %v493_v22, %v497_v23 }
  0x64   : > { %500 = vst.msk [vmem:[#allocation2 + $0x90] sm:$0xff] %vm424_vm1, %v498_v24  ;;  %501 = vst.msk [vmem:[#allocation2 + $0x98] sm:$0xff] %vm424_vm1, %v499_v25 }
  0x65 PF: > { %v2760_v16 = vld [vmem:[%s4102_s2 + $0x2] sm:$0x3]  ;;  %vm1023_vm2 = vcmask 1041408   ;;  %v3632_v18 = vld [vmem:[%s4102_s2 + $0x8] sm:$0x3]  ;;  %v1580_v28 = vld [vmem:[#allocation2 + $0x10] sm:$0xff] }
  0x66   : > { %v973_v17 = vld [vmem:[#allocation2] sm:$0xff]  ;;  %3295 = vmatprep.subr.msk.bf16.mxu1 %vm1023_vm2, %v2760_v16  ;;  %3299 = vmatprep.subr.msk.bf16.mxu0 %vm1023_vm2, %v3632_v18  ;;  %v1025_v20 = vsel %vm1023_vm2, %v2760_v16, 0  ;;  %v3640_v26 = vsel %vm1023_vm2, %v3632_v18, 0  ;;  %v3642_v27 = vld [vmem:[#allocation2 + $0x8] sm:$0xff]  ;;  %v1581_v29 = vld [vmem:[#allocation2 + $0x18] sm:$0xff]  ;;  %v506_v30 = vadd.s32 24, %v3491_v3 }
  0x67   : > { %883 = vst.msk [vmem:[#allocation3 + $0x1] sm:$0xff] %vm424_vm1, %v973_v17  ;;  %3004 = vmatpush3.bf16.msra.mxu1 %v1025_v20  ;;  %3076 = vmatpush3.bf16.msra.mxu0 %v3640_v26  ;;  %v989_v31 = vpack.c.bf16 %v3642_v27, %v973_v17  ;;  %v1596_v32 = vpack.c.bf16 %v1581_v29, %v1580_v28  ;;  %v972_v33 = vld [vmem:[%s4102_s2] sm:$0x3]  ;;  %v3651_v35 = vld [vmem:[#allocation2 + $0x28] sm:$0xff]  ;;  %v508_v36 = vadd.s32 40, %v3491_v3  ;;  %v510_v37 = vadd.s32 56, %v3491_v3 }
  0x68   : > { %v1582_v34 = vld [vmem:[#allocation2 + $0x20] sm:$0xff]  ;;  %885 = vst.msk [vmem:[#allocation3 + $0x11] sm:$0xff] %vm424_vm1, %v1580_v28  ;;  %3296 = vmatprep.subr.msk.bf16.mxu1 %vm1023_vm2, %v972_v33  ;;  %v2804_v39 = vld [vmem:[%s4102_s2 + $0xa] sm:$0x3]  ;;  %v1149_v40 = vsel %vm1023_vm2, %v972_v33, 0  ;;  %v1584_v41 = vld [vmem:[#allocation2 + $0x30] sm:$0xff] }
  0x69   : > { %v3658_v38 = vpack.c.bf16 %v3651_v35, %v1582_v34  ;;  %v3664_v42 = vld [vmem:[#allocation2 + $0x38] sm:$0xff]  ;;  %v548_v43 = vand.u32 15, %v506_v30  ;;  %887 = vst.msk [vmem:[#allocation3 + $0x21] sm:$0xff] %vm424_vm1, %v1582_v34  ;;  %3005 = vmatprep.mubr.msk.bf16.mxu1 %vm424_vm1, %v989_v31  ;;  %3077 = vmatprep.mubr.msk.bf16.mxu0 %vm424_vm1, %v1596_v32  ;;  %v1797_v44 = vsel %vm1023_vm2, %v2804_v39, 0  ;;  %v1586_v46 = vld [vmem:[#allocation2 + $0x40] sm:$0xff]  ;;  %v562_v48 = vand.u32 15, %v508_v36 }
  0x6a   : > { %v3671_v45 = vpack.c.bf16 %v3664_v42, %v1584_v41  ;;  %v805_v47 = vld [vmem:[#allocation2 + $0x11] sm:$0xff]  ;;  %v576_v49 = vand.u32 15, %v510_v37  ;;  %889 = vst.msk [vmem:[#allocation3 + $0x31] sm:$0xff] %vm424_vm1, %v1584_v41  ;;  %3006 = vmatmul.mubr.msk.bf16.vlgmr.msra.gmra.mrb[0].mxu1 %vm424_vm1, %v1596_v32  ;;  %v3677_v50 = vld [vmem:[#allocation2 + $0x48] sm:$0xff]  ;;  %v806_v52 = vld [vmem:[#allocation2 + $0x19] sm:$0xff]  ;;  %v512_v54 = vadd.s32 72, %v3491_v3  ;;  %3301 = vmatprep.subr.msk.bf16.mxu0 %vm1023_vm2, %v2804_v39 }
  0x6b   : > { %3078 = vmatmul.mubr.msk.bf16.vlgmr.msra.gmra.mrb[0].mxu0 %vm424_vm1, %v3658_v38  ;;  %vm3679_vm3 = vcmp.eq.s32.totalorder %v548_v43, 15  ;;  %929 = vst.msk [vmem:[#allocation3 + $0xb0] sm:$0xff] %vm424_vm1, %v805_v47  ;;  %v3684_v53 = vld [vmem:[#allocation2 + $0x50] sm:$0xff]  ;;  %v504_v55 = vadd.s32 8, %v3491_v3  ;;  %891 = vst.msk [vmem:[#allocation3 + $0x41] sm:$0xff] %vm424_vm1, %v1586_v46  ;;  %3022 = vmatpush3.bf16.msra.mxu1 %v1149_v40  ;;  %vm3694_vm4 = vcmp.eq.s32.totalorder %v562_v48, 15  ;;  %v3729_v7 = vpack.c.bf16 %v3677_v50, %v1586_v46 }
  0x6c   : > { %v866_v56 = vsel %vm3679_vm3, 0.0, %v1581_v29  ;;  %v909_v57 = vsel %vm3679_vm3, 0.0, %v806_v52  ;;  %v807_v59 = vld [vmem:[#allocation2 + $0x21] sm:$0xff]  ;;  %v808_v60 = vld [vmem:[#allocation2 + $0x29] sm:$0xff]  ;;  %893 = vst.msk [vmem:[#allocation3 + $0x51] sm:$0xff] %vm424_vm1, %v3684_v53  ;;  %3094 = vmatpush3.bf16.msra.mxu0 %v1797_v44  ;;  %3009 = vmatprep.mubr.msk.bf16.mxu1 %vm424_vm1, %v3658_v38  ;;  %vm3714_vm5 = vcmp.eq.s32.totalorder %v576_v49, 15 }
  0x6d   : > { %v3698_v61 = vld [vmem:[#allocation2 + $0x60] sm:$0xff]  ;;  %886 = vst.msk [vmem:[#allocation3 + $0x19] sm:$0xff] %vm424_vm1, %v866_v56  ;;  %930 = vst.msk [vmem:[#allocation3 + $0xb8] sm:$0xff] %vm424_vm1, %v909_v57  ;;  %v911_v62 = vsel %vm3694_vm4, 0.0, %v808_v60  ;;  %v3712_v63 = vld [vmem:[%s4102_s2 + $0xc] sm:$0x3]  ;;  %3081 = vmatprep.mubr.msk.bf16.mxu0 %vm424_vm1, %v3671_v45 }
  0x6e   : > { %931 = vst.msk [vmem:[#allocation3 + $0xc0] sm:$0xff] %vm424_vm1, %v807_v59  ;;  %v809_v1 = vld [vmem:[#allocation2 + $0x31] sm:$0xff]  ;;  %895 = vst.msk [vmem:[#allocation3 + $0x61] sm:$0xff] %vm424_vm1, %v3698_v61  ;;  %3302 = vmatprep.subr.msk.bf16.mxu0 %vm1023_vm2, %v3712_v63  ;;  %v810_v2 = vld [vmem:[#allocation2 + $0x39] sm:$0xff]  ;;  %v590_v5 = vand.u32 15, %v512_v54  ;;  %v534_v6 = vand.u32 15, %v504_v55 }
  0x6f   : > { %932 = vst.msk [vmem:[#allocation3 + $0xc8] sm:$0xff] %vm424_vm1, %v911_v62  ;;  %933 = vst.msk [vmem:[#allocation3 + $0xd0] sm:$0xff] %vm424_vm1, %v809_v1  ;;  %v3726_v4 = vld [vmem:[#allocation2 + $0x70] sm:$0xff]  ;;  %v913_v8 = vsel %vm3714_vm5, 0.0, %v810_v2  ;;  %v811_v9 = vld [vmem:[#allocation2 + $0x41] sm:$0xff]  ;;  %vm904_vm6 = vcmask 24576  }
  0x70   : > { %v812_v10 = vld [vmem:[#allocation2 + $0x49] sm:$0xff]  ;;  %v813_v11 = vld [vmem:[#allocation2 + $0x51] sm:$0xff]  ;;  %897 = vst.msk [vmem:[#allocation3 + $0x71] sm:$0xff] %vm424_vm1, %v3726_v4  ;;  %934 = vst.msk [vmem:[#allocation3 + $0xd8] sm:$0xff] %vm424_vm1, %v913_v8  ;;  %vm3736_vm7 = vcmp.eq.s32.totalorder %v590_v5, 15  ;;  %vm3741_vm8 = vcmp.eq.s32.totalorder %v534_v6, 15 }
  0x71   : > { %935 = vst.msk [vmem:[#allocation3 + $0xe0] sm:$0xff] %vm424_vm1, %v811_v9  ;;  %v3392_v14 = vmov 0.0   ;;  %v514_v15 = vadd.s32 88, %v3491_v3  ;;  %937 = vst.msk [vmem:[#allocation3 + $0xf0] sm:$0xff] %vm424_vm1, %v813_v11  ;;  %v3752_v19 = vld [vmem:[%s4102_s2 + $0x4] sm:$0x3] }
  0x72   : > { %905 = vst.msk [vmem:[#allocation3] sm:$0x1] %vm904_vm6, %v3392_v14  ;;  %947 = vst.msk [vmem:[#allocation3 + $0x13f] sm:$0x1] %vm904_vm6, %v3392_v14  ;;  %v984_v21 = vld [vmem:[#allocation2 + $0x58] sm:$0xff]  ;;  %v915_v22 = vsel %vm3736_vm7, 0.0, %v812_v10  ;;  %3297 = vmatprep.subr.msk.bf16.mxu1 %vm1023_vm2, %v3752_v19  ;;  %3010 = vmatmul.mubr.msk.bf16.gmra.mrb[4].mxu1 %vm424_vm1, %v3671_v45 }
  0x73   : > { %v864_v23 = vsel %vm3741_vm8, 0.0, %v3642_v27  ;;  %v516_v24 = vadd.s32 104, %v3491_v3  ;;  %v815_v25 = vld [vmem:[#allocation2 + $0x61] sm:$0xff]  ;;  %v1746_v16 = vld [vmem:[#allocation3 + $0xb0] sm:$0xff]  ;;  %936 = vst.msk [vmem:[#allocation3 + $0xe8] sm:$0xff] %vm424_vm1, %v915_v22  ;;  %v604_v20 = vand.u32 15, %v514_v15  ;;  %3082 = vmatmul.mubr.msk.bf16.gmra.mrb[4].mxu0 %vm424_vm1, %v3729_v7  ;;  %3013 = vmatprep.mubr.msk.bf16.mxu1 %vm424_vm1, %v3729_v7 }
  0x74   : > { %v986_v17 = vld [vmem:[#allocation2 + $0x68] sm:$0xff]  ;;  %884 = vst.msk [vmem:[#allocation3 + $0x9] sm:$0xff] %vm424_vm1, %v864_v23  ;;  %v814_v28 = vld [vmem:[#allocation2 + $0x59] sm:$0xff]  ;;  %939 = vst.msk [vmem:[#allocation3 + $0x100] sm:$0xff] %vm424_vm1, %v815_v25  ;;  %v868_v27 = vsel %vm3694_vm4, 0.0, %v3651_v35  ;;  %v518_v29 = vadd.s32 120, %v3491_v3 }
  0x75   : > { %v817_v30 = vld [vmem:[#allocation2 + $0x71] sm:$0xff]  ;;  %v618_v31 = vand.u32 15, %v516_v24  ;;  %v816_v32 = vld [vmem:[#allocation2 + $0x69] sm:$0xff]  ;;  %888 = vst.msk [vmem:[#allocation3 + $0x29] sm:$0xff] %vm424_vm1, %v868_v27  ;;  %v870_v33 = vsel %vm3714_vm5, 0.0, %v3664_v42  ;;  %v520_v34 = vadd.s32 136, %v3491_v3 }
  0x76   : > { %941 = vst.msk [vmem:[#allocation3 + $0x110] sm:$0xff] %vm424_vm1, %v817_v30  ;;  %v819_v35 = vld [vmem:[#allocation2 + $0x81] sm:$0xff]  ;;  %v872_v36 = vsel %vm3736_vm7, 0.0, %v3677_v50  ;;  %v1747_v37 = vld [vmem:[#allocation3 + $0xb8] sm:$0xff]  ;;  %vm3784_vm9 = vcmp.eq.s32.totalorder %v604_v20, 15  ;;  %v632_v41 = vand.u32 15, %v518_v29  ;;  %v3800_v50 = vpack.c.bf16 %v984_v21, %v3684_v53 }
  0x77   : > { %v1748_v39 = vld [vmem:[#allocation3 + $0xc0] sm:$0xff]  ;;  %890 = vst.msk [vmem:[#allocation3 + $0x39] sm:$0xff] %vm424_vm1, %v870_v33  ;;  %943 = vst.msk [vmem:[#allocation3 + $0x120] sm:$0xff] %vm424_vm1, %v819_v35  ;;  %v3791_v42 = vpack.c.bf16 %v1747_v37, %v1746_v16  ;;  %v1749_v44 = vld [vmem:[#allocation3 + $0xc8] sm:$0xff]  ;;  %v917_v46 = vsel %vm3784_vm9, 0.0, %v814_v28  ;;  %vm3795_vm10 = vcmp.eq.s32.totalorder %v618_v31, 15  ;;  %v3816_v53 = vpack.c.bf16 %v986_v17, %v3698_v61 }
  0x78   : > { %v818_v43 = vld [vmem:[#allocation2 + $0x79] sm:$0xff]  ;;  %892 = vst.msk [vmem:[#allocation3 + $0x49] sm:$0xff] %vm424_vm1, %v872_v36  ;;  %v646_v48 = vand.u32 15, %v520_v34  ;;  %v820_v49 = vld [vmem:[#allocation2 + $0x89] sm:$0xff]  ;;  %938 = vst.msk [vmem:[#allocation3 + $0xf8] sm:$0xff] %vm424_vm1, %v917_v46  ;;  %v919_v52 = vsel %vm3795_vm10, 0.0, %v816_v32  ;;  %v3813_v57 = vpack.c.bf16 %v1749_v44, %v1748_v39 }
  0x79   : > { %v1750_v51 = vld [vmem:[#allocation3 + $0xd0] sm:$0xff]  ;;  %vm3805_vm11 = vcmp.eq.s32.totalorder %v632_v41, 15  ;;  %v874_v55 = vsel %vm3784_vm9, 0.0, %v984_v21  ;;  %v803_v56 = vld [vmem:[#allocation2 + $0x1] sm:$0xff]  ;;  %3095 = vmatprep.mubr.msk.bf16.mxu0 %vm424_vm1, %v3791_v42  ;;  %v1751_v58 = vld [vmem:[#allocation3 + $0xd8] sm:$0xff]  ;;  %940 = vst.msk [vmem:[#allocation3 + $0x108] sm:$0xff] %vm424_vm1, %v919_v52 }
  0x7a   : > { %v988_v59 = vld [vmem:[#allocation2 + $0x78] sm:$0xff]  ;;  %v921_v60 = vsel %vm3805_vm11, 0.0, %v818_v43  ;;  %vm3821_vm12 = vcmp.eq.s32.totalorder %v646_v48, 15  ;;  %894 = vst.msk [vmem:[#allocation3 + $0x59] sm:$0xff] %vm424_vm1, %v874_v55  ;;  %927 = vst.msk [vmem:[#allocation3 + $0xa0] sm:$0xff] %vm424_vm1, %v803_v56  ;;  %v876_v0 = vsel %vm3795_vm10, 0.0, %v986_v17  ;;  %v3837_v9 = vpack.c.bf16 %v1751_v58, %v1750_v51  ;;  %3014 = vmatmul.mubr.msk.bf16.gmra.mrb[8].mxu1 %vm424_vm1, %v3800_v50 }
  0x7b   : > { %942 = vst.msk [vmem:[#allocation3 + $0x118] sm:$0xff] %vm424_vm1, %v921_v60  ;;  %v923_v61 = vsel %vm3821_vm12, 0.0, %v820_v49  ;;  %v878_v1 = vsel %vm3805_vm11, 0.0, %v988_v59  ;;  %v804_v2 = vld [vmem:[#allocation2 + $0x9] sm:$0xff]  ;;  %v799_v5 = vld [vmem:[#allocation2 + $0x80] sm:$0xff]  ;;  %v522_v6 = vadd.s32 152, %v3491_v3  ;;  %3096 = vmatmul.mubr.msk.bf16.vlgmr.msra.gmra.mrb[0].mxu0 %vm424_vm1, %v3813_v57  ;;  %3017 = vmatprep.mubr.msk.bf16.mxu1 %vm424_vm1, %v3816_v53  ;;  %v3866_v25 = vpack.c.bf16 %v988_v59, %v3726_v4 }
  0x7c   : > { %v1963_v8 = vsel %vm1023_vm2, %v3712_v63, 0  ;;  %944 = vst.msk [vmem:[#allocation3 + $0x128] sm:$0xff] %vm424_vm1, %v923_v61  ;;  %896 = vst.msk [vmem:[#allocation3 + $0x69] sm:$0xff] %vm424_vm1, %v876_v0  ;;  %v907_v10 = vsel %vm3741_vm8, 0.0, %v804_v2  ;;  %v3848_v3 = vld [vmem:[%s4102_s2 + $0xe] sm:$0x3]  ;;  %3099 = vmatprep.mubr.msk.bf16.mxu0 %vm424_vm1, %v3837_v9 }
  0x7d   : > { %898 = vst.msk [vmem:[#allocation3 + $0x79] sm:$0xff] %vm424_vm1, %v878_v1  ;;  %899 = vst.msk [vmem:[#allocation3 + $0x81] sm:$0xff] %vm424_vm1, %v799_v5  ;;  %v1752_v63 = vld [vmem:[#allocation3 + $0xe0] sm:$0xff]  ;;  %3112 = vmatpush3.bf16.msra.mxu0 %v1963_v8  ;;  %v1753_v11 = vld [vmem:[#allocation3 + $0xe8] sm:$0xff]  ;;  %v660_v14 = vand.u32 15, %v522_v6  ;;  %vm902_vm14 = vcmask 30720  }
  0x7e   : > { %928 = vst.msk [vmem:[#allocation3 + $0xa8] sm:$0xff] %vm424_vm1, %v907_v10  ;;  %v948_v12 = vld [vmem:[#allocation3] sm:$0xff]  ;;  %v1754_v13 = vld [vmem:[#allocation3 + $0xf0] sm:$0xff]  ;;  %v949_v15 = vld [vmem:[#allocation3 + $0x8] sm:$0xff]  ;;  %3303 = vmatprep.subr.msk.bf16.mxu0 %vm1023_vm2, %v3848_v3  ;;  %v3868_v16 = vpack.c.bf16 %v1753_v11, %v1752_v63  ;;  %v1299_v47 = vsel %vm1023_vm2, %v3752_v19, 0  ;;  %v2129_v6 = vsel %vm1023_vm2, %v3848_v3, 0 }
  0x7f   : > { %v1755_v21 = vld [vmem:[#allocation3 + $0xf8] sm:$0xff]  ;;  %v800_v22 = vld [vmem:[#allocation2 + $0x88] sm:$0xff]  ;;  %v3871_v17 = vld [vmem:[#allocation2 + $0x90] sm:$0xff]  ;;  %v964_v20 = vpack.c.bf16 %v949_v15, %v948_v12  ;;  %vm3875_vm13 = vcmp.eq.s32.totalorder %v660_v14, 15  ;;  %vm2474_vm15 = vcmask 27648  }
  0x80   : > { %v880_v23 = vsel %vm3821_vm12, 0.0, %v800_v22  ;;  %v3863_v24 = vpack.c.bf16 %v800_v22, %v799_v5  ;;  %v3873_v28 = vpack.c.bf16 %v1755_v21, %v1754_v13  ;;  %901 = vst.msk [vmem:[#allocation3 + $0x91] sm:$0xff] %vm424_vm1, %v3871_v17  ;;  %v802_v29 = vld [vmem:[#allocation2 + $0x98] sm:$0x7f]  ;;  %v950_v33 = vld [vmem:[#allocation3 + $0x10] sm:$0xff]  ;;  %v1756_v34 = vld [vmem:[#allocation3 + $0x100] sm:$0xff] }
  0x81   : > { %900 = vst.msk [vmem:[#allocation3 + $0x89] sm:$0xff] %vm424_vm1, %v880_v23  ;;  %v951_v4 = vld [vmem:[#allocation3 + $0x18] sm:$0xff]  ;;  %v882_v30 = vsel %vm3875_vm13, 0.0, %v802_v29  ;;  %v1757_v35 = vld [vmem:[#allocation3 + $0x108] sm:$0xff]  ;;  %v952_v37 = vld [vmem:[#allocation3 + $0x20] sm:$0xff] }
  0x82   : > { %3018 = vmatmul.mubr.msk.bf16.gmra.mrb[12].mxu1 %vm424_vm1, %v3866_v25  ;;  %v821_v31 = vld [vmem:[#allocation2 + $0x91] sm:$0xff]  ;;  %v822_v32 = vld [vmem:[#allocation2 + $0x99] sm:$0x7f]  ;;  %903 = vst.msk [vmem:[#allocation3 + $0x99] sm:$0x7f] %vm902_vm14, %v882_v30  ;;  %v953_v39 = vld [vmem:[#allocation3 + $0x28] sm:$0xff]  ;;  %v3895_v43 = vpack.c.bf16 %v951_v4, %v950_v33  ;;  %v3897_v44 = vpack.c.bf16 %v1757_v35, %v1756_v34 }
  0x83   : > { %3100 = vmatmul.mubr.msk.bf16.gmra.mrb[4].mxu0 %vm424_vm1, %v3868_v16  ;;  %3023 = vmatprep.mubr.msk.bf16.mxu1 %vm424_vm1, %v964_v20  ;;  %v925_v36 = vsel %vm3875_vm13, 0.0, %v822_v32  ;;  %945 = vst.msk [vmem:[#allocation3 + $0x130] sm:$0xff] %vm424_vm1, %v821_v31  ;;  %v1758_v40 = vld [vmem:[#allocation3 + $0x110] sm:$0xff]  ;;  %v1759_v41 = vld [vmem:[#allocation3 + $0x118] sm:$0xff]  ;;  %v3899_v46 = vpack.c.bf16 %v953_v39, %v952_v37  ;;  %v2786_v49 = vld [vmem:[%s4102_s2 + $0x6] sm:$0x3] }
  0x84   : > { %3103 = vmatprep.mubr.msk.bf16.mxu0 %vm424_vm1, %v3873_v28  ;;  %946 = vst.msk [vmem:[#allocation3 + $0x138] sm:$0x7f] %vm902_vm14, %v925_v36  ;;  %v3903_v48 = vpack.c.bf16 %v1759_v41, %v1758_v40  ;;  %v954_v51 = vld [vmem:[#allocation3 + $0x30] sm:$0xff]  ;;  %v955_v52 = vld [vmem:[#allocation3 + $0x38] sm:$0xff]  ;;  %v1760_v54 = vld [vmem:[#allocation3 + $0x120] sm:$0xff]  ;;  %v1465_v21 = vsel %vm1023_vm2, %v2786_v49, 0 }
  0x85   : > { %v1761_v19 = vld [vmem:[#allocation3 + $0x128] sm:$0xff]  ;;  %v956_v55 = vld [vmem:[#allocation3 + $0x40] sm:$0xff]  ;;  %v967_v58 = vpack.c.bf16 %v955_v52, %v954_v51  ;;  %v958_v62 = vld [vmem:[#allocation3 + $0x50] sm:$0xff] }
  0x86   : > { %v957_v56 = vld [vmem:[#allocation3 + $0x48] sm:$0xff]  ;;  %v3917_v59 = vpack.c.bf16 %v1761_v19, %v1760_v54  ;;  %v959_v61 = vld [vmem:[#allocation3 + $0x58] sm:$0xff]  ;;  %v960_v0 = vld [vmem:[#allocation3 + $0x60] sm:$0xff] }
  0x87   : > { %v3919_v60 = vpack.c.bf16 %v957_v56, %v956_v55  ;;  %v961_v1 = vld [vmem:[#allocation3 + $0x68] sm:$0xff]  ;;  %v969_v2 = vpack.c.bf16 %v959_v61, %v958_v62  ;;  %v2831_v8 = vld [vmem:[%s4102_s2 + $0x10] sm:$0x3]  ;;  %v963_v63 = vld [vmem:[#allocation3 + $0x78] sm:$0xff] }
  0x88   : > { %v970_v5 = vpack.c.bf16 %v961_v1, %v960_v0  ;;  %v962_v10 = vld [vmem:[#allocation3 + $0x70] sm:$0xff]  ;;  %v1248_v11 = vld [vmem:[#allocation3 + $0xa0] sm:$0xff]  ;;  %v1249_v12 = vld [vmem:[#allocation3 + $0xa8] sm:$0xff] }
  0x89   : > { %v971_v3 = vpack.c.bf16 %v963_v63, %v962_v10  ;;  %v1264_v13 = vpack.c.bf16 %v1249_v12, %v1248_v11  ;;  %v1924_v14 = vld [vmem:[#allocation3 + $0x80] sm:$0xff]  ;;  %v1925_v15 = vld [vmem:[#allocation3 + $0x88] sm:$0xff]  ;;  %v1926_v23 = vld [vmem:[#allocation3 + $0x90] sm:$0xff] }
  0x8a   : > { %3024 = vmatmul.mubr.msk.bf16.vlgmr.msra.gmra.mrb[0].mxu1 %vm424_vm1, %v3895_v43  ;;  %v1934_v22 = vpack.c.bf16 %v1925_v15, %v1924_v14  ;;  %v1927_v20 = vld [vmem:[#allocation3 + $0x98] sm:$0xff] }
  0x8b   : > { %3104 = vmatmul.mubr.msk.bf16.gmra.mrb[8].mxu0 %vm424_vm1, %v3897_v44  ;;  %3040 = vmatpush3.bf16.msra.mxu1 %v1299_v47  ;;  %v1935_v27 = vpack.c.bf16 %v1927_v20, %v1926_v23 }
  0x8c   : > { %3027 = vmatprep.mubr.msk.bf16.mxu1 %vm424_vm1, %v3899_v46  ;;  %3107 = vmatprep.mubr.msk.bf16.mxu0 %vm424_vm1, %v3903_v48 }
  0x8d   : > { %3298 = vmatprep.subr.msk.bf16.mxu1 %vm1023_vm2, %v2786_v49 }
  0x92   : > { %3028 = vmatmul.mubr.msk.bf16.gmra.mrb[4].mxu1 %vm424_vm1, %v967_v58 }
  0x93   : > { %3108 = vmatmul.mubr.msk.bf16.gmra.mrb[12].mxu0 %vm424_vm1, %v3917_v59  ;;  %3031 = vmatprep.mubr.msk.bf16.mxu1 %vm424_vm1, %v3919_v60 }
  0x94   : > { %3113 = vmatprep.mubr.msk.bf16.mxu0 %vm424_vm1, %v3899_v46 }
  0x9a   : > { %3032 = vmatmul.mubr.msk.bf16.gmra.mrb[8].mxu1 %vm424_vm1, %v969_v2 }
  0x9b   : > { %3114 = vmatmul.mubr.msk.bf16.vlgmr.msra.gmra.mrb[0].mxu0 %vm424_vm1, %v967_v58  ;;  %3035 = vmatprep.mubr.msk.bf16.mxu1 %vm424_vm1, %v970_v5 }
  0x9c   : > { %3130 = vmatpush3.bf16.msra.mxu0 %v2129_v6  ;;  %3117 = vmatprep.mubr.msk.bf16.mxu0 %vm424_vm1, %v3919_v60 }
  0x9d   : > { %3304 = vmatprep.subr.msk.bf16.mxu0 %vm1023_vm2, %v2831_v8 }
  0xa2   : > { %3036 = vmatmul.mubr.msk.bf16.gmra.mrb[12].mxu1 %vm424_vm1, %v971_v3 }
  0xa3   : > { %3118 = vmatmul.mubr.msk.bf16.gmra.mrb[4].mxu0 %vm424_vm1, %v969_v2  ;;  %3041 = vmatprep.mubr.msk.bf16.mxu1 %vm424_vm1, %v1264_v13 }
  0xa4   : > { %3121 = vmatprep.mubr.msk.bf16.mxu0 %vm424_vm1, %v970_v5 }
  0xaa   : > { %3042 = vmatmul.mubr.msk.bf16.vlgmr.msra.gmra.mrb[0].mxu1 %vm424_vm1, %v3791_v42  ;;  %v2295_v42 = vsel %vm1023_vm2, %v2831_v8, 0 }
  0xab   : > { %3122 = vmatmul.mubr.msk.bf16.gmra.mrb[8].mxu0 %vm424_vm1, %v971_v3  ;;  %3058 = vmatpush3.bf16.msra.mxu1 %v1465_v21 }
  0xac   : > { %3045 = vmatprep.mubr.msk.bf16.mxu1 %vm424_vm1, %v3813_v57  ;;  %3125 = vmatprep.mubr.msk.bf16.mxu0 %vm424_vm1, %v1934_v22 }
  0xad   : > { %3300 = vmatprep.subr.msk.bf16.mxu1 %vm1023_vm2, %v3632_v18  ;;  %v2093_v18 = vld [vmem:[#allocation2 + $0x98] sm:$0xff] }
  0xb2   : > { %3046 = vmatmul.mubr.msk.bf16.gmra.mrb[4].mxu1 %vm424_vm1, %v3837_v9 }
  0xb3   : > { %3126 = vmatmul.mubr.msk.bf16.gmra.mrb[12].mxu0 %vm424_vm1, %v1935_v27  ;;  %3049 = vmatprep.mubr.msk.bf16.mxu1 %vm424_vm1, %v3868_v16 }
  0xb4   : > { %3131 = vmatprep.mubr.msk.bf16.mxu0 %vm424_vm1, %v3658_v38  ;;  %v2101_v38 = vpack.c.bf16 %v2093_v18, %v3871_v17 }
  0xba   : > { %3050 = vmatmul.mubr.msk.bf16.gmra.mrb[8].mxu1 %vm424_vm1, %v3873_v28 }
  0xbb   : > { %3132 = vmatmul.mubr.msk.bf16.vlgmr.msra.gmra.mrb[0].mxu0 %vm424_vm1, %v3671_v45  ;;  %3053 = vmatprep.mubr.msk.bf16.mxu1 %vm424_vm1, %v3897_v44  ;;  %v2259_v45 = vld [vmem:[#allocation3 + $0x138] sm:$0xff] }
  0xbc   : > { %3148 = vmatpush3.bf16.msra.mxu0 %v2295_v42  ;;  %3135 = vmatprep.mubr.msk.bf16.mxu0 %vm424_vm1, %v3729_v7 }
  0xc2   : > { %3054 = vmatmul.mubr.msk.bf16.gmra.mrb[12].mxu1 %vm424_vm1, %v3903_v48 }
  0xc3   : > { %3136 = vmatmul.mubr.msk.bf16.gmra.mrb[4].mxu0 %vm424_vm1, %v3800_v50  ;;  %3059 = vmatprep.mubr.msk.bf16.mxu1 %vm424_vm1, %v3895_v43 }
  0xc4   : > { %3139 = vmatprep.mubr.msk.bf16.mxu0 %vm424_vm1, %v3816_v53 }
  0xca   : > { %3060 = vmatmul.mubr.msk.bf16.vlgmr.msra.gmra.mrb[0].mxu1 %vm424_vm1, %v3899_v46 }
  0xcb   : > { %3140 = vmatmul.mubr.msk.bf16.gmra.mrb[8].mxu0 %vm424_vm1, %v3866_v25  ;;  %3166 = vmatpush3.bf16.msra.mxu1 %v3640_v26  ;;  %v2258_v26 = vld [vmem:[#allocation3 + $0x130] sm:$0xff] }
  0xcc   : > { %3063 = vmatprep.mubr.msk.bf16.mxu1 %vm424_vm1, %v967_v58  ;;  %3143 = vmatprep.mubr.msk.bf16.mxu0 %vm424_vm1, %v3863_v24  ;;  %v2267_v7 = vpack.c.bf16 %v2259_v45, %v2258_v26 }
  0xd2   : > { %3064 = vmatmul.mubr.msk.bf16.gmra.mrb[4].mxu1 %vm424_vm1, %v3919_v60 }
  0xd3   : > { %3144 = vmatmul.mubr.msk.bf16.gmra.mrb[12].mxu0 %vm424_vm1, %v2101_v38  ;;  %3067 = vmatprep.mubr.msk.bf16.mxu1 %vm424_vm1, %v969_v2 }
  0xd4   : > { %3149 = vmatprep.mubr.msk.bf16.mxu0 %vm424_vm1, %v3813_v57 }
  0xda   : > { %3068 = vmatmul.mubr.msk.bf16.gmra.mrb[8].mxu1 %vm424_vm1, %v970_v5 }
  0xdb   : > { %3150 = vmatmul.mubr.msk.bf16.vlgmr.msra.gmra.mrb[0].mxu0 %vm424_vm1, %v3837_v9  ;;  %3071 = vmatprep.mubr.msk.bf16.mxu1 %vm424_vm1, %v971_v3 }
  0xdc   : > { %3153 = vmatprep.mubr.msk.bf16.mxu0 %vm424_vm1, %v3868_v16 }
  0xe2   : > { %3072 = vmatmul.mubr.msk.bf16.gmra.mrb[12].mxu1 %vm424_vm1, %v1934_v22 }
  0xe3   : > { %3154 = vmatmul.mubr.msk.bf16.gmra.mrb[4].mxu0 %vm424_vm1, %v3873_v28  ;;  %3085 = vmatprep.mubr.msk.bf16.mxu1 %vm424_vm1, %v3800_v50 }
  0xe4   : > { %3157 = vmatprep.mubr.msk.bf16.mxu0 %vm424_vm1, %v3897_v44 }
  0xea   : > { %3086 = vmatmul.mubr.msk.bf16.vlgmr.msra.gmra.mrb[8].mxu1 %vm424_vm1, %v3816_v53 }
  0xeb   : > { %3158 = vmatmul.mubr.msk.bf16.gmra.mrb[8].mxu0 %vm424_vm1, %v3903_v48  ;;  %3089 = vmatprep.mubr.msk.bf16.mxu1 %vm424_vm1, %v3866_v25 }
  0xec   : > { %3161 = vmatprep.mubr.msk.bf16.mxu0 %vm424_vm1, %v3917_v59 }
  0xf2   : > { %3090 = vmatmul.mubr.msk.bf16.gmra.mrb[12].mxu1 %vm424_vm1, %v3863_v24 }
  0xf3   : > { %3162 = vmatmul.mubr.msk.bf16.gmra.mrb[12].mxu0 %vm424_vm1, %v2267_v7 }
 0x19d   : > { %v3061_v50 = vpop.f32.mrb[0].mxu1 }
 0x19e   : > { %v1501_v57 = vpop.f32.mrb[1].mxu1 }
 0x19f   : > { %v3062_v53 = vpop.f32.mrb[2].mxu1 }
 0x1a0   : > { %v1504_v9 = vpop.f32.mrb[3].mxu1 }
 0x1a5   : > { %v3065_v16 = vpop.f32.mrb[4].mxu1 }
 0x1a6   : > { %v1517_v17 = vpop.f32.mrb[5].mxu1 }
 0x1a7   : > { %v3066_v28 = vpop.f32.mrb[6].mxu1 }
 0x1a8   : > { %v1520_v25 = vpop.f32.mrb[7].mxu1 }
 0x1ae   : > { %v3151_v29 = vpop.f32.mrb[0].mxu0 }
 0x1af   : > { %v3167_v4 = vadd.f32 %v3151_v29, %v3061_v50  ;;  %v2331_v30 = vpop.f32.mrb[1].mxu0 }
 0x1b0   : > { %v3168_v31 = vadd.f32 %v2331_v30, %v1501_v57  ;;  %v3152_v32 = vpop.f32.mrb[2].mxu0 }
 0x1b1   : > { %v2861_v24 = vpack.c.bf16 %v3167_v4, %v3167_v4  ;;  %v3169_v33 = vadd.f32 %v3152_v32, %v3062_v53  ;;  %v2334_v34 = vpop.f32.mrb[3].mxu0  ;;  %v2534_v39 = vmul.f32 %v3167_v4, %v3167_v4  ;;  %v2495_v49 = vsel %vm424_vm1, %v3167_v4, 0.0 }
 0x1b2   : > { %v2859_v35 = vpack.c.bf16 %v3168_v31, %v3168_v31  ;;  %v2532_v36 = vmul.f32 %v3168_v31, %v3168_v31  ;;  %v3170_v37 = vadd.f32 %v2334_v34, %v1504_v9  ;;  %v2492_v41 = vsel %vm424_vm1, %v3168_v31, 0.0 }
 0x1b3   : > { %2477 = vst.msk [vmem:[%s3480_s30 + $0x8] sm:$0xf] %vm2474_vm15, %v2861_v24  ;;  %v2862_v40 = vpack.c.bf16 %v3169_v33, %v3169_v33  ;;  %v2535_v47 = vmul.f32 %v3169_v33, %v3169_v33  ;;  %v2551_v59 = vsel %vm424_vm1, %v2534_v39, 0.0  ;;  %v2497_v61 = vsel %vm424_vm1, %v3169_v33, 0.0 }
 0x1b4   : > { %2475 = vst.msk [vmem:[%s3480_s30] sm:$0xf] %vm2474_vm15, %v2859_v35  ;;  %v2860_v43 = vpack.c.bf16 %v3170_v37, %v3170_v37  ;;  %v2493_v44 = vsel %vm424_vm1, %v3170_v37, 0.0  ;;  %v2533_v46 = vmul.f32 %v3170_v37, %v3170_v37  ;;  %v2548_v51 = vsel %vm424_vm1, %v2532_v36, 0.0 }
 0x1b5   : > { %2478 = vst.msk [vmem:[%s3480_s30 + $0xc] sm:$0xf] %vm2474_vm15, %v2862_v40  ;;  %v2494_v48 = vadd.f32 %v2493_v44, %v2492_v41  ;;  %v2553_v0 = vsel %vm424_vm1, %v2535_v47, 0.0 }
 0x1b6   : > { %2476 = vst.msk [vmem:[%s3480_s30 + $0x4] sm:$0xf] %vm2474_vm15, %v2860_v43  ;;  %v2549_v52 = vsel %vm424_vm1, %v2533_v46, 0.0  ;;  %v3155_v54 = vpop.f32.mrb[4].mxu0 }
 0x1b7   : > { %v2496_v19 = vadd.f32 %v2495_v49, %v2494_v48  ;;  %v2550_v55 = vadd.f32 %v2549_v52, %v2548_v51  ;;  %v3171_v56 = vadd.f32 %v3155_v54, %v3065_v16  ;;  %v2347_v58 = vpop.f32.mrb[5].mxu0 }
 0x1b8   : > { %v3172_v60 = vadd.f32 %v2347_v58, %v1517_v17  ;;  %v3156_v62 = vpop.f32.mrb[6].mxu0 }
 0x1b9   : > { %v2552_v1 = vadd.f32 %v2551_v59, %v2550_v55  ;;  %v2865_v2 = vpack.c.bf16 %v3171_v56, %v3171_v56  ;;  %v2350_v5 = vpop.f32.mrb[7].mxu0  ;;  %v2498_v8 = vadd.f32 %v2497_v61, %v2496_v19  ;;  %v3173_v12 = vadd.f32 %v3156_v62, %v3066_v28 }
 0x1ba   : > { %v2863_v6 = vpack.c.bf16 %v3172_v60, %v3172_v60  ;;  %v2499_v10 = vsel %vm424_vm1, %v3172_v60, 0.0  ;;  %v2536_v63 = vmul.f32 %v3172_v60, %v3172_v60  ;;  %v3174_v3 = vadd.f32 %v2350_v5, %v1520_v25 }
 0x1bb   : > { %2481 = vst.msk [vmem:[%s3480_s30 + $0x18] sm:$0xf] %vm2474_vm15, %v2865_v2  ;;  %v2554_v11 = vadd.f32 %v2553_v0, %v2552_v1  ;;  %v2500_v13 = vadd.f32 %v2499_v10, %v2498_v8  ;;  %v2538_v15 = vmul.f32 %v3171_v56, %v3171_v56  ;;  %v2866_v22 = vpack.c.bf16 %v3173_v12, %v3173_v12 }
 0x1bc   : > { %2479 = vst.msk [vmem:[%s3480_s30 + $0x10] sm:$0xf] %vm2474_vm15, %v2863_v6  ;;  %v2555_v14 = vsel %vm424_vm1, %v2536_v63, 0.0  ;;  %v2864_v23 = vpack.c.bf16 %v3174_v3, %v3174_v3  ;;  %v2501_v20 = vsel %vm424_vm1, %v3174_v3, 0.0  ;;  %v2537_v27 = vmul.f32 %v3174_v3, %v3174_v3 }
 0x1bd   : > { %v2556_v21 = vadd.f32 %v2555_v14, %v2554_v11  ;;  %v3087_v42 = vpop.f32.mrb[8].mxu1  ;;  %2482 = vst.msk [vmem:[%s3480_s30 + $0x1c] sm:$0xf] %vm2474_vm15, %v2866_v22  ;;  %v2502_v38 = vadd.f32 %v2501_v20, %v2500_v13  ;;  %v2503_v50 = vsel %vm424_vm1, %v3171_v56, 0.0  ;;  %v2539_v57 = vmul.f32 %v3173_v12, %v3173_v12 }
 0x1be   : > { %v3159_v18 = vpop.f32.mrb[8].mxu0  ;;  %v1699_v45 = vpop.f32.mrb[9].mxu1  ;;  %2480 = vst.msk [vmem:[%s3480_s30 + $0x14] sm:$0xf] %vm2474_vm15, %v2864_v23  ;;  %v2557_v53 = vsel %vm424_vm1, %v2537_v27, 0.0  ;;  %v2559_v28 = vsel %vm424_vm1, %v2538_v15, 0.0 }
 0x1bf   : > { %v3175_v26 = vadd.f32 %v3159_v18, %v3087_v42  ;;  %v2363_v7 = vpop.f32.mrb[9].mxu0  ;;  %v3088_v16 = vpop.f32.mrb[10].mxu1  ;;  %v2504_v25 = vadd.f32 %v2503_v50, %v2502_v38  ;;  %v2558_v29 = vadd.f32 %v2557_v53, %v2556_v21  ;;  %v2505_v32 = vsel %vm424_vm1, %v3173_v12, 0.0 }
 0x1c0   : > { %v3176_v9 = vadd.f32 %v2363_v7, %v1699_v45  ;;  %v3160_v17 = vpop.f32.mrb[10].mxu0  ;;  %v1702_v30 = vpop.f32.mrb[11].mxu1  ;;  %v2561_v40 = vsel %vm424_vm1, %v2539_v57, 0.0 }
 0x1c1   : > { %v2869_v4 = vpack.c.bf16 %v3175_v26, %v3175_v26  ;;  %v2366_v31 = vpop.f32.mrb[11].mxu0  ;;  %v2560_v35 = vadd.f32 %v2559_v28, %v2558_v29  ;;  %v2506_v36 = vadd.f32 %v2505_v32, %v2504_v25  ;;  %v3177_v37 = vadd.f32 %v3160_v17, %v3088_v16 }
 0x1c2   : > { %v2867_v24 = vpack.c.bf16 %v3176_v9, %v3176_v9  ;;  %v2507_v33 = vsel %vm424_vm1, %v3176_v9, 0.0  ;;  %v2540_v34 = vmul.f32 %v3176_v9, %v3176_v9  ;;  %v3178_v39 = vadd.f32 %v2366_v31, %v1702_v30 }
 0x1c3   : > { %2485 = vst.msk [vmem:[%s3480_s30 + $0x28] sm:$0xf] %vm2474_vm15, %v2869_v4  ;;  %v2542_v43 = vmul.f32 %v3175_v26, %v3175_v26  ;;  %v2508_v44 = vadd.f32 %v2507_v33, %v2506_v36  ;;  %v2562_v46 = vadd.f32 %v2561_v40, %v2560_v35  ;;  %v2870_v47 = vpack.c.bf16 %v3177_v37, %v3177_v37 }
 0x1c4   : > { %2483 = vst.msk [vmem:[%s3480_s30 + $0x20] sm:$0xf] %vm2474_vm15, %v2867_v24  ;;  %v2563_v41 = vsel %vm424_vm1, %v2540_v34, 0.0  ;;  %v2868_v48 = vpack.c.bf16 %v3178_v39, %v3178_v39  ;;  %v2509_v49 = vsel %vm424_vm1, %v3178_v39, 0.0  ;;  %v2541_v51 = vmul.f32 %v3178_v39, %v3178_v39 }
 0x1c5   : > { %v3091_v52 = vpop.f32.mrb[12].mxu1  ;;  %v2564_v19 = vadd.f32 %v2563_v41, %v2562_v46  ;;  %2486 = vst.msk [vmem:[%s3480_s30 + $0x2c] sm:$0xf] %vm2474_vm15, %v2870_v47  ;;  %v2510_v55 = vadd.f32 %v2509_v49, %v2508_v44  ;;  %v2511_v60 = vsel %vm424_vm1, %v3175_v26, 0.0  ;;  %v2543_v62 = vmul.f32 %v3177_v37, %v3177_v37  ;;  %v2491_v44 = vld [vmem:[%s3470_s13] sm:$0x1] }
 0x1c6   : > { %v3163_v54 = vpop.f32.mrb[12].mxu0  ;;  %v1715_v58 = vpop.f32.mrb[13].mxu1  ;;  %2484 = vst.msk [vmem:[%s3480_s30 + $0x24] sm:$0xf] %vm2474_vm15, %v2868_v48  ;;  %v2565_v61 = vsel %vm424_vm1, %v2541_v51, 0.0  ;;  %v2567_v5 = vsel %vm424_vm1, %v2542_v43, 0.0 }
 0x1c7   : > { %v3179_v56 = vadd.f32 %v3163_v54, %v3091_v52  ;;  %v2379_v59 = vpop.f32.mrb[13].mxu0  ;;  %v3092_v1 = vpop.f32.mrb[14].mxu1  ;;  %v2512_v6 = vadd.f32 %v2511_v60, %v2510_v55  ;;  %v2566_v8 = vadd.f32 %v2565_v61, %v2564_v19  ;;  %v2513_v12 = vsel %vm424_vm1, %v3177_v37, 0.0  ;;  %v2531_v48 = vld [vmem:[%s3475_s17] sm:$0x1] }
 0x1c8   : > { %v3180_v0 = vadd.f32 %v2379_v59, %v1715_v58  ;;  %v3164_v2 = vpop.f32.mrb[14].mxu0  ;;  %v1718_v63 = vpop.f32.mrb[15].mxu1  ;;  %v2569_v20 = vsel %vm424_vm1, %v2543_v62, 0.0 }
 0x1c9   : > { %v2873_v10 = vpack.c.bf16 %v3179_v56, %v3179_v56  ;;  %v2382_v11 = vpop.f32.mrb[15].mxu0  ;;  %v2568_v15 = vadd.f32 %v2567_v5, %v2566_v8  ;;  %v2514_v21 = vadd.f32 %v2513_v12, %v2512_v6  ;;  %v3181_v22 = vadd.f32 %v3164_v2, %v3092_v1 }
 0x1ca   : > { %v2871_v3 = vpack.c.bf16 %v3180_v0, %v3180_v0  ;;  %v2515_v13 = vsel %vm424_vm1, %v3180_v0, 0.0  ;;  %v2544_v14 = vmul.f32 %v3180_v0, %v3180_v0  ;;  %v3182_v23 = vadd.f32 %v2382_v11, %v1718_v63 }
 0x1cb   : > { %2489 = vst.msk [vmem:[%s3480_s30 + $0x38] sm:$0xf] %vm2474_vm15, %v2873_v10  ;;  %v2516_v42 = vadd.f32 %v2515_v13, %v2514_v21  ;;  %v2570_v18 = vadd.f32 %v2569_v20, %v2568_v15  ;;  %v2874_v38 = vpack.c.bf16 %v3181_v22, %v3181_v22  ;;  %v2546_v26 = vmul.f32 %v3179_v56, %v3179_v56 }
 0x1cc   : > { %2487 = vst.msk [vmem:[%s3480_s30 + $0x30] sm:$0xf] %vm2474_vm15, %v2871_v3  ;;  %v2571_v27 = vsel %vm424_vm1, %v2544_v14, 0.0  ;;  %v2872_v45 = vpack.c.bf16 %v3182_v23, %v3182_v23  ;;  %v2517_v7 = vsel %vm424_vm1, %v3182_v23, 0.0  ;;  %v2545_v50 = vmul.f32 %v3182_v23, %v3182_v23 }
 0x1cd   : > { %v2572_v57 = vadd.f32 %v2571_v27, %v2570_v18  ;;  %2490 = vst.msk [vmem:[%s3480_s30 + $0x3c] sm:$0xf] %vm2474_vm15, %v2874_v38  ;;  %v2518_v53 = vadd.f32 %v2517_v7, %v2516_v42  ;;  %v2519_v9 = vsel %vm424_vm1, %v3179_v56, 0.0  ;;  %v2547_v16 = vmul.f32 %v3181_v22, %v3181_v22 }
 0x1ce   : > { %2488 = vst.msk [vmem:[%s3480_s30 + $0x34] sm:$0xf] %vm2474_vm15, %v2872_v45  ;;  %v2573_v17 = vsel %vm424_vm1, %v2545_v50, 0.0  ;;  %v2575_v29 = vsel %vm424_vm1, %v2546_v26, 0.0  ;;  %v2521_v4 = vsel %vm424_vm1, %v3181_v22, 0.0 }
 0x1cf   : > { %v2520_v28 = vadd.f32 %v2519_v9, %v2518_v53  ;;  %v2574_v25 = vadd.f32 %v2573_v17, %v2572_v57  ;;  %v2577_v32 = vsel %vm424_vm1, %v2547_v16, 0.0 }
 0x1d1   : > { %v2522_v30 = vadd.f32 %v2521_v4, %v2520_v28  ;;  %v2576_v31 = vadd.f32 %v2575_v29, %v2574_v25 }
 0x1d3   : > { %v2523_v24 = vrot.slane %v2522_v30, 4  ;;  %v2578_v33 = vadd.f32 %v2577_v32, %v2576_v31 }
 0x1d5   : > { %v2524_v34 = vadd.f32 %v2523_v24, %v2522_v30  ;;  %v2579_v35 = vrot.slane %v2578_v33, 4 }
 0x1d7   : > { %v2525_v36 = vrot.slane %v2524_v34, 2  ;;  %v2580_v37 = vadd.f32 %v2579_v35, %v2578_v33 }
 0x1d9   : > { %v2526_v39 = vadd.f32 %v2525_v36, %v2524_v34  ;;  %v2581_v40 = vrot.slane %v2580_v37, 2 }
 0x1db   : > { %v2527_v41 = vrot.slane %v2526_v39, 1  ;;  %v2582_v43 = vadd.f32 %v2581_v40, %v2580_v37 }
 0x1dd   : > { %v2528_v46 = vadd.f32 %v2527_v41, %v2526_v39  ;;  %v2583_v47 = vrot.slane %v2582_v43, 1 }
 0x1df   : > { %v2529_v49 = vadd.f32 %v2528_v46, %v2491_v44  ;;  %v2584_v51 = vadd.f32 %v2583_v47, %v2582_v43 }
 0x1e1   : > { %2530 = vst.msk [vmem:[%s3470_s13] sm:$0x1] %vm904_vm6, %v2529_v49  ;;  %v2585_v52 = vadd.f32 %v2584_v51, %v2531_v48 }
 0x1e3   : > { %2586 = vst.msk [vmem:[%s3475_s17] sm:$0x1] %vm904_vm6, %v2585_v52 }
 0x1e4 PF: > { %s16_s22 = sadd.s32 1, %s3387_s22   ;;  %s4127_s30 = sld [smem:[#allocation4_spill]] }
 0x1e5   : > { %p13_p11 = scmp.ge.s32.totalorder %s16_s22, 6   ;;  %s4128_s18 = smov %s3379_s20 }
 0x1e6   : > { %s4129_s19 = smov %s3383_s21  ;;  %s4130_s20 = smov %s4133_s23 }
 0x1e7   :  { %15 = sbr.rel (!%p13_p11) target bundleno = 3 (0x3), region = 121 }
 0x1ea   : > { %s4131_s21 = smov %s4127_s30 }

</bundles_post_ra>
